<compile_context>
chip_gen: v7x
topology: tpu7x:2x2x1
jax: 0.10.0
libtpu: 0.0.40
codegen_flags: <defaults>
</compile_context>

<pallas_src>
import numpy as np
import jax
import jax.numpy as jnp
from jax import lax
from jax.experimental import pallas as pl
from jax.experimental.pallas import tpu as pltpu


def _make_fe_kernel(C, N, PAD, shifts, center_idx, t_split):
    n_taps = len(shifts)

    def kernel(x_ref, wa_ref, wb_ref, b_ref, a_ref, m_ref, o_ref,
               xpad_ref, pa_ref, pb_ref):
        # ---- zero-padded copy of the flattened input (f32, lane-aligned) ----
        halo = jnp.zeros((C, PAD), jnp.float32)
        xpad_ref[:, :PAD] = halo
        xpad_ref[:, PAD + N:] = halo
        xpad_ref[:, PAD:PAD + N] = x_ref[0]

        # ---- de-duplicated im2col patch, built into two bf16 chunks ----------
        # Two separate scratch buffers so the chunk-1 build (VPU/vst) can
        # overlap the chunk-0 matmul (MXU): no data dependency between them.
        def build(dst_ref, row, t):
            s = shifts[t]
            tap = xpad_ref[:, PAD + s:PAD + s + N]             # (C, N) f32
            if t == center_idx:                                # mask == 1 everywhere
                dst_ref[row * C:(row + 1) * C, :] = tap.astype(jnp.bfloat16)
            else:
                m = m_ref[t]                                   # (1, N) f32, 0/1
                dst_ref[row * C:(row + 1) * C, :] = (tap * m).astype(jnp.bfloat16)

        for r in range(t_split):
            build(pa_ref, r, r)
        for r in range(n_taps - t_split):
            build(pb_ref, r, t_split + r)

        # ---- ONE fused bf16 matmul (two accumulated K-chunks) for all four
        # branches, f32 accumulation, fused bias + per-row PReLU, one store. --
        z = jnp.dot(wa_ref[...], pa_ref[...], preferred_element_type=jnp.float32)
        z = z + jnp.dot(wb_ref[...], pb_ref[...], preferred_element_type=jnp.float32)
        z = z + b_ref[...]                                     # (C, 1) bias
        y = jnp.where(z >= 0, z, a_ref[...] * z)               # per-row PReLU
        o_ref[0] = y.astype(o_ref.dtype)

    return kernel


def fe_block_2d_pallas(x, w_uv, b_uv, a_uv, w_xy, b_xy, a_xy,
                       w_ux, b_ux, a_ux, w_vy, b_vy, a_vy):
    """x: (B, C, U, V, H, W) float32.
    Conv3d weights in PyTorch layout: w_uv/w_ux: (C//4, C, 3, 3, 1),
    w_xy/w_vy: (C//4, C, 1, 3, 3).  b_*: (C//4,).  a_*: scalar PReLU params.
    Returns (B, C, U, V, H, W)."""
    B, C, U, V, H, W = x.shape
    assert C % 4 == 0
    C4 = C // 4
    N = U * V * H * W
    sizes = (U, V, H, W)
    strides = (V * H * W, H * W, W, 1)
    # branch -> (first, second) conv axis; order matches each Conv3d weight's
    # kernel-dim order and the channel order of torch.cat([uv, xy, ux, vy]).
    branch_axes = ((0, 1), (2, 3), (0, 2), (1, 3))     # uv, xy, ux, vy

    # ---- de-duplicate the 36 branch taps into 25 unique 4-D offsets ---------
    tap_id = {}
    tap_offsets = []
    branch_taps = []                                   # per branch: [(tap, k1, k2)]*9
    for (a1, a2) in branch_axes:
        taps = []
        for k1 in range(3):
            for k2 in range(3):
                off = [0, 0, 0, 0]
                off[a1] += k1 - 1
                off[a2] += k2 - 1
                off = tuple(off)
                if off not in tap_id:
                    tap_id[off] = len(tap_offsets)
                    tap_offsets.append(off)
                taps.append((tap_id[off], k1, k2))
        branch_taps.append(taps)
    n_taps = len(tap_offsets)                          # 25
    center_idx = tap_id[(0, 0, 0, 0)]
    shifts = [sum(o[ax] * strides[ax] for ax in range(4)) for o in tap_offsets]

    pad_raw = max(abs(s) for s in shifts)
    PAD = ((pad_raw + 127) // 128) * 128               # lane-align interior / center tap

    # ---- free (contiguity-preserving) reshape only ---------------------------
    x_flat = x.reshape(B, C, N).astype(jnp.float32)

    # ---- one fused (C, 25C) weight matrix (bf16), zero cols for unused taps --
    def branch_rows(w5, squeeze_axis, taps):
        w4 = jnp.squeeze(w5, axis=squeeze_axis).astype(jnp.float32)   # (C4, C, 3, 3)
        lut = {t: (k1, k2) for (t, k1, k2) in taps}
        blocks = []
        for t in range(n_taps):
            if t in lut:
                k1, k2 = lut[t]
                blocks.append(w4[:, :, k1, k2])
            else:
                blocks.append(jnp.zeros((C4, C), jnp.float32))
        return jnp.concatenate(blocks, axis=1)                        # (C4, 25C)

    w_fused = jnp.concatenate(
        [branch_rows(w_uv, 4, branch_taps[0]),
         branch_rows(w_xy, 2, branch_taps[1]),
         branch_rows(w_ux, 4, branch_taps[2]),
         branch_rows(w_vy, 2, branch_taps[3])], axis=0).astype(jnp.bfloat16)

    t_split = (n_taps + 1) // 2                        # 13 / 12 tap chunks
    w_a = w_fused[:, :t_split * C]                     # (C, 13C) bf16
    w_b = w_fused[:, t_split * C:]                     # (C, 12C) bf16

    b_all = jnp.concatenate([b_uv, b_xy, b_ux, b_vy]).reshape(C, 1).astype(jnp.float32)
    a_all = jnp.concatenate(
        [jnp.full((C4,), jnp.asarray(a, jnp.float32))
         for a in (a_uv, a_xy, a_ux, a_vy)]).reshape(C, 1).astype(jnp.float32)

    # ---- host-precomputed per-tap zero-padding masks (grid-invariant) --------
    p = np.arange(N)
    idx = np.stack([p // (V * H * W), (p // (H * W)) % V, (p // W) % H, p % W])
    masks_np = np.ones((n_taps, 1, N), np.float32)
    for t, off in enumerate(tap_offsets):
        m = np.ones((N,), bool)
        for ax in range(4):
            if off[ax] != 0:
                sh = idx[ax] + off[ax]
                m &= (sh >= 0) & (sh < sizes[ax])
        masks_np[t, 0] = m
    masks = jnp.asarray(masks_np, jnp.float32)

    # ---- explicit VMEM budget (v7x has only 64 MiB physical) -----------------
    def tile_bytes(shape, dtype):
        it = np.dtype(dtype).itemsize
        sub = {4: 8, 2: 16, 1: 32}[it]
        s = list(shape)
        s[-1] = -(-s[-1] // 128) * 128
        s[-2] = -(-s[-2] // sub) * sub
        return int(np.prod(s)) * it

    scratch_bytes = (tile_bytes((C, N + 2 * PAD), jnp.float32)
                     + tile_bytes((t_split * C, N), jnp.bfloat16)
                     + tile_bytes(((n_taps - t_split) * C, N), jnp.bfloat16))
    block_bytes = (2 * tile_bytes((C, N), jnp.float32)                 # x + out
                   + tile_bytes((C, t_split * C), jnp.bfloat16)
                   + tile_bytes((C, (n_taps - t_split) * C), jnp.bfloat16)
                   + 2 * tile_bytes((C, 1), jnp.float32)
                   + n_taps * tile_bytes((1, N), jnp.float32))
    vmem_limit = min(int(1.5 * (scratch_bytes + 2 * block_bytes)) + (8 << 20),
                     100 * 1024 * 1024)

    kernel = _make_fe_kernel(C, N, PAD, shifts, center_idx, t_split)

    out_flat = pl.pallas_call(
        kernel,
        out_shape=jax.ShapeDtypeStruct((B, C, N), jnp.float32),
        grid_spec=pltpu.PrefetchScalarGridSpec(
            num_scalar_prefetch=0,
            grid=(B,),
            in_specs=[
                pl.BlockSpec((1, C, N), lambda b: (b, 0, 0)),              # x
                pl.BlockSpec((C, t_split * C), lambda b: (0, 0)),          # W chunk A
                pl.BlockSpec((C, (n_taps - t_split) * C), lambda b: (0, 0)),  # W chunk B
                pl.BlockSpec((C, 1), lambda b: (0, 0)),                    # bias
                pl.BlockSpec((C, 1), lambda b: (0, 0)),                    # PReLU alpha
                pl.BlockSpec((n_taps, 1, N), lambda b: (0, 0, 0)),         # tap masks
            ],
            out_specs=pl.BlockSpec((1, C, N), lambda b: (b, 0, 0)),
            scratch_shapes=[
                pltpu.VMEM((C, N + 2 * PAD), jnp.float32),                 # padded x
                pltpu.VMEM((t_split * C, N), jnp.bfloat16),                # patch A
                pltpu.VMEM(((n_taps - t_split) * C, N), jnp.bfloat16),     # patch B
            ],
        ),
        compiler_params=pltpu.CompilerParams(
            dimension_semantics=("parallel",),
            vmem_limit_bytes=vmem_limit),
    )(x_flat, w_a, w_b, b_all, a_all, masks)

    return out_flat.reshape(B, C, U, V, H, W)


def _reference(x, w_uv, b_uv, a_uv, w_xy, b_xy, a_xy,
               w_ux, b_ux, a_ux, w_vy, b_vy, a_vy):
    """Pure-JAX mirror of the PyTorch FE_block_2d forward."""
    B, C, U, V, H, W = x.shape
    C4 = C // 4

    def conv3d(inp, w, b, pad):
        y = lax.conv_general_dilated(
            inp, w, window_strides=(1, 1, 1), padding=pad,
            dimension_numbers=("NCDHW", "OIDHW", "NCDHW"),
            precision=lax.Precision.HIGHEST)
        return y + b.reshape(1, -1, 1, 1, 1)

    def prelu(y, a):
        return jnp.where(y >= 0, y, a * y)

    x1 = x.reshape(B, C, U, V, H * W)
    uv = prelu(conv3d(x1, w_uv, b_uv, ((1, 1), (1, 1), (0, 0))), a_uv)
    uv = uv.reshape(B, C4, U, V, H, W)

    x2 = x.reshape(B, C, U * V, H, W)
    xy = prelu(conv3d(x2, w_xy, b_xy, ((0, 0), (1, 1), (1, 1))), a_xy)
    xy = xy.reshape(B, C4, U, V, H, W)

    xp = jnp.transpose(x, (0, 1, 2, 4, 3, 5))                 # (B, C, U, H, V, W)
    x3 = xp.reshape(B, C, U, H, V * W)
    ux = prelu(conv3d(x3, w_ux, b_ux, ((1, 1), (1, 1), (0, 0))), a_ux)
    ux = jnp.transpose(ux.reshape(B, C4, U, H, V, W), (0, 1, 2, 4, 3, 5))

    x4 = xp.reshape(B, C, U * H, V, W)
    vy = prelu(conv3d(x4, w_vy, b_vy, ((0, 0), (1, 1), (1, 1))), a_vy)
    vy = jnp.transpose(vy.reshape(B, C4, U, H, V, W), (0, 1, 2, 4, 3, 5))

    return jnp.concatenate([uv, xy, ux, vy], axis=1)


if __name__ == "__main__":
    # Module default in_channel=32; small angular/spatial extents.
    B, C, U, V, H, W = 2, 32, 3, 3, 8, 8
    C4 = C // 4

    key = jax.random.PRNGKey(0)
    keys = jax.random.split(key, 9)

    x = jax.random.normal(keys[0], (B, C, U, V, H, W), jnp.float32)

    fan_in = C * 3 * 3
    bound = 1.0 / (fan_in ** 0.5)
    w_uv = jax.random.uniform(keys[1], (C4, C, 3, 3, 1), jnp.float32, -bound, bound)
    w_xy = jax.random.uniform(keys[2], (C4, C, 1, 3, 3), jnp.float32, -bound, bound)
    w_ux = jax.random.uniform(keys[3], (C4, C, 3, 3, 1), jnp.float32, -bound, bound)
    w_vy = jax.random.uniform(keys[4], (C4, C, 1, 3, 3), jnp.float32, -bound, bound)
    b_uv = jax.random.uniform(keys[5], (C4,), jnp.float32, -bound, bound)
    b_xy = jax.random.uniform(keys[6], (C4,), jnp.float32, -bound, bound)
    b_ux = jax.random.uniform(keys[7], (C4,), jnp.float32, -bound, bound)
    b_vy = jax.random.uniform(keys[8], (C4,), jnp.float32, -bound, bound)
    a_uv, a_xy, a_ux, a_vy = (jnp.float32(0.25), jnp.float32(0.1),
                              jnp.float32(0.2), jnp.float32(0.3))

    out = fe_block_2d_pallas(x, w_uv, b_uv, a_uv, w_xy, b_xy, a_xy,
                             w_ux, b_ux, a_ux, w_vy, b_vy, a_vy)
    out = jax.block_until_ready(out)

    ref = _reference(x, w_uv, b_uv, a_uv, w_xy, b_xy, a_xy,
                     w_ux, b_ux, a_ux, w_vy, b_vy, a_vy)

    assert out.shape == (B, C, U, V, H, W)
    # Tolerance loosened vs the pure-f32 version because the im2col patch and
    # weights are bf16 (per perf review); accumulation / bias / PReLU stay f32.
    err = float(jnp.max(jnp.abs(out - ref)))
    assert jnp.allclose(out, ref, atol=2e-2, rtol=2e-2), err
    print("KERNEL_OK")
</pallas_src>

<mosaic_0001>
module attributes {stable_mosaic.version = 11 : i64} {
  func.func @kernel(%arg0: i32, %arg1: memref<1x32x576xf32, #tpu.memory_space<vmem>>, %arg2: memref<32x416xbf16, #tpu.memory_space<vmem>>, %arg3: memref<32x384xbf16, #tpu.memory_space<vmem>>, %arg4: memref<32x1xf32, #tpu.memory_space<vmem>>, %arg5: memref<32x1xf32, #tpu.memory_space<vmem>>, %arg6: memref<25x1x576xf32, #tpu.memory_space<vmem>>, %arg7: memref<1x32x576xf32, #tpu.memory_space<vmem>>, %arg8: memref<32x1088xf32, #tpu.memory_space<vmem>>, %arg9: memref<416x576xbf16, #tpu.memory_space<vmem>>, %arg10: memref<384x576xbf16, #tpu.memory_space<vmem>>) attributes {dimension_semantics = [#tpu.dimension_semantics<parallel>], iteration_bounds = array<i64: 2>, scalar_prefetch = 0 : i64, scratch_operands = 3 : i64, tpu.core_type = #tpu.core_type<tc>, window_params = [{transform_indices = @transform_0, window_bounds = array<i64: 1, 32, 576>}, {pipeline_mode = #tpu.pipeline_mode<synchronous>, transform_indices = @transform_1, window_bounds = array<i64: 32, 416>}, {pipeline_mode = #tpu.pipeline_mode<synchronous>, transform_indices = @transform_2, window_bounds = array<i64: 32, 384>}, {pipeline_mode = #tpu.pipeline_mode<synchronous>, transform_indices = @transform_3, window_bounds = array<i64: 32, 1>}, {pipeline_mode = #tpu.pipeline_mode<synchronous>, transform_indices = @transform_4, window_bounds = array<i64: 32, 1>}, {pipeline_mode = #tpu.pipeline_mode<synchronous>, transform_indices = @transform_5, window_bounds = array<i64: 25, 1, 576>}, {transform_indices = @transform_6, window_bounds = array<i64: 1, 32, 576>}]} {
    %cst = arith.constant 0.000000e+00 : f32
    %0 = vector.broadcast %cst : f32 to vector<32x256xf32>
    %c0 = arith.constant 0 : index
    %c0_0 = arith.constant 0 : index
    %1 = vector.load %arg8[%c0, %c0_0] : memref<32x1088xf32, #tpu.memory_space<vmem>>, vector<32x256xf32>
    tpu.vector_store %arg8[%c0, %c0_0], %0 {strides = array<i32>} : memref<32x1088xf32, #tpu.memory_space<vmem>>, vector<32x256xf32>,
    %c0_1 = arith.constant 0 : index
    %c832 = arith.constant 832 : index
    %2 = vector.load %arg8[%c0_1, %c832] : memref<32x1088xf32, #tpu.memory_space<vmem>>, vector<32x256xf32>
    tpu.vector_store %arg8[%c0_1, %c832], %0 {strides = array<i32>} : memref<32x1088xf32, #tpu.memory_space<vmem>>, vector<32x256xf32>,
    %c0_2 = arith.constant 0 : index
    %c0_3 = arith.constant 0 : index
    %c0_4 = arith.constant 0 : index
    %3 = vector.load %arg1[%c0_2, %c0_3, %c0_4] : memref<1x32x576xf32, #tpu.memory_space<vmem>>, vector<1x32x576xf32>
    %4 = vector.shape_cast %3 : vector<1x32x576xf32> to vector<32x576xf32>
    %c0_5 = arith.constant 0 : index
    %c256 = arith.constant 256 : index
    %5 = vector.load %arg8[%c0_5, %c256] : memref<32x1088xf32, #tpu.memory_space<vmem>>, vector<32x576xf32>
    tpu.vector_store %arg8[%c0_5, %c256], %4 {strides = array<i32>} : memref<32x1088xf32, #tpu.memory_space<vmem>>, vector<32x576xf32>,
    %c0_6 = arith.constant 0 : index
    %c0_7 = arith.constant 0 : index
    %6 = vector.load %arg8[%c0_6, %c0_7] : memref<32x1088xf32, #tpu.memory_space<vmem>>, vector<32x576xf32>
    %c0_8 = arith.constant 0 : index
    %c0_9 = arith.constant 0 : index
    %c0_10 = arith.constant 0 : index
    %7 = vector.load %arg6[%c0_8, %c0_9, %c0_10] : memref<25x1x576xf32, #tpu.memory_space<vmem>>, vector<1x1x576xf32>
    %8 = vector.shape_cast %7 : vector<1x1x576xf32> to vector<1x576xf32>
    %9 = vector.broadcast %8 : vector<1x576xf32> to vector<32x576xf32>
    %10 = arith.mulf %6, %9 : vector<32x576xf32>
    %11 = arith.truncf %10 : vector<32x576xf32> to vector<32x576xbf16>
    %c0_11 = arith.constant 0 : index
    %c0_12 = arith.constant 0 : index
    %12 = vector.load %arg9[%c0_11, %c0_12] : memref<416x576xbf16, #tpu.memory_space<vmem>>, vector<32x576xbf16>
    tpu.vector_store %arg9[%c0_11, %c0_12], %11 {strides = array<i32>} : memref<416x576xbf16, #tpu.memory_space<vmem>>, vector<32x576xbf16>,
    %c0_13 = arith.constant 0 : index
    %c64 = arith.constant 64 : index
    %13 = vector.load %arg8[%c0_13, %c64] : memref<32x1088xf32, #tpu.memory_space<vmem>>, vector<32x576xf32>
    %c1 = arith.constant 1 : index
    %c0_14 = arith.constant 0 : index
    %c0_15 = arith.constant 0 : index
    %14 = vector.load %arg6[%c1, %c0_14, %c0_15] : memref<25x1x576xf32, #tpu.memory_space<vmem>>, vector<1x1x576xf32>
    %15 = vector.shape_cast %14 : vector<1x1x576xf32> to vector<1x576xf32>
    %16 = vector.broadcast %15 : vector<1x576xf32> to vector<32x576xf32>
    %17 = arith.mulf %13, %16 : vector<32x576xf32>
    %18 = arith.truncf %17 : vector<32x576xf32> to vector<32x576xbf16>
    %c32 = arith.constant 32 : index
    %c0_16 = arith.constant 0 : index
    %19 = vector.load %arg9[%c32, %c0_16] : memref<416x576xbf16, #tpu.memory_space<vmem>>, vector<32x576xbf16>
    tpu.vector_store %arg9[%c32, %c0_16], %18 {strides = array<i32>} : memref<416x576xbf16, #tpu.memory_space<vmem>>, vector<32x576xbf16>,
    %c0_17 = arith.constant 0 : index
    %c128 = arith.constant 128 : index
    %20 = vector.load %arg8[%c0_17, %c128] : memref<32x1088xf32, #tpu.memory_space<vmem>>, vector<32x576xf32>
    %c2 = arith.constant 2 : index
    %c0_18 = arith.constant 0 : index
    %c0_19 = arith.constant 0 : index
    %21 = vector.load %arg6[%c2, %c0_18, %c0_19] : memref<25x1x576xf32, #tpu.memory_space<vmem>>, vector<1x1x576xf32>
    %22 = vector.shape_cast %21 : vector<1x1x576xf32> to vector<1x576xf32>
    %23 = vector.broadcast %22 : vector<1x576xf32> to vector<32x576xf32>
    %24 = arith.mulf %20, %23 : vector<32x576xf32>
    %25 = arith.truncf %24 : vector<32x576xf32> to vector<32x576xbf16>
    %c64_20 = arith.constant 64 : index
    %c0_21 = arith.constant 0 : index
    %26 = vector.load %arg9[%c64_20, %c0_21] : memref<416x576xbf16, #tpu.memory_space<vmem>>, vector<32x576xbf16>
    tpu.vector_store %arg9[%c64_20, %c0_21], %25 {strides = array<i32>} : memref<416x576xbf16, #tpu.memory_space<vmem>>, vector<32x576xbf16>,
    %c0_22 = arith.constant 0 : index
    %c192 = arith.constant 192 : index
    %27 = vector.load %arg8[%c0_22, %c192] : memref<32x1088xf32, #tpu.memory_space<vmem>>, vector<32x576xf32>
    %c3 = arith.constant 3 : index
    %c0_23 = arith.constant 0 : index
    %c0_24 = arith.constant 0 : index
    %28 = vector.load %arg6[%c3, %c0_23, %c0_24] : memref<25x1x576xf32, #tpu.memory_space<vmem>>, vector<1x1x576xf32>
    %29 = vector.shape_cast %28 : vector<1x1x576xf32> to vector<1x576xf32>
    %30 = vector.broadcast %29 : vector<1x576xf32> to vector<32x576xf32>
    %31 = arith.mulf %27, %30 : vector<32x576xf32>
    %32 = arith.truncf %31 : vector<32x576xf32> to vector<32x576xbf16>
    %c96 = arith.constant 96 : index
    %c0_25 = arith.constant 0 : index
    %33 = vector.load %arg9[%c96, %c0_25] : memref<416x576xbf16, #tpu.memory_space<vmem>>, vector<32x576xbf16>
    tpu.vector_store %arg9[%c96, %c0_25], %32 {strides = array<i32>} : memref<416x576xbf16, #tpu.memory_space<vmem>>, vector<32x576xbf16>,
    %c0_26 = arith.constant 0 : index
    %c256_27 = arith.constant 256 : index
    %34 = vector.load %arg8[%c0_26, %c256_27] : memref<32x1088xf32, #tpu.memory_space<vmem>>, vector<32x576xf32>
    %35 = arith.truncf %34 : vector<32x576xf32> to vector<32x576xbf16>
    %c128_28 = arith.constant 128 : index
    %c0_29 = arith.constant 0 : index
    %36 = vector.load %arg9[%c128_28, %c0_29] : memref<416x576xbf16, #tpu.memory_space<vmem>>, vector<32x576xbf16>
    tpu.vector_store %arg9[%c128_28, %c0_29], %35 {strides = array<i32>} : memref<416x576xbf16, #tpu.memory_space<vmem>>, vector<32x576xbf16>,
    %c0_30 = arith.constant 0 : index
    %c320 = arith.constant 320 : index
    %37 = vector.load %arg8[%c0_30, %c320] : memref<32x1088xf32, #tpu.memory_space<vmem>>, vector<32x576xf32>
    %c5 = arith.constant 5 : index
    %c0_31 = arith.constant 0 : index
    %c0_32 = arith.constant 0 : index
    %38 = vector.load %arg6[%c5, %c0_31, %c0_32] : memref<25x1x576xf32, #tpu.memory_space<vmem>>, vector<1x1x576xf32>
    %39 = vector.shape_cast %38 : vector<1x1x576xf32> to vector<1x576xf32>
    %40 = vector.broadcast %39 : vector<1x576xf32> to vector<32x576xf32>
    %41 = arith.mulf %37, %40 : vector<32x576xf32>
    %42 = arith.truncf %41 : vector<32x576xf32> to vector<32x576xbf16>
    %c160 = arith.constant 160 : index
    %c0_33 = arith.constant 0 : index
    %43 = vector.load %arg9[%c160, %c0_33] : memref<416x576xbf16, #tpu.memory_space<vmem>>, vector<32x576xbf16>
    tpu.vector_store %arg9[%c160, %c0_33], %42 {strides = array<i32>} : memref<416x576xbf16, #tpu.memory_space<vmem>>, vector<32x576xbf16>,
    %c0_34 = arith.constant 0 : index
    %c384 = arith.constant 384 : index
    %44 = vector.load %arg8[%c0_34, %c384] : memref<32x1088xf32, #tpu.memory_space<vmem>>, vector<32x576xf32>
    %c6 = arith.constant 6 : index
    %c0_35 = arith.constant 0 : index
    %c0_36 = arith.constant 0 : index
    %45 = vector.load %arg6[%c6, %c0_35, %c0_36] : memref<25x1x576xf32, #tpu.memory_space<vmem>>, vector<1x1x576xf32>
    %46 = vector.shape_cast %45 : vector<1x1x576xf32> to vector<1x576xf32>
    %47 = vector.broadcast %46 : vector<1x576xf32> to vector<32x576xf32>
    %48 = arith.mulf %44, %47 : vector<32x576xf32>
    %49 = arith.truncf %48 : vector<32x576xf32> to vector<32x576xbf16>
    %c192_37 = arith.constant 192 : index
    %c0_38 = arith.constant 0 : index
    %50 = vector.load %arg9[%c192_37, %c0_38] : memref<416x576xbf16, #tpu.memory_space<vmem>>, vector<32x576xbf16>
    tpu.vector_store %arg9[%c192_37, %c0_38], %49 {strides = array<i32>} : memref<416x576xbf16, #tpu.memory_space<vmem>>, vector<32x576xbf16>,
    %c0_39 = arith.constant 0 : index
    %c448 = arith.constant 448 : index
    %51 = vector.load %arg8[%c0_39, %c448] : memref<32x1088xf32, #tpu.memory_space<vmem>>, vector<32x576xf32>
    %c7 = arith.constant 7 : index
    %c0_40 = arith.constant 0 : index
    %c0_41 = arith.constant 0 : index
    %52 = vector.load %arg6[%c7, %c0_40, %c0_41] : memref<25x1x576xf32, #tpu.memory_space<vmem>>, vector<1x1x576xf32>
    %53 = vector.shape_cast %52 : vector<1x1x576xf32> to vector<1x576xf32>
    %54 = vector.broadcast %53 : vector<1x576xf32> to vector<32x576xf32>
    %55 = arith.mulf %51, %54 : vector<32x576xf32>
    %56 = arith.truncf %55 : vector<32x576xf32> to vector<32x576xbf16>
    %c224 = arith.constant 224 : index
    %c0_42 = arith.constant 0 : index
    %57 = vector.load %arg9[%c224, %c0_42] : memref<416x576xbf16, #tpu.memory_space<vmem>>, vector<32x576xbf16>
    tpu.vector_store %arg9[%c224, %c0_42], %56 {strides = array<i32>} : memref<416x576xbf16, #tpu.memory_space<vmem>>, vector<32x576xbf16>,
    %c0_43 = arith.constant 0 : index
    %c512 = arith.constant 512 : index
    %58 = vector.load %arg8[%c0_43, %c512] : memref<32x1088xf32, #tpu.memory_space<vmem>>, vector<32x576xf32>
    %c8 = arith.constant 8 : index
    %c0_44 = arith.constant 0 : index
    %c0_45 = arith.constant 0 : index
    %59 = vector.load %arg6[%c8, %c0_44, %c0_45] : memref<25x1x576xf32, #tpu.memory_space<vmem>>, vector<1x1x576xf32>
    %60 = vector.shape_cast %59 : vector<1x1x576xf32> to vector<1x576xf32>
    %61 = vector.broadcast %60 : vector<1x576xf32> to vector<32x576xf32>
    %62 = arith.mulf %58, %61 : vector<32x576xf32>
    %63 = arith.truncf %62 : vector<32x576xf32> to vector<32x576xbf16>
    %c256_46 = arith.constant 256 : index
    %c0_47 = arith.constant 0 : index
    %64 = vector.load %arg9[%c256_46, %c0_47] : memref<416x576xbf16, #tpu.memory_space<vmem>>, vector<32x576xbf16>
    tpu.vector_store %arg9[%c256_46, %c0_47], %63 {strides = array<i32>} : memref<416x576xbf16, #tpu.memory_space<vmem>>, vector<32x576xbf16>,
    %c0_48 = arith.constant 0 : index
    %c247 = arith.constant 247 : index
    %65 = vector.load %arg8[%c0_48, %c247] : memref<32x1088xf32, #tpu.memory_space<vmem>>, vector<32x576xf32>
    %c9 = arith.constant 9 : index
    %c0_49 = arith.constant 0 : index
    %c0_50 = arith.constant 0 : index
    %66 = vector.load %arg6[%c9, %c0_49, %c0_50] : memref<25x1x576xf32, #tpu.memory_space<vmem>>, vector<1x1x576xf32>
    %67 = vector.shape_cast %66 : vector<1x1x576xf32> to vector<1x576xf32>
    %68 = vector.broadcast %67 : vector<1x576xf32> to vector<32x576xf32>
    %69 = arith.mulf %65, %68 : vector<32x576xf32>
    %70 = arith.truncf %69 : vector<32x576xf32> to vector<32x576xbf16>
    %c288 = arith.constant 288 : index
    %c0_51 = arith.constant 0 : index
    %71 = vector.load %arg9[%c288, %c0_51] : memref<416x576xbf16, #tpu.memory_space<vmem>>, vector<32x576xbf16>
    tpu.vector_store %arg9[%c288, %c0_51], %70 {strides = array<i32>} : memref<416x576xbf16, #tpu.memory_space<vmem>>, vector<32x576xbf16>,
    %c0_52 = arith.constant 0 : index
    %c248 = arith.constant 248 : index
    %72 = vector.load %arg8[%c0_52, %c248] : memref<32x1088xf32, #tpu.memory_space<vmem>>, vector<32x576xf32>
    %c10 = arith.constant 10 : index
    %c0_53 = arith.constant 0 : index
    %c0_54 = arith.constant 0 : index
    %73 = vector.load %arg6[%c10, %c0_53, %c0_54] : memref<25x1x576xf32, #tpu.memory_space<vmem>>, vector<1x1x576xf32>
    %74 = vector.shape_cast %73 : vector<1x1x576xf32> to vector<1x576xf32>
    %75 = vector.broadcast %74 : vector<1x576xf32> to vector<32x576xf32>
    %76 = arith.mulf %72, %75 : vector<32x576xf32>
    %77 = arith.truncf %76 : vector<32x576xf32> to vector<32x576xbf16>
    %c320_55 = arith.constant 320 : index
    %c0_56 = arith.constant 0 : index
    %78 = vector.load %arg9[%c320_55, %c0_56] : memref<416x576xbf16, #tpu.memory_space<vmem>>, vector<32x576xbf16>
    tpu.vector_store %arg9[%c320_55, %c0_56], %77 {strides = array<i32>} : memref<416x576xbf16, #tpu.memory_space<vmem>>, vector<32x576xbf16>,
    %c0_57 = arith.constant 0 : index
    %c249 = arith.constant 249 : index
    %79 = vector.load %arg8[%c0_57, %c249] : memref<32x1088xf32, #tpu.memory_space<vmem>>, vector<32x576xf32>
    %c11 = arith.constant 11 : index
    %c0_58 = arith.constant 0 : index
    %c0_59 = arith.constant 0 : index
    %80 = vector.load %arg6[%c11, %c0_58, %c0_59] : memref<25x1x576xf32, #tpu.memory_space<vmem>>, vector<1x1x576xf32>
    %81 = vector.shape_cast %80 : vector<1x1x576xf32> to vector<1x576xf32>
    %82 = vector.broadcast %81 : vector<1x576xf32> to vector<32x576xf32>
    %83 = arith.mulf %79, %82 : vector<32x576xf32>
    %84 = arith.truncf %83 : vector<32x576xf32> to vector<32x576xbf16>
    %c352 = arith.constant 352 : index
    %c0_60 = arith.constant 0 : index
    %85 = vector.load %arg9[%c352, %c0_60] : memref<416x576xbf16, #tpu.memory_space<vmem>>, vector<32x576xbf16>
    tpu.vector_store %arg9[%c352, %c0_60], %84 {strides = array<i32>} : memref<416x576xbf16, #tpu.memory_space<vmem>>, vector<32x576xbf16>,
    %c0_61 = arith.constant 0 : index
    %c255 = arith.constant 255 : index
    %86 = vector.load %arg8[%c0_61, %c255] : memref<32x1088xf32, #tpu.memory_space<vmem>>, vector<32x576xf32>
    %c12 = arith.constant 12 : index
    %c0_62 = arith.constant 0 : index
    %c0_63 = arith.constant 0 : index
    %87 = vector.load %arg6[%c12, %c0_62, %c0_63] : memref<25x1x576xf32, #tpu.memory_space<vmem>>, vector<1x1x576xf32>
    %88 = vector.shape_cast %87 : vector<1x1x576xf32> to vector<1x576xf32>
    %89 = vector.broadcast %88 : vector<1x576xf32> to vector<32x576xf32>
    %90 = arith.mulf %86, %89 : vector<32x576xf32>
    %91 = arith.truncf %90 : vector<32x576xf32> to vector<32x576xbf16>
    %c384_64 = arith.constant 384 : index
    %c0_65 = arith.constant 0 : index
    %92 = vector.load %arg9[%c384_64, %c0_65] : memref<416x576xbf16, #tpu.memory_space<vmem>>, vector<32x576xbf16>
    tpu.vector_store %arg9[%c384_64, %c0_65], %91 {strides = array<i32>} : memref<416x576xbf16, #tpu.memory_space<vmem>>, vector<32x576xbf16>,
    %c0_66 = arith.constant 0 : index
    %c257 = arith.constant 257 : index
    %93 = vector.load %arg8[%c0_66, %c257] : memref<32x1088xf32, #tpu.memory_space<vmem>>, vector<32x576xf32>
    %c13 = arith.constant 13 : index
    %c0_67 = arith.constant 0 : index
    %c0_68 = arith.constant 0 : index
    %94 = vector.load %arg6[%c13, %c0_67, %c0_68] : memref<25x1x576xf32, #tpu.memory_space<vmem>>, vector<1x1x576xf32>
    %95 = vector.shape_cast %94 : vector<1x1x576xf32> to vector<1x576xf32>
    %96 = vector.broadcast %95 : vector<1x576xf32> to vector<32x576xf32>
    %97 = arith.mulf %93, %96 : vector<32x576xf32>
    %98 = arith.truncf %97 : vector<32x576xf32> to vector<32x576xbf16>
    %c0_69 = arith.constant 0 : index
    %c0_70 = arith.constant 0 : index
    %99 = vector.load %arg10[%c0_69, %c0_70] : memref<384x576xbf16, #tpu.memory_space<vmem>>, vector<32x576xbf16>
    tpu.vector_store %arg10[%c0_69, %c0_70], %98 {strides = array<i32>} : memref<384x576xbf16, #tpu.memory_space<vmem>>, vector<32x576xbf16>,
    %c0_71 = arith.constant 0 : index
    %c263 = arith.constant 263 : index
    %100 = vector.load %arg8[%c0_71, %c263] : memref<32x1088xf32, #tpu.memory_space<vmem>>, vector<32x576xf32>
    %c14 = arith.constant 14 : index
    %c0_72 = arith.constant 0 : index
    %c0_73 = arith.constant 0 : index
    %101 = vector.load %arg6[%c14, %c0_72, %c0_73] : memref<25x1x576xf32, #tpu.memory_space<vmem>>, vector<1x1x576xf32>
    %102 = vector.shape_cast %101 : vector<1x1x576xf32> to vector<1x576xf32>
    %103 = vector.broadcast %102 : vector<1x576xf32> to vector<32x576xf32>
    %104 = arith.mulf %100, %103 : vector<32x576xf32>
    %105 = arith.truncf %104 : vector<32x576xf32> to vector<32x576xbf16>
    %c32_74 = arith.constant 32 : index
    %c0_75 = arith.constant 0 : index
    %106 = vector.load %arg10[%c32_74, %c0_75] : memref<384x576xbf16, #tpu.memory_space<vmem>>, vector<32x576xbf16>
    tpu.vector_store %arg10[%c32_74, %c0_75], %105 {strides = array<i32>} : memref<384x576xbf16, #tpu.memory_space<vmem>>, vector<32x576xbf16>,
    %c0_76 = arith.constant 0 : index
    %c264 = arith.constant 264 : index
    %107 = vector.load %arg8[%c0_76, %c264] : memref<32x1088xf32, #tpu.memory_space<vmem>>, vector<32x576xf32>
    %c15 = arith.constant 15 : index
    %c0_77 = arith.constant 0 : index
    %c0_78 = arith.constant 0 : index
    %108 = vector.load %arg6[%c15, %c0_77, %c0_78] : memref<25x1x576xf32, #tpu.memory_space<vmem>>, vector<1x1x576xf32>
    %109 = vector.shape_cast %108 : vector<1x1x576xf32> to vector<1x576xf32>
    %110 = vector.broadcast %109 : vector<1x576xf32> to vector<32x576xf32>
    %111 = arith.mulf %107, %110 : vector<32x576xf32>
    %112 = arith.truncf %111 : vector<32x576xf32> to vector<32x576xbf16>
    %c64_79 = arith.constant 64 : index
    %c0_80 = arith.constant 0 : index
    %113 = vector.load %arg10[%c64_79, %c0_80] : memref<384x576xbf16, #tpu.memory_space<vmem>>, vector<32x576xbf16>
    tpu.vector_store %arg10[%c64_79, %c0_80], %112 {strides = array<i32>} : memref<384x576xbf16, #tpu.memory_space<vmem>>, vector<32x576xbf16>,
    %c0_81 = arith.constant 0 : index
    %c265 = arith.constant 265 : index
    %114 = vector.load %arg8[%c0_81, %c265] : memref<32x1088xf32, #tpu.memory_space<vmem>>, vector<32x576xf32>
    %c16 = arith.constant 16 : index
    %c0_82 = arith.constant 0 : index
    %c0_83 = arith.constant 0 : index
    %115 = vector.load %arg6[%c16, %c0_82, %c0_83] : memref<25x1x576xf32, #tpu.memory_space<vmem>>, vector<1x1x576xf32>
    %116 = vector.shape_cast %115 : vector<1x1x576xf32> to vector<1x576xf32>
    %117 = vector.broadcast %116 : vector<1x576xf32> to vector<32x576xf32>
    %118 = arith.mulf %114, %117 : vector<32x576xf32>
    %119 = arith.truncf %118 : vector<32x576xf32> to vector<32x576xbf16>
    %c96_84 = arith.constant 96 : index
    %c0_85 = arith.constant 0 : index
    %120 = vector.load %arg10[%c96_84, %c0_85] : memref<384x576xbf16, #tpu.memory_space<vmem>>, vector<32x576xbf16>
    tpu.vector_store %arg10[%c96_84, %c0_85], %119 {strides = array<i32>} : memref<384x576xbf16, #tpu.memory_space<vmem>>, vector<32x576xbf16>,
    %c0_86 = arith.constant 0 : index
    %c56 = arith.constant 56 : index
    %121 = vector.load %arg8[%c0_86, %c56] : memref<32x1088xf32, #tpu.memory_space<vmem>>, vector<32x576xf32>
    %c17 = arith.constant 17 : index
    %c0_87 = arith.constant 0 : index
    %c0_88 = arith.constant 0 : index
    %122 = vector.load %arg6[%c17, %c0_87, %c0_88] : memref<25x1x576xf32, #tpu.memory_space<vmem>>, vector<1x1x576xf32>
    %123 = vector.shape_cast %122 : vector<1x1x576xf32> to vector<1x576xf32>
    %124 = vector.broadcast %123 : vector<1x576xf32> to vector<32x576xf32>
    %125 = arith.mulf %121, %124 : vector<32x576xf32>
    %126 = arith.truncf %125 : vector<32x576xf32> to vector<32x576xbf16>
    %c128_89 = arith.constant 128 : index
    %c0_90 = arith.constant 0 : index
    %127 = vector.load %arg10[%c128_89, %c0_90] : memref<384x576xbf16, #tpu.memory_space<vmem>>, vector<32x576xbf16>
    tpu.vector_store %arg10[%c128_89, %c0_90], %126 {strides = array<i32>} : memref<384x576xbf16, #tpu.memory_space<vmem>>, vector<32x576xbf16>,
    %c0_91 = arith.constant 0 : index
    %c72 = arith.constant 72 : index
    %128 = vector.load %arg8[%c0_91, %c72] : memref<32x1088xf32, #tpu.memory_space<vmem>>, vector<32x576xf32>
    %c18 = arith.constant 18 : index
    %c0_92 = arith.constant 0 : index
    %c0_93 = arith.constant 0 : index
    %129 = vector.load %arg6[%c18, %c0_92, %c0_93] : memref<25x1x576xf32, #tpu.memory_space<vmem>>, vector<1x1x576xf32>
    %130 = vector.shape_cast %129 : vector<1x1x576xf32> to vector<1x576xf32>
    %131 = vector.broadcast %130 : vector<1x576xf32> to vector<32x576xf32>
    %132 = arith.mulf %128, %131 : vector<32x576xf32>
    %133 = arith.truncf %132 : vector<32x576xf32> to vector<32x576xbf16>
    %c160_94 = arith.constant 160 : index
    %c0_95 = arith.constant 0 : index
    %134 = vector.load %arg10[%c160_94, %c0_95] : memref<384x576xbf16, #tpu.memory_space<vmem>>, vector<32x576xbf16>
    tpu.vector_store %arg10[%c160_94, %c0_95], %133 {strides = array<i32>} : memref<384x576xbf16, #tpu.memory_space<vmem>>, vector<32x576xbf16>,
    %c0_96 = arith.constant 0 : index
    %c440 = arith.constant 440 : index
    %135 = vector.load %arg8[%c0_96, %c440] : memref<32x1088xf32, #tpu.memory_space<vmem>>, vector<32x576xf32>
    %c19 = arith.constant 19 : index
    %c0_97 = arith.constant 0 : index
    %c0_98 = arith.constant 0 : index
    %136 = vector.load %arg6[%c19, %c0_97, %c0_98] : memref<25x1x576xf32, #tpu.memory_space<vmem>>, vector<1x1x576xf32>
    %137 = vector.shape_cast %136 : vector<1x1x576xf32> to vector<1x576xf32>
    %138 = vector.broadcast %137 : vector<1x576xf32> to vector<32x576xf32>
    %139 = arith.mulf %135, %138 : vector<32x576xf32>
    %140 = arith.truncf %139 : vector<32x576xf32> to vector<32x576xbf16>
    %c192_99 = arith.constant 192 : index
    %c0_100 = arith.constant 0 : index
    %141 = vector.load %arg10[%c192_99, %c0_100] : memref<384x576xbf16, #tpu.memory_space<vmem>>, vector<32x576xbf16>
    tpu.vector_store %arg10[%c192_99, %c0_100], %140 {strides = array<i32>} : memref<384x576xbf16, #tpu.memory_space<vmem>>, vector<32x576xbf16>,
    %c0_101 = arith.constant 0 : index
    %c456 = arith.constant 456 : index
    %142 = vector.load %arg8[%c0_101, %c456] : memref<32x1088xf32, #tpu.memory_space<vmem>>, vector<32x576xf32>
    %c20 = arith.constant 20 : index
    %c0_102 = arith.constant 0 : index
    %c0_103 = arith.constant 0 : index
    %143 = vector.load %arg6[%c20, %c0_102, %c0_103] : memref<25x1x576xf32, #tpu.memory_space<vmem>>, vector<1x1x576xf32>
    %144 = vector.shape_cast %143 : vector<1x1x576xf32> to vector<1x576xf32>
    %145 = vector.broadcast %144 : vector<1x576xf32> to vector<32x576xf32>
    %146 = arith.mulf %142, %145 : vector<32x576xf32>
    %147 = arith.truncf %146 : vector<32x576xf32> to vector<32x576xbf16>
    %c224_104 = arith.constant 224 : index
    %c0_105 = arith.constant 0 : index
    %148 = vector.load %arg10[%c224_104, %c0_105] : memref<384x576xbf16, #tpu.memory_space<vmem>>, vector<32x576xbf16>
    tpu.vector_store %arg10[%c224_104, %c0_105], %147 {strides = array<i32>} : memref<384x576xbf16, #tpu.memory_space<vmem>>, vector<32x576xbf16>,
    %c0_106 = arith.constant 0 : index
    %c191 = arith.constant 191 : index
    %149 = vector.load %arg8[%c0_106, %c191] : memref<32x1088xf32, #tpu.memory_space<vmem>>, vector<32x576xf32>
    %c21 = arith.constant 21 : index
    %c0_107 = arith.constant 0 : index
    %c0_108 = arith.constant 0 : index
    %150 = vector.load %arg6[%c21, %c0_107, %c0_108] : memref<25x1x576xf32, #tpu.memory_space<vmem>>, vector<1x1x576xf32>
    %151 = vector.shape_cast %150 : vector<1x1x576xf32> to vector<1x576xf32>
    %152 = vector.broadcast %151 : vector<1x576xf32> to vector<32x576xf32>
    %153 = arith.mulf %149, %152 : vector<32x576xf32>
    %154 = arith.truncf %153 : vector<32x576xf32> to vector<32x576xbf16>
    %c256_109 = arith.constant 256 : index
    %c0_110 = arith.constant 0 : index
    %155 = vector.load %arg10[%c256_109, %c0_110] : memref<384x576xbf16, #tpu.memory_space<vmem>>, vector<32x576xbf16>
    tpu.vector_store %arg10[%c256_109, %c0_110], %154 {strides = array<i32>} : memref<384x576xbf16, #tpu.memory_space<vmem>>, vector<32x576xbf16>,
    %c0_111 = arith.constant 0 : index
    %c193 = arith.constant 193 : index
    %156 = vector.load %arg8[%c0_111, %c193] : memref<32x1088xf32, #tpu.memory_space<vmem>>, vector<32x576xf32>
    %c22 = arith.constant 22 : index
    %c0_112 = arith.constant 0 : index
    %c0_113 = arith.constant 0 : index
    %157 = vector.load %arg6[%c22, %c0_112, %c0_113] : memref<25x1x576xf32, #tpu.memory_space<vmem>>, vector<1x1x576xf32>
    %158 = vector.shape_cast %157 : vector<1x1x576xf32> to vector<1x576xf32>
    %159 = vector.broadcast %158 : vector<1x576xf32> to vector<32x576xf32>
    %160 = arith.mulf %156, %159 : vector<32x576xf32>
    %161 = arith.truncf %160 : vector<32x576xf32> to vector<32x576xbf16>
    %c288_114 = arith.constant 288 : index
    %c0_115 = arith.constant 0 : index
    %162 = vector.load %arg10[%c288_114, %c0_115] : memref<384x576xbf16, #tpu.memory_space<vmem>>, vector<32x576xbf16>
    tpu.vector_store %arg10[%c288_114, %c0_115], %161 {strides = array<i32>} : memref<384x576xbf16, #tpu.memory_space<vmem>>, vector<32x576xbf16>,
    %c0_116 = arith.constant 0 : index
    %c319 = arith.constant 319 : index
    %163 = vector.load %arg8[%c0_116, %c319] : memref<32x1088xf32, #tpu.memory_space<vmem>>, vector<32x576xf32>
    %c23 = arith.constant 23 : index
    %c0_117 = arith.constant 0 : index
    %c0_118 = arith.constant 0 : index
    %164 = vector.load %arg6[%c23, %c0_117, %c0_118] : memref<25x1x576xf32, #tpu.memory_space<vmem>>, vector<1x1x576xf32>
    %165 = vector.shape_cast %164 : vector<1x1x576xf32> to vector<1x576xf32>
    %166 = vector.broadcast %165 : vector<1x576xf32> to vector<32x576xf32>
    %167 = arith.mulf %163, %166 : vector<32x576xf32>
    %168 = arith.truncf %167 : vector<32x576xf32> to vector<32x576xbf16>
    %c320_119 = arith.constant 320 : index
    %c0_120 = arith.constant 0 : index
    %169 = vector.load %arg10[%c320_119, %c0_120] : memref<384x576xbf16, #tpu.memory_space<vmem>>, vector<32x576xbf16>
    tpu.vector_store %arg10[%c320_119, %c0_120], %168 {strides = array<i32>} : memref<384x576xbf16, #tpu.memory_space<vmem>>, vector<32x576xbf16>,
    %c0_121 = arith.constant 0 : index
    %c321 = arith.constant 321 : index
    %170 = vector.load %arg8[%c0_121, %c321] : memref<32x1088xf32, #tpu.memory_space<vmem>>, vector<32x576xf32>
    %c24 = arith.constant 24 : index
    %c0_122 = arith.constant 0 : index
    %c0_123 = arith.constant 0 : index
    %171 = vector.load %arg6[%c24, %c0_122, %c0_123] : memref<25x1x576xf32, #tpu.memory_space<vmem>>, vector<1x1x576xf32>
    %172 = vector.shape_cast %171 : vector<1x1x576xf32> to vector<1x576xf32>
    %173 = vector.broadcast %172 : vector<1x576xf32> to vector<32x576xf32>
    %174 = arith.mulf %170, %173 : vector<32x576xf32>
    %175 = arith.truncf %174 : vector<32x576xf32> to vector<32x576xbf16>
    %c352_124 = arith.constant 352 : index
    %c0_125 = arith.constant 0 : index
    %176 = vector.load %arg10[%c352_124, %c0_125] : memref<384x576xbf16, #tpu.memory_space<vmem>>, vector<32x576xbf16>
    tpu.vector_store %arg10[%c352_124, %c0_125], %175 {strides = array<i32>} : memref<384x576xbf16, #tpu.memory_space<vmem>>, vector<32x576xbf16>,
    %c0_126 = arith.constant 0 : index
    %c0_127 = arith.constant 0 : index
    %177 = vector.load %arg2[%c0_126, %c0_127] : memref<32x416xbf16, #tpu.memory_space<vmem>>, vector<32x416xbf16>
    %c0_128 = arith.constant 0 : index
    %c0_129 = arith.constant 0 : index
    %178 = vector.load %arg9[%c0_128, %c0_129] : memref<416x576xbf16, #tpu.memory_space<vmem>>, vector<416x576xbf16>
    %cst_130 = arith.constant dense<0.000000e+00> : vector<32x576xf32>
    %179 = tpu.matmul %177, %178, %cst_130 {dimension_numbers = #tpu.dot_dimension_numbers<[1], [0], [0], [1], [0, 0, 1, 1], [], []>} : vector<32x416xbf16>, vector<416x576xbf16>, vector<32x576xf32> -> vector<32x576xf32>
    %c0_131 = arith.constant 0 : index
    %c0_132 = arith.constant 0 : index
    %180 = vector.load %arg3[%c0_131, %c0_132] : memref<32x384xbf16, #tpu.memory_space<vmem>>, vector<32x384xbf16>
    %c0_133 = arith.constant 0 : index
    %c0_134 = arith.constant 0 : index
    %181 = vector.load %arg10[%c0_133, %c0_134] : memref<384x576xbf16, #tpu.memory_space<vmem>>, vector<384x576xbf16>
    %cst_135 = arith.constant dense<0.000000e+00> : vector<32x576xf32>
    %182 = tpu.matmul %180, %181, %cst_135 {dimension_numbers = #tpu.dot_dimension_numbers<[1], [0], [0], [1], [0, 0, 1, 1], [], []>} : vector<32x384xbf16>, vector<384x576xbf16>, vector<32x576xf32> -> vector<32x576xf32>
    %183 = arith.addf %179, %182 : vector<32x576xf32>
    %c0_136 = arith.constant 0 : index
    %c0_137 = arith.constant 0 : index
    %184 = vector.load %arg4[%c0_136, %c0_137] : memref<32x1xf32, #tpu.memory_space<vmem>>, vector<32x1xf32>
    %185 = vector.broadcast %184 : vector<32x1xf32> to vector<32x576xf32>
    %186 = arith.addf %183, %185 : vector<32x576xf32>
    %cst_138 = arith.constant 0.000000e+00 : f32
    %187 = vector.broadcast %cst_138 : f32 to vector<32x576xf32>
    %188 = arith.cmpf oge, %186, %187 : vector<32x576xf32>
    %c0_139 = arith.constant 0 : index
    %c0_140 = arith.constant 0 : index
    %189 = vector.load %arg5[%c0_139, %c0_140] : memref<32x1xf32, #tpu.memory_space<vmem>>, vector<32x1xf32>
    %190 = vector.broadcast %189 : vector<32x1xf32> to vector<32x576xf32>
    %191 = arith.mulf %190, %186 : vector<32x576xf32>
    %192 = arith.select %188, %186, %191 : vector<32x576xi1>, vector<32x576xf32>
    %c0_141 = arith.constant 0 : index
    %c0_142 = arith.constant 0 : index
    %c0_143 = arith.constant 0 : index
    %193 = vector.load %arg7[%c0_141, %c0_142, %c0_143] : memref<1x32x576xf32, #tpu.memory_space<vmem>>, vector<1x32x576xf32>
    %194 = vector.shape_cast %193 : vector<1x32x576xf32> to vector<32x576xf32>
    %195 = vector.shape_cast %192 : vector<32x576xf32> to vector<1x32x576xf32>
    tpu.vector_store %arg7[%c0_141, %c0_142, %c0_143], %195 {strides = array<i32>} : memref<1x32x576xf32, #tpu.memory_space<vmem>>, vector<1x32x576xf32>,
    return
  }
  func.func @transform_0(%arg0: i32) -> (i32, i32, i32) {
    %c0_i32 = arith.constant 0 : i32
    %c0_i32_0 = arith.constant 0 : i32
    %c0_i32_1 = arith.constant 0 : i32
    return %arg0, %c0_i32, %c0_i32_0 : i32, i32, i32
  }
  func.func @transform_1(%arg0: i32) -> (i32, i32) {
    %c0_i32 = arith.constant 0 : i32
    %c0_i32_0 = arith.constant 0 : i32
    %c0_i32_1 = arith.constant 0 : i32
    return %c0_i32, %c0_i32_0 : i32, i32
  }
  func.func @transform_2(%arg0: i32) -> (i32, i32) {
    %c0_i32 = arith.constant 0 : i32
    %c0_i32_0 = arith.constant 0 : i32
    %c0_i32_1 = arith.constant 0 : i32
    return %c0_i32, %c0_i32_0 : i32, i32
  }
  func.func @transform_3(%arg0: i32) -> (i32, i32) {
    %c0_i32 = arith.constant 0 : i32
    %c0_i32_0 = arith.constant 0 : i32
    %c0_i32_1 = arith.constant 0 : i32
    return %c0_i32, %c0_i32_0 : i32, i32
  }
  func.func @transform_4(%arg0: i32) -> (i32, i32) {
    %c0_i32 = arith.constant 0 : i32
    %c0_i32_0 = arith.constant 0 : i32
    %c0_i32_1 = arith.constant 0 : i32
    return %c0_i32, %c0_i32_0 : i32, i32
  }
  func.func @transform_5(%arg0: i32) -> (i32, i32, i32) {
    %c0_i32 = arith.constant 0 : i32
    %c0_i32_0 = arith.constant 0 : i32
    %c0_i32_1 = arith.constant 0 : i32
    %c0_i32_2 = arith.constant 0 : i32
    return %c0_i32, %c0_i32_0, %c0_i32_1 : i32, i32, i32
  }
  func.func @transform_6(%arg0: i32) -> (i32, i32, i32) {
    %c0_i32 = arith.constant 0 : i32
    %c0_i32_0 = arith.constant 0 : i32
    %c0_i32_1 = arith.constant 0 : i32
    return %arg0, %c0_i32, %c0_i32_0 : i32, i32, i32
  }
}

</mosaic_0001>

<bundles_post_ra>
// kernel: tpu_custom_call.1
= control target key start
LH: loop header
LB: loop body
LE: loop exit
PB: predicated region body
PF: predicated region fallthrough
CT: control target
= control target key end

     0   :  { %11 = vsyncpa [#allocation6], 0  ;;  %s8789_s0 = inlined_call_operand.hbm [shape: f32[2,32,576], index: 0, kind: input, shape index: {}]   ;;  %s8790_s1 = inlined_call_operand.vmem [shape: bf16[32,416], index: 1, kind: input, shape index: {}]   ;;  %s8791_s2 = inlined_call_operand.hbm [shape: bf16[32,384], index: 2, kind: input, shape index: {}]   ;;  %s8792_s3 = inlined_call_operand.vmem [shape: f32[32,1], index: 3, kind: input, shape index: {}]   ;;  %s8793_s4 = inlined_call_operand.vmem [shape: f32[32,1], index: 4, kind: input, shape index: {}]   ;;  %s8794_s5 = inlined_call_operand.hbm [shape: f32[25,1,576], index: 5, kind: input, shape index: {}]   ;;  %s8795_s6 = inlined_call_operand.hbm [shape: f32[2,32,576], index: 6, kind: output, shape index: {}]  }
   0x1   :  { %13 = vsyncpa [#allocation6 + $0x1], 0 }
   0x2   :  { %14 = vsyncpa [#allocation9], 0 }
   0x3   :  { %15 = vsyncpa [#allocation7], 0 }
   0x4   :  { %17 = vsyncpa [#allocation7 + $0x1], 0  ;;  %s5695_s21 = smov 0   ;;  %s5697_s22 = smov 0  }
   0x5   :  { %s5699_s23 = smov 0   ;;  %s5701_s24 = smov 0  }
   0x6 LB: > { %s5716_s25 = sadd.s32 4294967295, %s5631_s24   ;;  %s5147_s26 = sadd.s32 4294967294, %s5631_s24   ;;  %s5631_s24 = sphi %s5701_s24, %s9059_s24   ;;  %s5627_s23 = sphi %s5699_s23, %s9058_s23   ;;  %s5623_s22 = sphi %s5697_s22, %s9057_s22   ;;  %s5619_s21 = sphi %s5695_s21, %s9056_s21  }
   0x7   : > { %p43_p0 = scmp.ne.s32.totalorder %s5623_s22, %s5619_s21  ;;  %p8796_p1 = scmp.eq.s32.totalorder %s5716_s25, 0 }
   0x8   : > { %p178_p3 = scmp.eq.s32.totalorder %s5147_s26, 1  ;;  %p5148_p5 = scmp.ge.s32.totalorder %s5631_s24, 1 }
   0x9   : > { %p5725_p4 = por %p8796_p1, %p43_p0  ;;  %p185_p7 = scmp.lt.s32.totalorder %s5631_s24, 3 }
   0xa   : > { %p5730_p6 = por %p178_p3, %p43_p0  ;;  %s5633_s30 = smov [#allocation8]  }
   0xb   : > { %s8877_s27 = scalar_select %p5725_p4, 1, 0 }
   0xc   : > { %s8878_s28 = scalar_select %p5730_p6, 1, 0 }
   0xd   : > { %p5735_p8 = pnand %p5148_p5, %p185_p7  ;;  %s200_s7 = sshll.u32 %s5633_s30, 4  ;;  %s5739_s7 = int_to_ptr.vmem [resolvable:$true] %s200_s7 }
   0xe   : > { %s5634_s9 = smov [#allocation10]   ;;  %s5475_s13 = scalar_lea.hbm %s8791_s2, 768 }
   0xf   : > { %p5329_p9 = pneg %p5735_p8  ;;  %s219_s10 = sshll.u32 %s5634_s9, 4  ;;  %s5750_s10 = int_to_ptr.vmem [resolvable:$true] %s219_s10 }
  0x10   : > { %p5476_p12 = scmp.ne.s32.totalorder %s8791_s2, %s5475_s13  ;;  %p5482_p5 = scmp.lt.u32.totalorder %s5475_s13, %s8791_s2 }
  0x11   : > { %p5746_p11 = pnand %p5329_p9, %p8796_p1 }
  0x13   : > { %p5477_p13 = pneg %p5746_p11 }
  0x15   : > { %p5478_p0 = pnand %p5477_p13, %p5476_p12 }
  0x17   : > { %p5479_p3 = pneg %p5478_p0 }
  0x19   : > { %p5484_p7 = pnand %p5482_p5, %p5479_p3 }
  0x1b   : > { %5487 = shalt.err (!%p5484_p7)
}
  0x1c   : > { %s5488_s18 = scalar_lea.vmem %s5739_s7, 768  ;;  %p5496_p2 = scmp.lt.s32.totalorder %s5739_s7, %s5739_s7 }
  0x1d   : > { %p5489_p9 = scmp.ne.s32.totalorder %s5739_s7, %s5488_s18  ;;  %p5497_p12 = scmp.lt.s32.totalorder %s5488_s18, %s5488_s18 }
  0x1f   : > { %p5491_p10 = pnand %p5489_p9, %p5477_p13  ;;  %p5498_p0 = por %p5497_p12, %p5496_p2 }
  0x21   : > { %p5492_p1 = pneg %p5491_p10 }
  0x23   : > { %p5499_p6 = pnand %p5498_p0, %p5492_p1 }
  0x25   : > { %5502 = shalt.err (!%p5499_p6)
}
  0x26   : > { %s5635_s19 = smov 192   ;;  %s5636_s20 = smov 12  }
  0x27   : > { %5332 = dma.hbm_to_vmem [thread:$0]  (!%p5746_p11), %s8791_s2, 768, %s5739_s7, [#allocation9], %s5635_s19, %s5635_s19, %s5636_s20  }
  0x28   : > { %s5503_s12 = scalar_lea.hbm %s8794_s5, 2000 }
  0x29   : > { %p5504_p2 = scmp.ne.s32.totalorder %s8794_s5, %s5503_s12  ;;  %p5510_p10 = scmp.lt.u32.totalorder %s5503_s12, %s8794_s5 }
  0x2b   : > { %p5506_p1 = pnand %p5504_p2, %p5477_p13 }
  0x2d   : > { %p5507_p6 = pneg %p5506_p1 }
  0x2f   : > { %p5512_p3 = pnand %p5510_p10, %p5507_p6 }
  0x31   : > { %5515 = shalt.err (!%p5512_p3)
}
  0x32   : > { %s5516_s7 = scalar_lea.vmem %s5750_s10, 2000  ;;  %s5523_s17 = scalar_lea.vmem %s5750_s10, 2016 }
  0x33   : > { %p5517_p5 = scmp.ne.s32.totalorder %s5750_s10, %s5516_s7  ;;  %p5524_p12 = scmp.lt.s32.totalorder %s5750_s10, %s5750_s10 }
  0x34   : > { %p5525_p0 = scmp.lt.s32.totalorder %s5523_s17, %s5516_s7 }
  0x35   : > { %p5519_p7 = pnand %p5517_p5, %p5477_p13 }
  0x36   : > { %p5526_p2 = por %p5525_p0, %p5524_p12 }
  0x37   : > { %p5520_p9 = pneg %p5519_p7 }
  0x39   : > { %p5527_p1 = pnand %p5526_p2, %p5520_p9 }
  0x3b   : > { %5530 = shalt.err (!%p5527_p1)
}
  0x3c   : > { %s5637_s18 = smov 80   ;;  %s5638_s19 = smov 5  }
  0x3d   : > { %5335 = dma.hbm_to_vmem [thread:$0]  (!%p5746_p11), %s8794_s5, 2000, %s5750_s10, [#allocation9], %s5637_s18, %s5637_s18, %s5638_s19  }
  0x3e   : > { %s5806_s30 = sadd.s32 1, %s5631_s24   ;;  %s30_s11 = sadd.s32 1, %s5627_s23 }
  0x3f   : > { %s27_s9 = ssub.s32 %s5631_s24, %s5806_s30  ;;  %p37_p6 = scmp.ne.s32.totalorder %s5627_s23, %s5623_s22 }
  0x40   : > { %p28_p13 = scmp.eq.s32.totalorder %s27_s9, 0  ;;  %p38_p10 = scmp.eq.s32.totalorder %s5631_s24, 0 }
  0x41   : > { %p8881_p5 = scmp.eq.s32.totalorder %s5716_s25, 1  ;;  %p5346_p9 = scmp.lt.s32.totalorder %s5631_s24, 2 }
  0x42   : > { %s5815_s12 = scalar_select %p28_p13, %s5627_s23, %s30_s11  }
  0x43   : > { %p39_p3 = por %p38_p10, %p37_p6  ;;  %p5819_p7 = por %p8881_p5, %p37_p6 }
  0x44   : > { %s233_s8 = sand.u32 1, %s5627_s23   ;;  %s5314_s10 = smul.u32 2560, %s5631_s24 }
  0x45   : > { %s8882_s13 = scalar_select %p5819_p7, 1, 0 }
  0x46   : > { %s5313_s14 = smul.u32 160, %s233_s8  ;;  %p5826_p11 = pnand %p5346_p9, %p39_p3 }
  0x47   : > { %s5833_s17 = scalar_lea.hbm %s8789_s0, %s5314_s10  ;;  %s5837_s20 = scalar_lea.sflag [#allocation6], %s233_s8 }
  0x48   : > { %s237_s18 = scalar_lea.vmem [#allocation5], %s5313_s14  ;;  %s5531_s26 = scalar_lea.hbm %s5833_s17, 2560 }
  0x49   : > { %s244_s19 = sshll.u32 %s237_s18, 4  ;;  %p5532_p12 = scmp.ne.s32.totalorder %s5833_s17, %s5531_s26  ;;  %s5835_s19 = int_to_ptr.vmem [resolvable:$true] %s244_s19 }
  0x4a   : > { %p5533_p0 = pneg %p5826_p11  ;;  %s5536_s10 = scalar_lea.hbm %s8789_s0, 5120 }
  0x4b   : > { %p5537_p13 = scmp.lt.u32.totalorder %s5833_s17, %s8789_s0  ;;  %p5538_p6 = scmp.lt.u32.totalorder %s5536_s10, %s5531_s26 }
  0x4c   : > { %p5534_p2 = pnand %p5533_p0, %p5532_p12  ;;  %p5540_p3 = scmp.lt.u32.totalorder %s5531_s26, %s5833_s17 }
  0x4d   : > { %p5539_p10 = por %p5538_p6, %p5537_p13 }
  0x4e   : > { %p5535_p1 = pneg %p5534_p2 }
  0x4f   : > { %p5541_p5 = por %p5540_p3, %p5539_p10 }
  0x51   : > { %p5542_p9 = pnand %p5541_p5, %p5535_p1 }
  0x53   : > { %5545 = shalt.err (!%p5542_p9)
}
  0x54   : > { %s5546_s8 = scalar_lea.vmem %s5835_s19, 2560  ;;  %s5639_s14 = smov [#allocation5]  }
  0x55   : > { %p5547_p12 = scmp.ne.s32.totalorder %s5835_s19, %s5546_s8  ;;  %s5551_s18 = sshll.u32 %s5639_s14, 4  ;;  %s5552_s18 = int_to_ptr.vmem [resolvable:$false] %s5551_s18 }
  0x56   : > { %s5553_s9 = scalar_lea.vmem %s5552_s18, 5120  ;;  %p5554_p4 = scmp.lt.s32.totalorder %s5835_s19, %s5552_s18 }
  0x57   : > { %p5549_p2 = pnand %p5547_p12, %p5533_p0  ;;  %p5555_p13 = scmp.lt.s32.totalorder %s5553_s9, %s5546_s8 }
  0x59   : > { %p5550_p7 = pneg %p5549_p2  ;;  %p5556_p6 = por %p5555_p13, %p5554_p4 }
  0x5b   : > { %p5557_p10 = pnand %p5556_p6, %p5550_p7 }
  0x5d   : > { %5560 = shalt.err (!%p5557_p10)
}
  0x5e   : > { %s5640_s26 = smov 640   ;;  %s5641_s11 = smov 40  }
  0x5f   : > { %5339 = dma.hbm_to_vmem [thread:$0]  (!%p5826_p11), %s5833_s17, 2560, %s5835_s19, %s5837_s20, %s5640_s26, %s5640_s26, %s5641_s11  }
  0x60   : > { %256 = sbr.rel (%p5735_p8) target bundleno = 1226 (0x4ca), region = 44 }
  0x67   : > { %s5868_s10 = sand.u32 1, %s5623_s22   ;;  %p8884_p4 = scmp.ne.s32.totalorder %s8877_s27, 0 }
  0x68   : > { %s5315_s16 = smul.u32 160, %s5868_s10  ;;  %s259_s7 = scalar_lea.sflag [#allocation6], %s5868_s10 }
  0x6a   : > { %s5874_s8 = scalar_lea.vmem [#allocation5], %s5315_s16 }
  0x6b   : > { %5606 = dma.done.wait (%p8884_p4), %s259_s7, 2560  }
  0x6c   : > { %5608 = vsyncadd (%p8884_p4), %s259_s7, 4294964736  ;;  %p8885_p7 = scmp.eq.s32.totalorder %s5716_s25, 0 }
  0x6e   : > { %5610 = dma.done.wait (%p8885_p7), [#allocation9], 2768   ;;  %p8886_p8 = pmov %p8885_p7 }
  0x6f   : > { %v384_v0 = vlaneseq  ;;  %vm311_vm0 = vcmask 523264   ;;  %v5642_v1 = vmov 0.0   ;;  %vm308_vm1 = vcmask 1048064   ;;  %v470_v7 = vld [vmem:[#allocation10 + $0x5] sm:$0x1f]  ;;  %s5643_s27 = smov 64  }
  0x70   : > { %5612 = vsyncadd (%p8886_p8), [#allocation9], 4294964528  ;;  %304 = vst [vmem:[#allocation2 + $0x90] sm:$0xff] %v5642_v1  ;;  %v709_v12 = vld [vmem:[#allocation10 + $0xf] sm:$0x1f]  ;;  %v5905_v14 = vld [vmem:[%s5874_s8 + $0x10] sm:$0xff] }
  0x71   : > { %312 = vst.msk [vmem:[#allocation2 + $0x40] sm:$0xff] %vm311_vm0, %v5642_v1  ;;  %315 = vst.msk [vmem:[#allocation2 + $0x88] sm:$0xff] %vm311_vm0, %v5642_v1  ;;  %v385_v2 = vshrl.u32 %v384_v0, 7  ;;  %v5908_v15 = vld [vmem:[%s5874_s8 + $0x38] sm:$0xff]  ;;  %v5911_v16 = vld [vmem:[%s5874_s8 + $0x60] sm:$0xff]  ;;  %s5644_s29 = smov 1  }
  0x72   : > { %318 = vst.msk [vmem:[#allocation2 + $0xd0] sm:$0xff] %vm311_vm0, %v5642_v1  ;;  %321 = vst.msk [vmem:[#allocation2 + $0x118] sm:$0xff] %vm311_vm0, %v5642_v1  ;;  %v5914_v17 = vld [vmem:[%s5874_s8 + $0x88] sm:$0xff]  ;;  %v5921_v18 = vld [vmem:[%s5874_s8] sm:$0xff]  ;;  %s5645_s15 = smov 7   ;;  %s5646_s17 = smov 8  }
  0x73   : > { %v5888_v3 = vsub.s32 2, %v385_v2  ;;  %v5890_v4 = vsub.s32 0, %v385_v2  ;;  %v5892_v5 = vsub.s32 3, %v385_v2  ;;  %v5894_v6 = vsub.s32 1, %v385_v2  ;;  %309 = vst.msk [vmem:[#allocation2 + $0x30] sm:$0xff] %vm308_vm1, %v5642_v1  ;;  %313 = vst.msk [vmem:[#allocation2 + $0x78] sm:$0xff] %vm308_vm1, %v5642_v1 }
  0x74   : > { %316 = vst.msk [vmem:[#allocation2 + $0xc0] sm:$0xff] %vm308_vm1, %v5642_v1  ;;  %319 = vst.msk [vmem:[#allocation2 + $0x108] sm:$0xff] %vm308_vm1, %v5642_v1  ;;  %v5902_v13 = vsub.s32 4, %v385_v2  ;;  %v5924_v19 = vld [vmem:[%s5874_s8 + $0x28] sm:$0xff]  ;;  %v326_v20 = vld [vmem:[%s5874_s8 + $0x20] sm:$0xff]  ;;  %s5647_s19 = smov 9  }
  0x75   : > { %8887 = vst [vmem:[#allocation15_spill] sm:$0xff] %v5890_v4  ;;  %8888 = vst [vmem:[#allocation16_spill] sm:$0xff] %v5892_v5  ;;  %v483_v8 = vrot.slane %v470_v7, %v5888_v3  ;;  %v475_v9 = vrot.slane %v470_v7, %v5890_v4  ;;  %v487_v10 = vrot.slane %v470_v7, %v5892_v5  ;;  %v2059_v21 = vld [vmem:[#allocation10 + $0x41] sm:$0x1f]  ;;  %v331_v22 = vld [vmem:[%s5874_s8 + $0x48] sm:$0xff]  ;;  %s5648_s20 = smov 56  }
  0x76   : > { %8889 = vst [vmem:[#allocation17_spill] sm:$0xff] %v5894_v6  ;;  %v479_v11 = vrot.slane %v470_v7, %v5894_v6  ;;  %8890 = vst [vmem:[#allocation18_spill] sm:$0xff] %v5902_v13  ;;  %v336_v23 = vld [vmem:[%s5874_s8 + $0x70] sm:$0xff]  ;;  %v341_v24 = vld [vmem:[%s5874_s8 + $0x98] sm:$0xff]  ;;  %v714_v25 = vrot.slane %v709_v12, %v5890_v4  ;;  %v491_v26 = vrot.slane %v470_v7, %v5902_v13  ;;  %s5649_s14 = smov 72   ;;  %s5650_s18 = smov 63  }
  0x77   : > { %496 = vrot.lane.b32.xlu1 %v483_v8, %s5643_s27  ;;  %492 = vrot.lane.b32.xlu0 %v475_v9, %s5643_s27  ;;  %344 = vst [vmem:[#allocation2 + $0x20] sm:$0xff] %v5905_v14  ;;  %349 = vst [vmem:[#allocation2 + $0x68] sm:$0xff] %v5908_v15  ;;  %v5941_v27 = vld [vmem:[%s5874_s8 + $0x58] sm:$0xff]  ;;  %v5944_v28 = vld [vmem:[%s5874_s8 + $0x80] sm:$0xff]  ;;  %v2076_v37 = vrot.slane %v2059_v21, %v5892_v5  ;;  %v2072_v38 = vrot.slane %v2059_v21, %v5888_v3  ;;  %vm2007_vm2 = vcmask 7168   ;;  %s5651_s9 = smov 127  }
  0x78   : > { %354 = vst [vmem:[#allocation2 + $0xb0] sm:$0xff] %v5911_v16  ;;  %359 = vst [vmem:[#allocation2 + $0xf8] sm:$0xff] %v5914_v17  ;;  %v5949_v29 = vld [vmem:[%s5874_s8 + $0x68] sm:$0xff]  ;;  %v5952_v30 = vld [vmem:[%s5874_s8 + $0x90] sm:$0xff]  ;;  %v2068_v39 = vrot.slane %v2059_v21, %v5894_v6  ;;  %v2080_v40 = vrot.slane %v2059_v21, %v5902_v13  ;;  %v2064_v42 = vrot.slane %v2059_v21, %v5890_v4  ;;  %vm1836_vm3 = vcmask 56320   ;;  %s5652_s26 = smov 121  }
  0x79   : > { %342 = vst [vmem:[#allocation2 + $0x10] sm:$0xff] %v5921_v18  ;;  %347 = vst [vmem:[#allocation2 + $0x58] sm:$0xff] %v5924_v19  ;;  %v5955_v31 = vld [vmem:[%s5874_s8 + $0x50] sm:$0xff]  ;;  %v5960_v32 = vld [vmem:[%s5874_s8 + $0x78] sm:$0xff]  ;;  %s5653_s11 = smov 65   ;;  %vm1665_vm4 = vcmask 64512  }
  0x7a   : > { %346 = vst.msk [vmem:[#allocation2 + $0x30] sm:$0xff] %vm311_vm0, %v326_v20  ;;  %351 = vst.msk [vmem:[#allocation2 + $0x78] sm:$0xff] %vm311_vm0, %v331_v22  ;;  %v5964_v33 = vld [vmem:[%s5874_s8 + $0x18] sm:$0xff]  ;;  %v5967_v34 = vld [vmem:[%s5874_s8 + $0x40] sm:$0xff]  ;;  %s5654_s7 = smov 120   ;;  %vm1494_vm5 = vcmask 72704  }
  0x7b   : > { %498 = vrot.lane.b32.xlu1 %v487_v10, %s5643_s27  ;;  %494 = vrot.lane.b32.xlu0 %v479_v11, %s5643_s27  ;;  %356 = vst.msk [vmem:[#allocation2 + $0xc0] sm:$0xff] %vm311_vm0, %v336_v23  ;;  %361 = vst.msk [vmem:[#allocation2 + $0x108] sm:$0xff] %vm311_vm0, %v341_v24  ;;  %v5970_v35 = vld [vmem:[%s5874_s8 + $0x8] sm:$0xff]  ;;  %v5973_v36 = vld [vmem:[%s5874_s8 + $0x30] sm:$0xff]  ;;  %s5655_s8 = smov 119   ;;  %vm2699_vm6 = vcmask 457728  }
  0x7c   : > { %353 = vst [vmem:[#allocation2 + $0xa8] sm:$0xff] %v5941_v27  ;;  %358 = vst [vmem:[#allocation2 + $0xf0] sm:$0xff] %v5944_v28  ;;  %v2211_v41 = vld [vmem:[#allocation10 + $0x46] sm:$0x1f]  ;;  %v2363_v48 = vld [vmem:[#allocation10 + $0x4b] sm:$0x1f] }
  0x7d   : > { %355 = vst [vmem:[#allocation2 + $0xb8] sm:$0xff] %v5949_v29  ;;  %360 = vst [vmem:[#allocation2 + $0x100] sm:$0xff] %v5952_v30  ;;  %v2224_v43 = vrot.slane %v2211_v41, %v5888_v3  ;;  %v2228_v44 = vrot.slane %v2211_v41, %v5892_v5  ;;  %v2232_v45 = vrot.slane %v2211_v41, %v5902_v13  ;;  %v2515_v53 = vld [vmem:[#allocation10 + $0x50] sm:$0x1f]  ;;  %v2667_v60 = vld [vmem:[#allocation10 + $0x55] sm:$0x1f] }
  0x7e   : > { %352 = vst [vmem:[#allocation2 + $0xa0] sm:$0xff] %v5955_v31  ;;  %357 = vst [vmem:[#allocation2 + $0xe8] sm:$0xff] %v5960_v32  ;;  %v2220_v46 = vrot.slane %v2211_v41, %v5894_v6  ;;  %v2216_v47 = vrot.slane %v2211_v41, %v5890_v4  ;;  %v2380_v49 = vrot.slane %v2363_v48, %v5892_v5  ;;  %v2823_v1 = vld [vmem:[#allocation10 + $0x5a] sm:$0x1f]  ;;  %v2990_v12 = vld [vmem:[#allocation10 + $0x5f] sm:$0x1f] }
  0x7f   : > { %345 = vst [vmem:[#allocation2 + $0x28] sm:$0xff] %v5964_v33  ;;  %350 = vst [vmem:[#allocation2 + $0x70] sm:$0xff] %v5967_v34  ;;  %731 = vrot.lane.b32.xlu1 %v714_v25, %s5643_s27  ;;  %500 = vrot.lane.b32.xlu0 %v491_v26, %s5643_s27  ;;  %v2376_v50 = vrot.slane %v2363_v48, %v5888_v3  ;;  %v2372_v51 = vrot.slane %v2363_v48, %v5894_v6  ;;  %v3144_v24 = vld [vmem:[#allocation10 + $0x64] sm:$0x1f]  ;;  %v6060_v41 = vld [vmem:[#allocation10 + $0x69] sm:$0x1f] }
  0x80   : > { %343 = vst [vmem:[#allocation2 + $0x18] sm:$0xff] %v5970_v35  ;;  %348 = vst [vmem:[#allocation2 + $0x60] sm:$0xff] %v5973_v36  ;;  %v2384_v52 = vrot.slane %v2363_v48, %v5902_v13  ;;  %v2528_v54 = vrot.slane %v2515_v53, %v5888_v3  ;;  %v2368_v55 = vrot.slane %v2363_v48, %v5890_v4  ;;  %vm1924_vm7 = vcmask 1039360   ;;  %p9053_p0 = scmp.ne.s32.totalorder %s8882_s13, 0 }
  0x81   : > { %v2536_v56 = vrot.slane %v2515_v53, %v5902_v13  ;;  %v2532_v57 = vrot.slane %v2515_v53, %v5892_v5  ;;  %v2520_v58 = vrot.slane %v2515_v53, %v5890_v4  ;;  %v2524_v59 = vrot.slane %v2515_v53, %v5894_v6 }
  0x82   : > { %v2684_v61 = vrot.slane %v2667_v60, %v5892_v5  ;;  %v2680_v62 = vrot.slane %v2667_v60, %v5888_v3  ;;  %v2676_v63 = vrot.slane %v2667_v60, %v5894_v6  ;;  %v2688_v0 = vrot.slane %v2667_v60, %v5902_v13 }
  0x83   : > { %2087 = vrot.lane.b32.xlu1 %v2076_v37, %s5644_s29  ;;  %2085 = vrot.lane.b32.xlu0 %v2072_v38, %s5644_s29  ;;  %v2836_v2 = vrot.slane %v2823_v1, %v5888_v3  ;;  %v2672_v7 = vrot.slane %v2667_v60, %v5890_v4  ;;  %v2844_v8 = vrot.slane %v2823_v1, %v5902_v13  ;;  %vm2769_vm8 = vcmask 588800  }
  0x84   : > { %v2840_v9 = vrot.slane %v2823_v1, %v5892_v5  ;;  %v2828_v10 = vrot.slane %v2823_v1, %v5890_v4  ;;  %v2832_v11 = vrot.slane %v2823_v1, %v5894_v6  ;;  %v3007_v20 = vrot.slane %v2990_v12, %v5892_v5 }
  0x85   : > { %v3003_v21 = vrot.slane %v2990_v12, %v5888_v3  ;;  %v2999_v22 = vrot.slane %v2990_v12, %v5894_v6  ;;  %v3011_v23 = vrot.slane %v2990_v12, %v5902_v13  ;;  %v3157_v25 = vrot.slane %v3144_v24, %v5888_v3 }
  0x86   : > { %v2995_v26 = vrot.slane %v2990_v12, %v5890_v4  ;;  %v3165_v37 = vrot.slane %v3144_v24, %v5902_v13  ;;  %v3161_v38 = vrot.slane %v3144_v24, %v5892_v5  ;;  %v6094_v12 = vld [vmem:[#allocation2 + $0x30] sm:$0xff]  ;;  %vm1753_vm9 = vcmask 990208  }
  0x87   : > { %2083 = vrot.lane.b32.xlu1 %v2068_v39, %s5644_s29  ;;  %2089 = vrot.lane.b32.xlu0 %v2080_v40, %s5644_s29  ;;  %v3149_v39 = vrot.slane %v3144_v24, %v5890_v4  ;;  %v3153_v40 = vrot.slane %v3144_v24, %v5894_v6  ;;  %vm1582_vm10 = vcmask 982016   ;;  %vm3341_vm11 = vcmask 515072  }
  0x88   : > { %vm1411_vm12 = vcmask 973824   ;;  %vm3411_vm13 = vcmask 531456   ;;  %vm4576_vm14 = vcmask 261120  }
  0x8b   : > { %2081 = vrot.lane.b32.xlu0 %v2064_v42, %s5644_s29  ;;  %2237 = vrot.lane.b32.xlu1 %v2224_v43, %s5645_s15  ;;  %v3322_v42 = vrot.slane %v6060_v41, %v5888_v3  ;;  %v3326_v43 = vrot.slane %v6060_v41, %v5892_v5 }
  0x8f   : > { %2239 = vrot.lane.b32.xlu0 %v2228_v44, %s5645_s15  ;;  %2241 = vrot.lane.b32.xlu1 %v2232_v45, %s5645_s15  ;;  %v3330_v44 = vrot.slane %v6060_v41, %v5902_v13  ;;  %v3318_v45 = vrot.slane %v6060_v41, %v5894_v6 }
  0x93   : > { %2235 = vrot.lane.b32.xlu0 %v2220_v46, %s5645_s15  ;;  %2233 = vrot.lane.b32.xlu1 %v2216_v47, %s5645_s15 }
  0x97   : > { %2391 = vrot.lane.b32.xlu1 %v2380_v49, %s5646_s17  ;;  %2389 = vrot.lane.b32.xlu0 %v2376_v50, %s5646_s17 }
  0x9b   : > { %2387 = vrot.lane.b32.xlu1 %v2372_v51, %s5646_s17  ;;  %2393 = vrot.lane.b32.xlu0 %v2384_v52, %s5646_s17 }
  0x9f   : > { %2541 = vrot.lane.b32.xlu1 %v2528_v54, %s5647_s19  ;;  %2385 = vrot.lane.b32.xlu0 %v2368_v55, %s5646_s17 }
  0xa3   : > { %2545 = vrot.lane.b32.xlu1 %v2536_v56, %s5647_s19  ;;  %2543 = vrot.lane.b32.xlu0 %v2532_v57, %s5647_s19 }
  0xa7   : > { %2537 = vrot.lane.b32.xlu1 %v2520_v58, %s5647_s19  ;;  %2539 = vrot.lane.b32.xlu0 %v2524_v59, %s5647_s19 }
  0xab   : > { %2695 = vrot.lane.b32.xlu1 %v2684_v61, %s5648_s20  ;;  %2693 = vrot.lane.b32.xlu0 %v2680_v62, %s5648_s20 }
  0xaf   : > { %2691 = vrot.lane.b32.xlu1 %v2676_v63, %s5648_s20  ;;  %2697 = vrot.lane.b32.xlu0 %v2688_v0, %s5648_s20 }
  0xb3   : > { %2849 = vrot.lane.b32.xlu1 %v2836_v2, %s5649_s14  ;;  %2689 = vrot.lane.b32.xlu0 %v2672_v7, %s5648_s20 }
  0xb7   : > { %2853 = vrot.lane.b32.xlu1 %v2844_v8, %s5649_s14  ;;  %2851 = vrot.lane.b32.xlu0 %v2840_v9, %s5649_s14 }
  0xbb   : > { %2845 = vrot.lane.b32.xlu1 %v2828_v10, %s5649_s14  ;;  %2847 = vrot.lane.b32.xlu0 %v2832_v11, %s5649_s14 }
  0xbf   : > { %3018 = vrot.lane.b32.xlu1 %v3007_v20, %s5648_s20  ;;  %3016 = vrot.lane.b32.xlu0 %v3003_v21, %s5648_s20  ;;  %v6096_v20 = vld [vmem:[#allocation2 + $0x78] sm:$0xff] }
  0xc3   : > { %3014 = vrot.lane.b32.xlu1 %v2999_v22, %s5648_s20  ;;  %3020 = vrot.lane.b32.xlu0 %v3011_v23, %s5648_s20 }
  0xc7   : > { %3170 = vrot.lane.b32.xlu1 %v3157_v25, %s5649_s14  ;;  %3012 = vrot.lane.b32.xlu0 %v2995_v26, %s5648_s20 }
  0xcb   : > { %3174 = vrot.lane.b32.xlu1 %v3165_v37, %s5649_s14  ;;  %3172 = vrot.lane.b32.xlu0 %v3161_v38, %s5649_s14 }
  0xcf   : > { %3166 = vrot.lane.b32.xlu1 %v3149_v39, %s5649_s14  ;;  %3168 = vrot.lane.b32.xlu0 %v3153_v40, %s5649_s14 }
  0xd3   : > { %3335 = vrot.lane.b32.xlu1 %v3322_v42, %s5650_s18  ;;  %3337 = vrot.lane.b32.xlu0 %v3326_v43, %s5650_s18 }
  0xd7   : > { %3339 = vrot.lane.b32.xlu1 %v3330_v44, %s5650_s18  ;;  %3333 = vrot.lane.b32.xlu0 %v3318_v45, %s5650_s18 }
  0xe9   : > { %v497_v46 = vpop.permute.xlu1 %496  ;;  %v493_v47 = vpop.permute.xlu0 %492 }
  0xea   : > { %v521_v48 = vmul.f32 0.0, %v493_v47 }
  0xec   : > { %v536_v49 = vpack.c.bf16 %v521_v48, %v521_v48 }
  0xed   : > { %v499_v50 = vpop.permute.xlu1 %498  ;;  %v495_v51 = vpop.permute.xlu0 %494 }
  0xee   : > { %v503_v52 = vsel %vm311_vm0, %v495_v51, %v497_v46  ;;  %561 = vrot.lane.b32.xlu0 %v536_v49, %s5643_s27  ;;  %551 = vrot.lane.b32.xlu1 %v536_v49, %s5643_s27  ;;  %v502_v58 = vsel %vm311_vm0, %v493_v47, %v495_v51  ;;  %v504_v62 = vsel %vm311_vm0, %v497_v46, %v499_v50 }
  0xef   : > { %v513_v53 = vmul.f32 %v503_v52, %v5921_v18  ;;  %v518_v54 = vmul.f32 %v503_v52, %v5924_v19  ;;  %v522_v2 = vmul.f32 0.0, %v502_v58  ;;  %v524_v7 = vmul.f32 %v504_v62, %v5941_v27 }
  0xf0   : > { %v529_v8 = vmul.f32 %v504_v62, %v5944_v28  ;;  %v514_v48 = vmul.f32 %v504_v62, %v5970_v35  ;;  %v519_v49 = vmul.f32 %v504_v62, %v5973_v36  ;;  %v523_v58 = vmul.f32 %v503_v52, %v5955_v31 }
  0xf1   : > { %v6081_v55 = vpop.permute.xlu1 %731  ;;  %v501_v56 = vpop.permute.xlu0 %500  ;;  %v533_v57 = vpack.c.bf16 %v518_v54, %v513_v53  ;;  %v537_v11 = vpack.c.bf16 %v522_v2, %v522_v2 }
  0xf2   : > { %8891 = vst [vmem:[#allocation19_spill] sm:$0xff] %v6081_v55  ;;  %v505_v59 = vsel %vm311_vm0, %v499_v50, %v501_v56  ;;  %v539_v22 = vpack.c.bf16 %v529_v8, %v524_v7 }
  0xf3   : > { %v515_v60 = vmul.f32 %v505_v59, %v5905_v14  ;;  %v520_v61 = vmul.f32 %v505_v59, %v5908_v15  ;;  %555 = vrot.lane.b32.xlu1 %v533_v57, %s5643_s27  ;;  %v534_v57 = vpack.c.bf16 %v519_v49, %v514_v48  ;;  %v525_v2 = vmul.f32 %v505_v59, %v5911_v16 }
  0xf4   : > { %v530_v7 = vmul.f32 %v505_v59, %v5914_v17 }
  0xf5   : > { %v2088_v63 = vpop.permute.xlu1 %2087  ;;  %v6089_v0 = vpop.permute.xlu0 %2085  ;;  %v535_v1 = vpack.c.bf16 %v520_v61, %v515_v60  ;;  %v528_v60 = vmul.f32 %v503_v52, %v5960_v32 }
  0xf6   : > { %v2094_v47 = vsel %vm2007_vm2, %v6089_v0, %v2088_v63 }
  0xf7   : > { %559 = vrot.lane.b32.xlu1 %v535_v1, %s5643_s27  ;;  %v2114_v51 = vmul.f32 %v2094_v47, %v5949_v29  ;;  %v2119_v53 = vmul.f32 %v2094_v47, %v5952_v30  ;;  %v3314_v1 = vrot.slane %v6060_v41, %v5890_v4  ;;  %v538_v8 = vpack.c.bf16 %v528_v60, %v523_v58 }
  0xf9   : > { %v2084_v9 = vpop.permute.xlu1 %2083  ;;  %v2090_v10 = vpop.permute.xlu0 %2089  ;;  %v2129_v61 = vpack.c.bf16 %v2119_v53, %v2114_v51 }
  0xfa   : > { %v6099_v21 = vsel %vm2007_vm2, %v2088_v63, %v2090_v10 }
  0xfb   : > { %563 = vrot.lane.b32.xlu1 %v537_v11, %s5643_s27  ;;  %v2105_v23 = vmul.f32 %v6099_v21, %v6094_v12  ;;  %v2110_v24 = vmul.f32 %v6099_v21, %v6096_v20 }
  0xfd   : > { %v6106_v25 = vpop.permute.xlu0 %2081  ;;  %v2238_v26 = vpop.permute.xlu1 %2237  ;;  %v2125_v42 = vpack.c.bf16 %v2110_v24, %v2105_v23  ;;  %v540_v24 = vpack.c.bf16 %v530_v7, %v525_v2 }
  0xfe   : > { %v2101_v37 = vmul.f32 %v6106_v25, %v5921_v18  ;;  %v2106_v38 = vmul.f32 %v6106_v25, %v5924_v19  ;;  %v2092_v39 = vsel %vm2007_vm2, %v6106_v25, %v2084_v9 }
  0xff   : > { %567 = vrot.lane.b32.xlu1 %v539_v22, %s5643_s27  ;;  %v2102_v43 = vmul.f32 %v2092_v39, %v5970_v35  ;;  %v2107_v44 = vmul.f32 %v2092_v39, %v5973_v36  ;;  %v2112_v10 = vmul.f32 %v2092_v39, %v5941_v27 }
 0x100   : > { %v2121_v40 = vpack.c.bf16 %v2106_v38, %v2101_v37  ;;  %v2104_v38 = vmul.f32 %v2094_v47, %v5964_v33 }
 0x101   : > { %v6117_v45 = vpop.permute.xlu0 %2239  ;;  %v6119_v46 = vpop.permute.xlu1 %2241  ;;  %v2122_v50 = vpack.c.bf16 %v2107_v44, %v2102_v43 }
 0x102   : > { %2141 = vrot.lane.b32.xlu0 %v2121_v40, %s5651_s9  ;;  %v6149_v52 = vsel %vm1836_vm3, %v2238_v26, %v6117_v45  ;;  %v2093_v40 = vsel %vm2007_vm2, %v2084_v9, %v6089_v0  ;;  %v6179_v0 = vld [vmem:[#allocation2 + $0xc0] sm:$0xff]  ;;  %v6181_v9 = vld [vmem:[#allocation2 + $0x108] sm:$0xff] }
 0x103   : > { %2149 = vrot.lane.b32.xlu1 %v2125_v42, %s5651_s9  ;;  %v2256_v41 = vmul.f32 %v6149_v52, %v5964_v33  ;;  %v2261_v59 = vmul.f32 %v6149_v52, %v5967_v34  ;;  %v2108_v51 = vmul.f32 %v2093_v40, %v5908_v15  ;;  %v2115_v58 = vmul.f32 %v6099_v21, %v6179_v0 }
 0x104   : > { %v2120_v60 = vmul.f32 %v6099_v21, %v6181_v9 }
 0x105   : > { %v6129_v54 = vpop.permute.xlu0 %2235  ;;  %v6131_v56 = vpop.permute.xlu1 %2233  ;;  %v2276_v44 = vpack.c.bf16 %v2261_v59, %v2256_v41  ;;  %v2118_v41 = vmul.f32 %v2093_v40, %v5914_v17  ;;  %v2247_v59 = vsel %vm1836_vm3, %v6117_v45, %v6119_v46  ;;  %v2116_v45 = vmul.f32 %v6106_v25, %v5960_v32 }
 0x106   : > { %553 = vrot.lane.b32.xlu0 %v537_v11, %s5643_s27  ;;  %v2117_v11 = vmul.f32 %v2092_v39, %v5944_v28  ;;  %v2245_v37 = vsel %vm1836_vm3, %v6129_v54, %v2238_v26  ;;  %v2109_v39 = vmul.f32 %v2094_v47, %v5967_v34  ;;  %v2103_v47 = vmul.f32 %v2093_v40, %v5905_v14 }
 0x107   : > { %2143 = vrot.lane.b32.xlu1 %v2122_v50, %s5651_s9  ;;  %v2255_v48 = vmul.f32 %v2245_v37, %v5905_v14  ;;  %v2260_v49 = vmul.f32 %v2245_v37, %v5908_v15 }
 0x108   : > { %v2127_v42 = vpack.c.bf16 %v2117_v11, %v2112_v10  ;;  %v2124_v50 = vpack.c.bf16 %v2109_v39, %v2104_v38  ;;  %v2130_v10 = vpack.c.bf16 %v2120_v60, %v2115_v58  ;;  %v2113_v11 = vmul.f32 %v2093_v40, %v5911_v16 }
 0x109   : > { %v6137_v62 = vpop.permute.xlu1 %2391  ;;  %v6139_v63 = vpop.permute.xlu0 %2389  ;;  %v2253_v38 = vmul.f32 %v6131_v56, %v5921_v18  ;;  %v2258_v39 = vmul.f32 %v6131_v56, %v5924_v19 }
 0x10a   : > { %557 = vrot.lane.b32.xlu0 %v534_v57, %s5643_s27  ;;  %v2275_v57 = vpack.c.bf16 %v2260_v49, %v2255_v48  ;;  %v2257_v48 = vmul.f32 %v2247_v59, %v6094_v12  ;;  %v2262_v49 = vmul.f32 %v2247_v59, %v6096_v20 }
 0x10b   : > { %2157 = vrot.lane.b32.xlu1 %v2129_v61, %s5651_s9  ;;  %v2123_v61 = vpack.c.bf16 %v2108_v51, %v2103_v47  ;;  %v2272_v47 = vmul.f32 %v2247_v59, %v6181_v9  ;;  %v2273_v51 = vpack.c.bf16 %v2258_v39, %v2253_v38  ;;  %v2268_v39 = vmul.f32 %v6131_v56, %v5960_v32 }
 0x10d   : > { %v6153_v22 = vpop.permute.xlu1 %2387  ;;  %v6155_v23 = vpop.permute.xlu0 %2393 }
 0x10e   : > { %565 = vrot.lane.b32.xlu0 %v538_v8, %s5643_s27 }
 0x10f   : > { %3331 = vrot.lane.b32.xlu1 %v3314_v1, %s5650_s18  ;;  %v6191_v1 = vld [vmem:[#allocation10 + $0x6e] sm:$0x1f] }
 0x110   : > { %v3482_v8 = vrot.slane %v6191_v1, %v5892_v5 }
 0x111   : > { %v6169_v43 = vpop.permute.xlu1 %2541  ;;  %v6175_v26 = vpop.permute.xlu0 %2385 }
 0x112   : > { %569 = vrot.lane.b32.xlu0 %v540_v24, %s5643_s27  ;;  %v3474_v24 = vrot.slane %v6191_v1, %v5894_v6 }
 0x113   : > { %2153 = vrot.lane.b32.xlu1 %v2127_v42, %s5651_s9  ;;  %v2128_v42 = vpack.c.bf16 %v2118_v41, %v2113_v11  ;;  %v3478_v11 = vrot.slane %v6191_v1, %v5888_v3 }
 0x115   : > { %v6183_v53 = vpop.permute.xlu1 %2545  ;;  %v6193_v2 = vpop.permute.xlu0 %2543 }
 0x116   : > { %2147 = vrot.lane.b32.xlu0 %v2124_v50, %s5651_s9  ;;  %v2267_v50 = vmul.f32 %v2247_v59, %v6179_v0 }
 0x117   : > { %2299 = vrot.lane.b32.xlu1 %v2276_v44, %s5652_s26  ;;  %v2111_v44 = vmul.f32 %v6106_v25, %v5955_v31  ;;  %v2277_v25 = vpack.c.bf16 %v2262_v49, %v2257_v48 }
 0x119   : > { %v6195_v7 = vpop.permute.xlu1 %2537  ;;  %v6216_v40 = vpop.permute.xlu0 %2539 }
 0x11a   : > { %2145 = vrot.lane.b32.xlu0 %v2123_v61, %s5651_s9  ;;  %v2282_v61 = vpack.c.bf16 %v2272_v47, %v2267_v50 }
 0x11b   : > { %2297 = vrot.lane.b32.xlu1 %v2275_v57, %s5652_s26  ;;  %v2126_v57 = vpack.c.bf16 %v2116_v45, %v2111_v44  ;;  %v3486_v44 = vrot.slane %v6191_v1, %v5902_v13 }
 0x11d   : > { %v6203_v21 = vpop.permute.xlu1 %2695  ;;  %v6230_v58 = vpop.permute.xlu0 %2693 }
 0x11e   : > { %2159 = vrot.lane.b32.xlu0 %v2130_v10, %s5651_s9  ;;  %v2270_v10 = vmul.f32 %v2245_v37, %v5914_v17 }
 0x11f   : > { %3493 = vrot.lane.b32.xlu1 %v3482_v8, %s5653_s11  ;;  %v2265_v8 = vmul.f32 %v2245_v37, %v5911_v16  ;;  %v2263_v37 = vmul.f32 %v6131_v56, %v5955_v31 }
 0x121   : > { %v6222_v46 = vpop.permute.xlu1 %2691  ;;  %v6244_v59 = vpop.permute.xlu0 %2697  ;;  %v2280_v38 = vpack.c.bf16 %v2270_v10, %v2265_v8 }
 0x122   : > { %2155 = vrot.lane.b32.xlu0 %v2128_v42, %s5651_s9  ;;  %v2244_v42 = vsel %vm1836_vm3, %v6131_v56, %v6129_v54  ;;  %v2278_v54 = vpack.c.bf16 %v2268_v39, %v2263_v37  ;;  %v2396_v37 = vsel %vm1665_vm4, %v6175_v26, %v6153_v22 }
 0x123   : > { %3489 = vrot.lane.b32.xlu1 %v3474_v24, %s5653_s11  ;;  %v6249_v24 = vsel %vm1665_vm4, %v6137_v62, %v6155_v23  ;;  %v2254_v48 = vmul.f32 %v2244_v42, %v5970_v35  ;;  %v2259_v49 = vmul.f32 %v2244_v42, %v5973_v36 }
 0x124   : > { %v2409_v23 = vmul.f32 %v6249_v24, %v6094_v12  ;;  %v2414_v45 = vmul.f32 %v6249_v24, %v6096_v20 }
 0x125   : > { %v6232_v60 = vpop.permute.xlu1 %2849  ;;  %v6270_v56 = vpop.permute.xlu0 %2689 }
 0x126   : > { %2151 = vrot.lane.b32.xlu0 %v2126_v57, %s5651_s9  ;;  %v2429_v47 = vpack.c.bf16 %v2414_v45, %v2409_v23  ;;  %v2266_v57 = vmul.f32 %v6149_v52, %v5949_v29  ;;  %v2269_v23 = vmul.f32 %v2244_v42, %v5944_v28 }
 0x127   : > { %2293 = vrot.lane.b32.xlu1 %v2273_v51, %s5652_s26  ;;  %v2274_v51 = vpack.c.bf16 %v2259_v49, %v2254_v48  ;;  %v2398_v48 = vsel %vm1665_vm4, %v6139_v63, %v6137_v62  ;;  %v2406_v49 = vmul.f32 %v2396_v37, %v5970_v35 }
 0x129   : > { %v6241_v41 = vpop.permute.xlu1 %2853 }
 0x12a   : > { %2301 = vrot.lane.b32.xlu0 %v2277_v25, %s5652_s26  ;;  %v2271_v25 = vmul.f32 %v6149_v52, %v5952_v30  ;;  %v3470_v52 = vrot.slane %v6191_v1, %v5890_v4 }
 0x12b   : > { %2311 = vrot.lane.b32.xlu1 %v2282_v61, %s5652_s26  ;;  %v6278_v61 = vld [vmem:[#allocation10 + $0x73] sm:$0x1f] }
 0x12c   : > { %v3645_v10 = vrot.slane %v6278_v61, %v5888_v3  ;;  %v3653_v39 = vrot.slane %v6278_v61, %v5902_v13 }
 0x12d   : > { %v6268_v50 = vpop.permute.xlu1 %2845 }
 0x12e   : > { %3491 = vrot.lane.b32.xlu0 %v3478_v11, %s5653_s11  ;;  %v6286_v11 = vpop.permute.xlu0 %2851 }
 0x12f   : > { %2307 = vrot.lane.b32.xlu1 %v2280_v38, %s5652_s26  ;;  %v2281_v38 = vpack.c.bf16 %v2271_v25, %v2266_v57  ;;  %v2397_v57 = vsel %vm1665_vm4, %v6153_v22, %v6139_v63  ;;  %v2418_v25 = vmul.f32 %v2398_v48, %v5949_v29  ;;  %v3637_v63 = vrot.slane %v6278_v61, %v5890_v4 }
 0x131   : > { %v6281_v8 = vpop.permute.xlu1 %3018 }
 0x132   : > { %3495 = vrot.lane.b32.xlu0 %v3486_v44, %s5653_s11  ;;  %v2264_v44 = vmul.f32 %v2244_v42, %v5941_v27  ;;  %v6304_v1 = vpop.permute.xlu0 %2847  ;;  %v2413_v42 = vmul.f32 %v2398_v48, %v5967_v34 }
 0x133   : > { %2303 = vrot.lane.b32.xlu1 %v2278_v54, %s5652_s26  ;;  %v2411_v54 = vmul.f32 %v2396_v37, %v5973_v36 }
 0x135   : > { %v6299_v45 = vpop.permute.xlu1 %3014  ;;  %v2426_v62 = vpack.c.bf16 %v2411_v54, %v2406_v49  ;;  %v2416_v54 = vmul.f32 %v2396_v37, %v5941_v27 }
 0x136   : > { %2295 = vrot.lane.b32.xlu0 %v2274_v51, %s5652_s26  ;;  %v2408_v51 = vmul.f32 %v2398_v48, %v5964_v33 }
 0x137   : > { %2453 = vrot.lane.b32.xlu1 %v2429_v47, %s5654_s7  ;;  %v2279_v47 = vpack.c.bf16 %v2269_v23, %v2264_v44  ;;  %v2407_v44 = vmul.f32 %v2397_v57, %v5905_v14  ;;  %v2412_v23 = vmul.f32 %v2397_v57, %v5908_v15 }
 0x139   : > { %v2427_v22 = vpack.c.bf16 %v2412_v23, %v2407_v44 }
 0x13a   : > { %2309 = vrot.lane.b32.xlu0 %v2281_v38, %s5652_s26  ;;  %v6318_v38 = vpop.permute.xlu1 %3170 }
 0x13b   : > { %3658 = vrot.lane.b32.xlu1 %v3645_v10, %s5650_s18  ;;  %v2423_v10 = vmul.f32 %v2398_v48, %v5952_v30 }
 0x13d   : > { %v2433_v55 = vpack.c.bf16 %v2423_v10, %v2418_v25  ;;  %v3641_v10 = vrot.slane %v6278_v61, %v5894_v6 }
 0x13e   : > { %3487 = vrot.lane.b32.xlu0 %v3470_v52, %s5653_s11  ;;  %v6321_v52 = vpop.permute.xlu0 %3016  ;;  %v6329_v48 = vpop.permute.xlu1 %3174 }
 0x13f   : > { %3662 = vrot.lane.b32.xlu1 %v3653_v39, %s5650_s18  ;;  %v2428_v39 = vpack.c.bf16 %v2413_v42, %v2408_v51  ;;  %v6338_v51 = vsel %vm1494_vm5, %v6169_v43, %v6193_v2 }
 0x140   : > { %v2560_v42 = vmul.f32 %v6338_v51, %v5964_v33  ;;  %v2405_v33 = vmul.f32 %v6175_v26, %v5921_v18 }
 0x142   : > { %2305 = vrot.lane.b32.xlu0 %v2279_v47, %s5652_s26  ;;  %v6331_v49 = vpop.permute.xlu0 %3020  ;;  %v2421_v47 = vmul.f32 %v2396_v37, %v5944_v28  ;;  %v2549_v37 = vsel %vm1494_vm5, %v6216_v40, %v6169_v43 }
 0x143   : > { %2447 = vrot.lane.b32.xlu1 %v2426_v62, %s5654_s7  ;;  %v2565_v62 = vmul.f32 %v6338_v51, %v5967_v34  ;;  %v2410_v34 = vmul.f32 %v6175_v26, %v5924_v19  ;;  %v2559_v23 = vmul.f32 %v2549_v37, %v5905_v14  ;;  %v2564_v43 = vmul.f32 %v2549_v37, %v5908_v15  ;;  %v6373_v19 = vld [vmem:[#allocation10 + $0x78] sm:$0x1f] }
 0x144   : > { %v2431_v25 = vpack.c.bf16 %v2421_v47, %v2416_v54 }
 0x145   : > { %v2425_v18 = vpack.c.bf16 %v2410_v34, %v2405_v33  ;;  %v6386_v33 = vld [vmem:[#allocation2 + $0x10] sm:$0xff]  ;;  %v6388_v34 = vld [vmem:[#allocation2 + $0x58] sm:$0xff] }
 0x146   : > { %2451 = vrot.lane.b32.xlu0 %v2428_v39, %s5654_s7  ;;  %v6354_v39 = vpop.permute.xlu1 %3166  ;;  %v6356_v44 = vpop.permute.xlu0 %3012  ;;  %8893 = vst [vmem:[#allocation21_spill] sm:$0xff] %v6388_v34 }
 0x147   : > { %2461 = vrot.lane.b32.xlu1 %v2433_v55, %s5654_s7  ;;  %v3649_v55 = vrot.slane %v6278_v61, %v5892_v5  ;;  %v2419_v61 = vmul.f32 %v6249_v24, %v6179_v0 }
 0x14a   : > { %2449 = vrot.lane.b32.xlu0 %v2427_v22, %s5654_s7  ;;  %v2424_v22 = vmul.f32 %v6249_v24, %v6181_v9  ;;  %v6371_v54 = vpop.permute.xlu1 %3335  ;;  %v6375_v47 = vpop.permute.xlu0 %3172 }
 0x14b   : > { %3654 = vrot.lane.b32.xlu1 %v3637_v63, %s5650_s18  ;;  %v2580_v63 = vpack.c.bf16 %v2565_v62, %v2560_v42  ;;  %8892 = vst [vmem:[#allocation20_spill] sm:$0xff] %v6371_v54  ;;  %v3803_v42 = vrot.slane %v6373_v19, %v5892_v5  ;;  %v2417_v62 = vmul.f32 %v2397_v57, %v5911_v16 }
 0x14c   : > { %v2434_v24 = vpack.c.bf16 %v2424_v22, %v2419_v61  ;;  %v2420_v61 = vmul.f32 %v6175_v26, %v5960_v32  ;;  %v2551_v22 = vsel %vm1494_vm5, %v6193_v2, %v6183_v53  ;;  %v2574_v5 = vmul.f32 %v2549_v37, %v5914_v17 }
 0x14d   : > { %v2576_v53 = vmul.f32 %v2551_v22, %v6181_v9 }
 0x14e   : > { %3660 = vrot.lane.b32.xlu0 %v3649_v55, %s5650_s18  ;;  %v2579_v55 = vpack.c.bf16 %v2564_v43, %v2559_v23  ;;  %v6390_v23 = vpop.permute.xlu0 %3168  ;;  %v3795_v43 = vrot.slane %v6373_v19, %v5894_v6 }
 0x14f   : > { %2457 = vrot.lane.b32.xlu1 %v2431_v25, %s5654_s7  ;;  %v2422_v25 = vmul.f32 %v2397_v57, %v5914_v17  ;;  %v2415_v57 = vmul.f32 %v6175_v26, %v5955_v31 }
 0x151   : > { %v2430_v26 = vpack.c.bf16 %v2420_v61, %v2415_v57  ;;  %v3799_v57 = vrot.slane %v6373_v19, %v5888_v3 }
 0x152   : > { %3656 = vrot.lane.b32.xlu0 %v3641_v10, %s5650_s18  ;;  %v6384_v10 = vpop.permute.xlu1 %3339  ;;  %v6414_v2 = vpop.permute.xlu0 %3337 }
 0x153   : > { %2603 = vrot.lane.b32.xlu1 %v2580_v63, %s5655_s8  ;;  %v2432_v63 = vpack.c.bf16 %v2422_v25, %v2417_v62  ;;  %v2566_v62 = vmul.f32 %v2551_v22, %v6096_v20 }
 0x156   : > { %2445 = vrot.lane.b32.xlu0 %v2425_v18, %s5654_s7  ;;  %v2557_v18 = vmul.f32 %v6195_v7, %v6386_v33  ;;  %v6425_v61 = vpop.permute.xlu0 %3333 }
 0x157   : > { %2601 = vrot.lane.b32.xlu1 %v2579_v55, %s5655_s8  ;;  %v2562_v55 = vmul.f32 %v6195_v7, %v6388_v34 }
 0x159   : > { %v2577_v6 = vpack.c.bf16 %v2562_v55, %v2557_v18  ;;  %v6440_v18 = vsel %vm2699_vm6, %v6203_v21, %v6244_v59 }
 0x15a   : > { %2463 = vrot.lane.b32.xlu0 %v2434_v24, %s5654_s7  ;;  %v2571_v24 = vmul.f32 %v2551_v22, %v6179_v0  ;;  %v2718_v59 = vmul.f32 %v6440_v18, %v5908_v15  ;;  %v2575_v15 = vmul.f32 %v6338_v51, %v5952_v30 }
 0x15b   : > { %3814 = vrot.lane.b32.xlu1 %v3803_v42, %s5653_s11  ;;  %v2561_v42 = vmul.f32 %v2551_v22, %v6094_v12  ;;  %v2572_v22 = vmul.f32 %v6195_v7, %v5960_v32 }
 0x15c   : > { %v2586_v34 = vpack.c.bf16 %v2576_v53, %v2571_v24 }
 0x15e   : > { %2459 = vrot.lane.b32.xlu0 %v2432_v63, %s5654_s7  ;;  %v2581_v63 = vpack.c.bf16 %v2566_v62, %v2561_v42 }
 0x15f   : > { %3810 = vrot.lane.b32.xlu1 %v3795_v43, %s5653_s11  ;;  %v2569_v43 = vmul.f32 %v2549_v37, %v5911_v16  ;;  %v2567_v37 = vmul.f32 %v6195_v7, %v5955_v31 }
 0x160   : > { %v6410_v25 = vpop.permute.xlu1 %551  ;;  %v562_v55 = vpop.permute.xlu0 %561 }
 0x161   : > { %v2584_v17 = vpack.c.bf16 %v2574_v5, %v2569_v43  ;;  %v2582_v62 = vpack.c.bf16 %v2572_v22, %v2567_v37 }
 0x162   : > { %2455 = vrot.lane.b32.xlu0 %v2430_v26, %s5654_s7  ;;  %v2700_v26 = vsel %vm2699_vm6, %v6270_v56, %v6222_v46 }
 0x163   : > { %2597 = vrot.lane.b32.xlu1 %v2577_v6, %s5655_s8  ;;  %v2548_v6 = vsel %vm1494_vm5, %v6195_v7, %v6216_v40  ;;  %v3807_v40 = vrot.slane %v6373_v19, %v5902_v13  ;;  %v2713_v7 = vmul.f32 %v6440_v18, %v5905_v14  ;;  %v2570_v14 = vmul.f32 %v6338_v51, %v5949_v29 }
 0x164   : > { %v2558_v5 = vmul.f32 %v2548_v6, %v5970_v35 }
 0x165   : > { %v6420_v54 = vpop.permute.xlu1 %555  ;;  %v2585_v22 = vpack.c.bf16 %v2575_v15, %v2570_v14 }
 0x166   : > { %2605 = vrot.lane.b32.xlu0 %v2581_v63, %s5655_s8  ;;  %v2702_v63 = vsel %vm2699_vm6, %v6230_v58, %v6203_v21 }
 0x167   : > { %2615 = vrot.lane.b32.xlu1 %v2586_v34, %s5655_s8  ;;  %v2563_v34 = vmul.f32 %v2548_v6, %v5973_v36  ;;  %v2722_v29 = vmul.f32 %v2702_v63, %v5941_v27  ;;  %v2727_v30 = vmul.f32 %v2702_v63, %v5944_v28 }
 0x169   : > { %v6431_v16 = vpop.permute.xlu1 %559  ;;  %v2578_v53 = vpack.c.bf16 %v2563_v34, %v2558_v5  ;;  %v2701_v5 = vsel %vm2699_vm6, %v6222_v46, %v6230_v58  ;;  %v3791_v34 = vrot.slane %v6373_v19, %v5890_v4 }
 0x16a   : > { %594 = vst.msk [vmem:[#allocation3 + $0x70] sm:$0xff] %vm311_vm0, %v6431_v16  ;;  %3812 = vrot.lane.b32.xlu0 %v3799_v57, %s5653_s11  ;;  %v2733_v57 = vpack.c.bf16 %v2718_v59, %v2713_v7  ;;  %v2568_v7 = vmul.f32 %v2548_v6, %v5941_v27  ;;  %v2573_v59 = vmul.f32 %v2548_v6, %v5944_v28 }
 0x16b   : > { %2611 = vrot.lane.b32.xlu1 %v2584_v17, %s5655_s8  ;;  %v6472_v17 = vld [vmem:[#allocation2 + $0x90] sm:$0xff]  ;;  %v2721_v46 = vmul.f32 %v2701_v5, %v5955_v31  ;;  %v2726_v58 = vmul.f32 %v2701_v5, %v5960_v32  ;;  %v2712_v28 = vmul.f32 %v2702_v63, %v5970_v35  ;;  %v2717_v31 = vmul.f32 %v2702_v63, %v5973_v36 }
 0x16c   : > { %v2710_v37 = vmul.f32 %v6472_v17, %v2700_v26  ;;  %v2719_v6 = vmul.f32 %v6472_v17, %v6270_v56  ;;  %v6522_v35 = vsel %vm2769_vm8, %v6286_v11, %v6241_v41  ;;  %v6526_v36 = vld [vmem:[#allocation2 + $0x10] sm:$0xff] }
 0x16d   : > { %v6454_v42 = vpop.permute.xlu1 %563  ;;  %v2711_v56 = vmul.f32 %v6526_v36, %v2701_v5 }
 0x16e   : > { %v576_v24 = vsel %vm311_vm0, %v562_v55, %v6454_v42  ;;  %3816 = vrot.lane.b32.xlu0 %v3807_v40, %s5653_s11  ;;  %v6481_v21 = vpack.c.bf16 %v2710_v37, %v2710_v37  ;;  %v2732_v37 = vpack.c.bf16 %v2717_v31, %v2712_v28  ;;  %v6562_v31 = vld [vmem:[#allocation2 + $0xb0] sm:$0xff] }
 0x16f   : > { %595 = vst [vmem:[#allocation3 + $0x78] sm:$0xff] %v576_v24  ;;  %2607 = vrot.lane.b32.xlu1 %v2582_v62, %s5655_s8  ;;  %v2737_v62 = vpack.c.bf16 %v2727_v30, %v2722_v29  ;;  %v2734_v29 = vpack.c.bf16 %v2719_v6, %v2719_v6  ;;  %v6532_v30 = vld [vmem:[#allocation2 + $0x20] sm:$0xff] }
 0x171   : > { %v6470_v43 = vpop.permute.xlu1 %567 }
 0x172   : > { %2599 = vrot.lane.b32.xlu0 %v2578_v53, %s5655_s8 }
 0x173   : > { %2757 = vrot.lane.b32.xlu1 %v2733_v57, %s5649_s14  ;;  %v2736_v57 = vpack.c.bf16 %v2726_v58, %v2721_v46 }
 0x174   : > { %v2142_v51 = vpop.permute.xlu0 %2141 }
 0x175   : > { %v6479_v40 = vpop.permute.xlu1 %2149 }
 0x176   : > { %2184 = vst.msk [vmem:[#allocation4 + $0x20] sm:$0xff] %vm311_vm0, %v6479_v40  ;;  %2613 = vrot.lane.b32.xlu0 %v2585_v22, %s5655_s8  ;;  %v6536_v22 = vld [vmem:[#allocation2 + $0x68] sm:$0xff] }
 0x177   : > { %2751 = vrot.lane.b32.xlu1 %v6481_v21, %s5649_s14 }
 0x178   : > { %v554_v55 = vpop.permute.xlu0 %553 }
 0x179   : > { %v572_v26 = vsel %vm311_vm0, %v6410_v25, %v554_v55  ;;  %v573_v19 = vsel %vm311_vm0, %v554_v55, %v6420_v54  ;;  %v6501_v24 = vpop.permute.xlu1 %2143  ;;  %v2583_v25 = vpack.c.bf16 %v2573_v59, %v2568_v7  ;;  %v2856_v55 = vsel %vm2769_vm8, %v6268_v50, %v6304_v1 }
 0x17a   : > { %590 = vst [vmem:[#allocation3 + $0x50] sm:$0xff] %v572_v26  ;;  %591 = vst [vmem:[#allocation3 + $0x58] sm:$0xff] %v573_v19  ;;  %v6505_v27 = vsel %vm1924_vm7, %v2142_v51, %v6501_v24  ;;  %3808 = vrot.lane.b32.xlu0 %v3791_v34, %s5653_s11  ;;  %v2870_v51 = vmul.f32 %v6532_v30, %v6522_v35  ;;  %v2876_v34 = vmul.f32 %v6536_v22, %v6522_v35 }
 0x17b   : > { %2765 = vrot.lane.b32.xlu1 %v2737_v62, %s5649_s14  ;;  %v2867_v58 = vmul.f32 %v6472_v17, %v2856_v55 }
 0x17c   : > { %v558_v32 = vpop.permute.xlu0 %557  ;;  %v2894_v28 = vpack.c.bf16 %v2876_v34, %v2870_v51 }
 0x17d   : > { %v574_v14 = vsel %vm311_vm0, %v6420_v54, %v558_v32  ;;  %v575_v15 = vsel %vm311_vm0, %v558_v32, %v6431_v16  ;;  %v6517_v53 = vpop.permute.xlu1 %2157  ;;  %v6529_v54 = vld [vmem:[#allocation2 + $0x58] sm:$0xff] }
 0x17e   : > { %592 = vst [vmem:[#allocation3 + $0x60] sm:$0xff] %v574_v14  ;;  %593 = vst [vmem:[#allocation3 + $0x68] sm:$0xff] %v575_v15  ;;  %2609 = vrot.lane.b32.xlu0 %v2583_v25, %s5655_s8  ;;  %v2716_v16 = vmul.f32 %v6529_v54, %v2701_v5  ;;  %v6566_v32 = vld [vmem:[#allocation2 + $0xf8] sm:$0xff]  ;;  %v6570_v25 = vld [vmem:[#allocation2 + $0xa8] sm:$0xff] }
 0x17f   : > { %2763 = vrot.lane.b32.xlu1 %v2736_v57, %s5649_s14  ;;  %v6573_v14 = vld [vmem:[#allocation2 + $0xf0] sm:$0xff] }
 0x180   : > { %v566_v63 = vpop.permute.xlu0 %565  ;;  %v2731_v46 = vpack.c.bf16 %v2716_v16, %v2711_v56 }
 0x181   : > { %v577_v7 = vsel %vm311_vm0, %v6454_v42, %v566_v63  ;;  %v578_v59 = vsel %vm311_vm0, %v566_v63, %v6470_v43  ;;  %v6544_v5 = vpop.permute.xlu1 %3331  ;;  %v2858_v42 = vsel %vm2769_vm8, %v6232_v60, %v6286_v11  ;;  %v2723_v11 = vmul.f32 %v6562_v31, %v6440_v18 }
 0x182   : > { %596 = vst [vmem:[#allocation3 + $0x80] sm:$0xff] %v577_v7  ;;  %597 = vst [vmem:[#allocation3 + $0x88] sm:$0xff] %v578_v59  ;;  %2755 = vrot.lane.b32.xlu0 %v2732_v37, %s5649_s14  ;;  %v2881_v6 = vmul.f32 %v6570_v25, %v2858_v42  ;;  %v2887_v15 = vmul.f32 %v6573_v14, %v2858_v42  ;;  %v6580_v63 = vpack.c.bf16 %v2867_v58, %v2867_v58  ;;  %v5437_v7 = vld [vmem:[#allocation2 + $0xa0] sm:$0xff]  ;;  %v5438_v59 = vld [vmem:[#allocation2 + $0xe8] sm:$0xff] }
 0x183   : > { %2759 = vrot.lane.b32.xlu1 %v2734_v29, %s5649_s14 }
 0x184   : > { %v570_v62 = vpop.permute.xlu0 %569  ;;  %v2899_v34 = vpack.c.bf16 %v2887_v15, %v2881_v6  ;;  %v2878_v15 = vmul.f32 %v6472_v17, %v6268_v50 }
 0x185   : > { %v579_v26 = vsel %vm311_vm0, %v6470_v43, %v570_v62  ;;  %599 = vst.msk [vmem:[#allocation3 + $0x98] sm:$0xff] %vm311_vm0, %v570_v62  ;;  %v6558_v19 = vpop.permute.xlu1 %2153  ;;  %v2728_v43 = vmul.f32 %v6566_v32, %v6440_v18  ;;  %v2857_v18 = vsel %vm2769_vm8, %v6304_v1, %v6232_v60 }
 0x186   : > { %598 = vst [vmem:[#allocation3 + $0x90] sm:$0xff] %v579_v26  ;;  %2753 = vrot.lane.b32.xlu0 %v2731_v46, %s5649_s14  ;;  %v2886_v55 = vmul.f32 %v5438_v59, %v2857_v18  ;;  %v6601_v26 = vld [vmem:[#allocation2 + $0x60] sm:$0xff] }
 0x187   : > { %2922 = vrot.lane.b32.xlu1 %v2894_v28, %s5648_s20  ;;  %v2738_v51 = vpack.c.bf16 %v2728_v43, %v2723_v11 }
 0x188   : > { %v2148_v57 = vpop.permute.xlu0 %2147 }
 0x189   : > { %v2165_v56 = vsel %vm1924_vm7, %v2148_v57, %v6479_v40  ;;  %v6578_v16 = vpop.permute.xlu1 %2299  ;;  %v2880_v40 = vmul.f32 %v5437_v7, %v2857_v18  ;;  %v6630_v7 = vsel %vm2699_vm6, %v6356_v44, %v6299_v45 }
 0x18a   : > { %2749 = vrot.lane.b32.xlu0 %v2734_v29, %s5649_s14  ;;  %4334 = vmatprep.subr.bf16.mxu1 %v2165_v56  ;;  %v6598_v29 = vld [vmem:[#allocation2 + $0x18] sm:$0xff] }
 0x18b   : > { %2916 = vrot.lane.b32.xlu1 %v6580_v63, %s5648_s20  ;;  %v2869_v58 = vmul.f32 %v6598_v29, %v2858_v42  ;;  %v2898_v6 = vpack.c.bf16 %v2886_v55, %v2880_v40 }
 0x18c   : > { %v2146_v37 = vpop.permute.xlu0 %2145 }
 0x18d   : > { %v2163_v62 = vsel %vm1924_vm7, %v6501_v24, %v2146_v37  ;;  %v2164_v46 = vsel %vm1924_vm7, %v2146_v37, %v2148_v57  ;;  %v6591_v60 = vpop.permute.xlu1 %2297  ;;  %v2875_v24 = vmul.f32 %v6601_v26, %v2858_v42  ;;  %v3025_v57 = vsel %vm2699_vm6, %v6281_v8, %v6331_v49 }
 0x18e   : > { %v2316_v1 = vsel %vm1753_vm9, %v6591_v60, %v6578_v16  ;;  %2767 = vrot.lane.b32.xlu0 %v2738_v51, %s5649_s14  ;;  %4228 = vmatprep.subr.bf16.mxu0 %v2163_v62  ;;  %v2874_v42 = vmul.f32 %v6529_v54, %v2857_v18  ;;  %v3035_v51 = vmul.f32 %v6472_v17, %v3025_v57  ;;  %v6634_v54 = vld [vmem:[#allocation2 + $0x68] sm:$0xff] }
 0x18f   : > { %2932 = vrot.lane.b32.xlu1 %v2899_v34, %s5648_s20  ;;  %4335 = vmatpush1.bf16.msra.mxu1 %v2164_v46  ;;  %v2893_v37 = vpack.c.bf16 %v2875_v24, %v2869_v58  ;;  %v3037_v46 = vmul.f32 %v6634_v54, %v6630_v7  ;;  %v3024_v58 = vsel %vm2699_vm6, %v6321_v52, %v6281_v8 }
 0x190   : > { %v2160_v28 = vpop.permute.xlu0 %2159  ;;  %4229 = vmatpush1.bf16.msra.mxu0 %v6505_v27  ;;  %v2868_v27 = vmul.f32 %v6526_v36, %v2857_v18  ;;  %v6632_v36 = vld [vmem:[#allocation2 + $0x20] sm:$0xff]  ;;  %v6640_v55 = vpack.c.bf16 %v3035_v51, %v3035_v51  ;;  %v2888_v24 = vmul.f32 %v6566_v32, %v6522_v35 }
 0x191   : > { %v2169_v11 = vsel %vm1924_vm7, %v6517_v53, %v2160_v28  ;;  %2189 = vst.msk [vmem:[#allocation4 + $0x48] sm:$0xff] %vm311_vm0, %v2160_v28  ;;  %v6608_v43 = vpop.permute.xlu1 %3493  ;;  %v3032_v62 = vmul.f32 %v6632_v36, %v6630_v7 }
 0x192   : > { %2761 = vrot.lane.b32.xlu0 %v6481_v21, %s5649_s14  ;;  %4336 = vmatprep.subr.bf16.mxu1 %v2169_v11  ;;  %v2896_v21 = vpack.c.bf16 %v2878_v15, %v2878_v15  ;;  %v3044_v11 = vmul.f32 %v3024_v58, %v6179_v0 }
 0x193   : > { %2930 = vrot.lane.b32.xlu1 %v2898_v6, %s5648_s20  ;;  %v3049_v6 = vmul.f32 %v3024_v58, %v6181_v9  ;;  %v3052_v57 = vpack.c.bf16 %v3037_v46, %v3032_v62 }
 0x194   : > { %v2156_v56 = vpop.permute.xlu0 %2155 }
 0x195   : > { %v2167_v50 = vsel %vm1924_vm7, %v6558_v19, %v2156_v56  ;;  %v2168_v49 = vsel %vm1924_vm7, %v2156_v56, %v6517_v53  ;;  %v6625_v34 = vpop.permute.xlu1 %3489  ;;  %v2892_v53 = vpack.c.bf16 %v2874_v42, %v2868_v27  ;;  %v3023_v27 = vsel %vm2699_vm6, %v6299_v45, %v6321_v52 }
 0x196   : > { %2920 = vrot.lane.b32.xlu0 %v2893_v37, %s5648_s20  ;;  %4230 = vmatprep.subr.bf16.mxu0 %v2167_v50  ;;  %v6672_v37 = vld [vmem:[#allocation2 + $0x100] sm:$0xff]  ;;  %v3059_v52 = vpack.c.bf16 %v3049_v6, %v3044_v11  ;;  %v6677_v50 = vld [vmem:[#allocation2 + $0xa8] sm:$0xff] }
 0x197   : > { %2926 = vrot.lane.b32.xlu1 %v2896_v21, %s5648_s20  ;;  %4337 = vmatpush1.bf16.msra.mxu1 %v2168_v49  ;;  %v3048_v51 = vmul.f32 %v6672_v37, %v3023_v27  ;;  %v6679_v49 = vld [vmem:[#allocation2 + $0xf0] sm:$0xff]  ;;  %v3041_v46 = vmul.f32 %v6677_v50, %v6356_v44 }
 0x198   : > { %v2152_v18 = vpop.permute.xlu0 %2151 }
 0x199   : > { %v2166_v40 = vsel %vm1924_vm7, %v2152_v18, %v6558_v19  ;;  %v2294_v59 = vpop.permute.xlu1 %2293  ;;  %v2882_v19 = vmul.f32 %v6562_v31, %v6522_v35 }
 0x19a   : > { %2918 = vrot.lane.b32.xlu0 %v2892_v53, %s5648_s20  ;;  %4231 = vmatpush1.bf16.msra.mxu0 %v2166_v40  ;;  %v3179_v53 = vsel %vm2769_vm8, %v6375_v47, %v6329_v48 }
 0x19b   : > { %3079 = vrot.lane.b32.xlu1 %v6640_v55, %s5649_s14  ;;  %v2900_v42 = vpack.c.bf16 %v2888_v24, %v2882_v19  ;;  %v3046_v19 = vmul.f32 %v6679_v49, %v6356_v44 }
 0x19c   : > { %v2302_v28 = vpop.permute.xlu0 %2301 }
 0x19d   : > { %v2317_v8 = vsel %vm1753_vm9, %v6578_v16, %v2302_v28  ;;  %2336 = vst.msk [vmem:[#allocation4 + $0x70] sm:$0xff] %vm311_vm0, %v2302_v28  ;;  %v2312_v15 = vpop.permute.xlu1 %2311  ;;  %v6669_v16 = vld [vmem:[#allocation2 + $0xb8] sm:$0xff]  ;;  %v3190_v28 = vmul.f32 %v6472_v17, %v3179_v53 }
 0x19e   : > { %2341 = vst.msk [vmem:[#allocation4 + $0x98] sm:$0xff] %vm311_vm0, %v2312_v15  ;;  %2914 = vrot.lane.b32.xlu0 %v2896_v21, %s5648_s20  ;;  %4338 = vmatprep.subr.bf16.mxu1 %v2317_v8  ;;  %v3043_v56 = vmul.f32 %v6669_v16, %v3023_v27  ;;  %v3039_v21 = vmul.f32 %v3024_v58, %v6096_v20  ;;  %v6704_v8 = vld [vmem:[#allocation2 + $0x18] sm:$0xff] }
 0x19f   : > { %3073 = vrot.lane.b32.xlu1 %v3052_v57, %s5649_s14  ;;  %4339 = vmatpush1.bf16.msra.mxu1 %v2316_v1  ;;  %v3034_v1 = vmul.f32 %v3024_v58, %v6094_v12  ;;  %v6696_v12 = vld [vmem:[#allocation2 + $0x28] sm:$0xff]  ;;  %v6699_v58 = vld [vmem:[#allocation2 + $0x70] sm:$0xff]  ;;  %v6706_v57 = vld [vmem:[#allocation2 + $0x60] sm:$0xff] }
 0x1a0   : > { %v6667_v35 = vpop.permute.xlu0 %3491  ;;  %v3058_v62 = vpack.c.bf16 %v3048_v51, %v3043_v56  ;;  %v3033_v20 = vmul.f32 %v6696_v12, %v3023_v27  ;;  %v3038_v24 = vmul.f32 %v6699_v58, %v3023_v27  ;;  %v3056_v51 = vpack.c.bf16 %v3046_v19, %v3041_v46 }
 0x1a1   : > { %v6675_v45 = vpop.permute.xlu1 %2307  ;;  %v3054_v6 = vpack.c.bf16 %v3039_v21, %v3034_v1  ;;  %v6714_v27 = vsel %vm2769_vm8, %v6354_v39, %v6390_v23  ;;  %v6722_v1 = vpack.c.bf16 %v3190_v28, %v3190_v28  ;;  %v3031_v21 = vmul.f32 %v6704_v8, %v6356_v44 }
 0x1a2   : > { %2934 = vrot.lane.b32.xlu0 %v2900_v42, %s5648_s20  ;;  %v3036_v53 = vmul.f32 %v6706_v57, %v6356_v44  ;;  %v3193_v46 = vmul.f32 %v6536_v22, %v6714_v27  ;;  %v6744_v22 = vld [vmem:[#allocation2 + $0xf8] sm:$0xff] }
 0x1a3   : > { %3087 = vrot.lane.b32.xlu1 %v3059_v52, %s5649_s14  ;;  %v3053_v52 = vpack.c.bf16 %v3038_v24, %v3033_v20  ;;  %v6742_v24 = vld [vmem:[#allocation2 + $0xb0] sm:$0xff] }
 0x1a4   : > { %v6685_v18 = vpop.permute.xlu0 %3495 }
 0x1a5   : > { %v2304_v40 = vpop.permute.xlu1 %2303 }
 0x1a6   : > { %2928 = vrot.lane.b32.xlu0 %v6580_v63, %s5648_s20 }
 0x1a7   : > { %3085 = vrot.lane.b32.xlu1 %v3058_v62, %s5649_s14  ;;  %v3187_v62 = vmul.f32 %v6532_v30, %v6714_v27 }
 0x1a8   : > { %v2296_v11 = vpop.permute.xlu0 %2295 }
 0x1a9   : > { %v2314_v63 = vsel %vm1753_vm9, %v2294_v59, %v2296_v11  ;;  %v2315_v42 = vsel %vm1753_vm9, %v2296_v11, %v6591_v60  ;;  %v2454_v56 = vpop.permute.xlu1 %2453  ;;  %v3178_v60 = vsel %vm2769_vm8, %v6318_v38, %v6375_v47 }
 0x1aa   : > { %2488 = vst.msk [vmem:[#allocation4 + $0xc0] sm:$0xff] %vm311_vm0, %v2454_v56  ;;  %3077 = vrot.lane.b32.xlu0 %v3054_v6, %s5649_s14  ;;  %4232 = vmatprep.subr.bf16.mxu0 %v2315_v42  ;;  %v3201_v44 = vmul.f32 %v3178_v60, %v6179_v0  ;;  %v3207_v30 = vmul.f32 %v3178_v60, %v6181_v9 }
 0x1ab   : > { %3081 = vrot.lane.b32.xlu1 %v3056_v51, %s5649_s14  ;;  %4233 = vmatpush1.bf16.msra.mxu0 %v2314_v63  ;;  %v3211_v6 = vpack.c.bf16 %v3193_v46, %v3187_v62  ;;  %v3177_v63 = vsel %vm2769_vm8, %v6390_v23, %v6318_v38  ;;  %v3042_v0 = vmul.f32 %v6742_v24, %v6630_v7  ;;  %v5446_v46 = vld [vmem:[#allocation2 + $0x78] sm:$0xff] }
 0x1ac   : > { %v2310_v59 = vpop.permute.xlu0 %2309  ;;  %v3047_v9 = vmul.f32 %v6744_v22, %v6630_v7  ;;  %v3219_v51 = vpack.c.bf16 %v3207_v30, %v3201_v44 }
 0x1ad   : > { %v2320_v19 = vsel %vm1753_vm9, %v6675_v45, %v2310_v59  ;;  %v2321_v47 = vsel %vm1753_vm9, %v2310_v59, %v2312_v15  ;;  %v6735_v20 = vpop.permute.xlu1 %3658  ;;  %v3051_v15 = vpack.c.bf16 %v3036_v53, %v3031_v21  ;;  %v3206_v59 = vmul.f32 %v6672_v37, %v3177_v63  ;;  %v5445_v53 = vld [vmem:[#allocation2 + $0x30] sm:$0xff] }
 0x1ae   : > { %3075 = vrot.lane.b32.xlu0 %v3053_v52, %s5649_s14  ;;  %4340 = vmatprep.subr.bf16.mxu1 %v2321_v47  ;;  %v3200_v52 = vmul.f32 %v6669_v16, %v3177_v63  ;;  %v3057_v7 = vpack.c.bf16 %v3047_v9, %v3042_v0  ;;  %v3189_v62 = vmul.f32 %v5445_v53, %v3178_v60 }
 0x1af   : > { %3242 = vrot.lane.b32.xlu1 %v6722_v1, %s5648_s20  ;;  %4341 = vmatpush1.bf16.msra.mxu1 %v2320_v19  ;;  %v3195_v19 = vmul.f32 %v5446_v46, %v3178_v60  ;;  %v3204_v47 = vmul.f32 %v6679_v49, %v6354_v39  ;;  %v3188_v60 = vmul.f32 %v6696_v12, %v3177_v63  ;;  %v8894_v46 = vld [vmem:[#allocation21_spill] sm:$0xff] }
 0x1b0   : > { %v6746_v28 = vpop.permute.xlu0 %3487  ;;  %v3218_v30 = vpack.c.bf16 %v3206_v59, %v3200_v52 }
 0x1b1   : > { %v6748_v11 = vpop.permute.xlu1 %3662  ;;  %v3213_v9 = vpack.c.bf16 %v3195_v19, %v3189_v62 }
 0x1b2   : > { %3071 = vrot.lane.b32.xlu0 %v3051_v15, %s5649_s14  ;;  %v6779_v15 = vsel %vm3341_vm11, %v6414_v2, %v6384_v10 }
 0x1b3   : > { %3236 = vrot.lane.b32.xlu1 %v3211_v6, %s5648_s20  ;;  %v3194_v6 = vmul.f32 %v6699_v58, %v3177_v63  ;;  %v6797_v63 = vsel %vm3341_vm11, %v6544_v5, %v6425_v61 }
 0x1b4   : > { %v2306_v42 = vpop.permute.xlu0 %2305  ;;  %v3352_v62 = vmul.f32 %v6797_v63, %v6386_v33  ;;  %v3357_v19 = vmul.f32 %v6797_v63, %v8894_v46 }
 0x1b5   : > { %v2318_v21 = vsel %vm1753_vm9, %v2304_v40, %v2306_v42  ;;  %v2319_v38 = vsel %vm1753_vm9, %v2306_v42, %v6675_v45  ;;  %v6764_v23 = vpop.permute.xlu1 %2447  ;;  %v3198_v45 = vmul.f32 %v6677_v50, %v6354_v39  ;;  %v3355_v42 = vmul.f32 %v6696_v12, %v6779_v15 }
 0x1b6   : > { %3089 = vrot.lane.b32.xlu0 %v6640_v55, %s5649_s14  ;;  %4234 = vmatprep.subr.bf16.mxu0 %v2319_v38  ;;  %v3192_v38 = vmul.f32 %v6706_v57, %v6354_v39 }
 0x1b7   : > { %3252 = vrot.lane.b32.xlu1 %v3219_v51, %s5648_s20  ;;  %4235 = vmatpush1.bf16.msra.mxu0 %v2318_v21  ;;  %v3360_v51 = vmul.f32 %v6699_v58, %v6779_v15  ;;  %v3212_v58 = vpack.c.bf16 %v3194_v6, %v3188_v60  ;;  %v3186_v21 = vmul.f32 %v6704_v8, %v6354_v39 }
 0x1b8   : > { %v2452_v40 = vpop.permute.xlu0 %2451  ;;  %v3372_v6 = vpack.c.bf16 %v3357_v19, %v3352_v62  ;;  %v6865_v19 = vld [vmem:[#allocation2 + $0x28] sm:$0xff] }
 0x1b9   : > { %v2469_v55 = vsel %vm1582_vm10, %v2452_v40, %v2454_v56  ;;  %v6774_v44 = vpop.permute.xlu1 %2461  ;;  %v3216_v56 = vpack.c.bf16 %v3204_v47, %v3198_v45  ;;  %v3375_v53 = vpack.c.bf16 %v3360_v51, %v3355_v42  ;;  %v3210_v39 = vpack.c.bf16 %v3192_v38, %v3186_v21 }
 0x1ba   : > { %3083 = vrot.lane.b32.xlu0 %v3057_v7, %s5649_s14  ;;  %4342 = vmatprep.subr.bf16.mxu1 %v2469_v55 }
 0x1bb   : > { %3250 = vrot.lane.b32.xlu1 %v3218_v30, %s5648_s20 }
 0x1bc   : > { %v2450_v0 = vpop.permute.xlu0 %2449 }
 0x1bd   : > { %v2467_v10 = vsel %vm1582_vm10, %v6764_v23, %v2450_v0  ;;  %v2468_v52 = vsel %vm1582_vm10, %v2450_v0, %v2452_v40  ;;  %v6792_v59 = vpop.permute.xlu1 %3654  ;;  %v8895_v40 = vld [vmem:[#allocation20_spill] sm:$0xff] }
 0x1be   : > { %3240 = vrot.lane.b32.xlu0 %v3213_v9, %s5648_s20  ;;  %4236 = vmatprep.subr.bf16.mxu0 %v2467_v10  ;;  %v3344_v45 = vsel %vm3341_vm11, %v8895_v40, %v6414_v2  ;;  %v3343_v0 = vsel %vm3341_vm11, %v6425_v61, %v8895_v40  ;;  %v3199_v2 = vmul.f32 %v6562_v31, %v6714_v27  ;;  %v6867_v40 = vld [vmem:[#allocation2 + $0x70] sm:$0xff] }
 0x1bf   : > { %3246 = vrot.lane.b32.xlu1 %v3216_v56, %s5648_s20  ;;  %4343 = vmatpush1.bf16.msra.mxu1 %v2468_v52  ;;  %v3364_v55 = vmul.f32 %v3344_v45, %v6742_v24  ;;  %v3369_v30 = vmul.f32 %v3344_v45, %v6744_v22  ;;  %v3205_v9 = vmul.f32 %v6566_v32, %v6714_v27  ;;  %v5409_v32 = vld [vmem:[#allocation8 + $0x4] ss:$12 sps:$4 sm:$0xff]  }
 0x1c0   : > { %v6801_v12 = vpop.permute.xlu0 %3660  ;;  %v3363_v42 = vmul.f32 %v6570_v25, %v3343_v0  ;;  %v3368_v51 = vmul.f32 %v6573_v14, %v3343_v0  ;;  %v3354_v14 = vmul.f32 %v3344_v45, %v6632_v36  ;;  %v3359_v27 = vmul.f32 %v3344_v45, %v6634_v54  ;;  %4366 = vmatprep.mubr.bf16.mxu1 %v5409_v32 }
 0x1c1   : > { %v6807_v7 = vpop.permute.xlu1 %2457  ;;  %v3379_v52 = vpack.c.bf16 %v3369_v30, %v3364_v55  ;;  %v3217_v25 = vpack.c.bf16 %v3205_v9, %v3199_v2  ;;  %4260 = vmatprep.mubr.bf16.mxu0 %v5409_v32  ;;  %v3358_v62 = vmul.f32 %v6601_v26, %v3343_v0  ;;  %v3500_v32 = vsel %vm3411_vm13, %v6667_v35, %v6608_v43 }
 0x1c2   : > { %3238 = vrot.lane.b32.xlu0 %v3212_v58, %s5648_s20  ;;  %v3361_v58 = vmul.f32 %v6472_v17, %v6544_v5  ;;  %v3378_v38 = vpack.c.bf16 %v3368_v51, %v3363_v42  ;;  %v3353_v5 = vmul.f32 %v6598_v29, %v3343_v0  ;;  %v6882_v0 = vsel %vm3411_vm13, %v6746_v28, %v6625_v34 }
 0x1c3   : > { %3399 = vrot.lane.b32.xlu1 %v3375_v53, %s5653_s11  ;;  %v6859_v53 = vsel %vm3411_vm13, %v6608_v43, %v6685_v18 }
 0x1c4   : > { %v6818_v47 = vpop.permute.xlu0 %3656  ;;  %v3376_v55 = vpack.c.bf16 %v3361_v58, %v3361_v58  ;;  %v3512_v29 = vmul.f32 %v6865_v19, %v6859_v53  ;;  %v3518_v26 = vmul.f32 %v6867_v40, %v6859_v53  ;;  %v3373_v9 = vpack.c.bf16 %v3358_v62, %v3353_v5  ;;  %v6906_v58 = vld [vmem:[#allocation2 + $0xa0] sm:$0xff] }
 0x1c5   : > { %v6822_v60 = vpop.permute.xlu1 %2603 }
 0x1c6   : > { %3234 = vrot.lane.b32.xlu0 %v3210_v39, %s5648_s20  ;;  %v3374_v39 = vpack.c.bf16 %v3359_v27, %v3354_v14  ;;  %v3536_v51 = vpack.c.bf16 %v3518_v26, %v3512_v29  ;;  %v3520_v29 = vmul.f32 %v6472_v17, %v6746_v28 }
 0x1c7   : > { %3393 = vrot.lane.b32.xlu1 %v3372_v6, %s5653_s11 }
 0x1c8   : > { %v2446_v56 = vpop.permute.xlu0 %2445 }
 0x1c9   : > { %v2466_v10 = vsel %vm1582_vm10, %v2446_v56, %v6764_v23  ;;  %v6837_v61 = vpop.permute.xlu1 %2601 }
 0x1ca   : > { %v6842_v31 = vsel %vm1411_vm12, %v6837_v61, %v6822_v60  ;;  %3254 = vrot.lane.b32.xlu0 %v6722_v1, %s5648_s20  ;;  %4237 = vmatpush1.bf16.msra.mxu0 %v2466_v10  ;;  %v3509_v10 = vmul.f32 %v6882_v0, %v6386_v33  ;;  %v3523_v33 = vmul.f32 %v3500_v32, %v6742_v24 }
 0x1cb   : > { %3407 = vrot.lane.b32.xlu1 %v3379_v52, %s5653_s11  ;;  %v3515_v52 = vmul.f32 %v6882_v0, %v8894_v46  ;;  %v3529_v46 = vmul.f32 %v3500_v32, %v6744_v22 }
 0x1cc   : > { %v2464_v23 = vpop.permute.xlu0 %2463 }
 0x1cd   : > { %v2473_v21 = vsel %vm1582_vm10, %v6774_v44, %v2464_v23  ;;  %2493 = vst.msk [vmem:[#allocation4 + $0xe8] sm:$0xff] %vm311_vm0, %v2464_v23  ;;  %v6854_v1 = vpop.permute.xlu1 %3814  ;;  %v3533_v23 = vpack.c.bf16 %v3515_v52, %v3509_v10  ;;  %v3541_v62 = vpack.c.bf16 %v3529_v46, %v3523_v33 }
 0x1ce   : > { %3248 = vrot.lane.b32.xlu0 %v3217_v25, %s5648_s20  ;;  %4344 = vmatprep.subr.bf16.mxu1 %v2473_v21  ;;  %v3370_v25 = vmul.f32 %v6672_v37, %v6779_v15  ;;  %v6908_v21 = vld [vmem:[#allocation2 + $0xe8] sm:$0xff] }
 0x1cf   : > { %3405 = vrot.lane.b32.xlu1 %v3378_v38, %s5653_s11  ;;  %v3367_v38 = vmul.f32 %v6797_v63, %v6908_v21 }
 0x1d0   : > { %v2460_v45 = vpop.permute.xlu0 %2459 }
 0x1d1   : > { %v2471_v30 = vsel %vm1582_vm10, %v6807_v7, %v2460_v45  ;;  %v2472_v6 = vsel %vm1582_vm10, %v2460_v45, %v6774_v44  ;;  %v6873_v2 = vpop.permute.xlu1 %3810  ;;  %v3517_v45 = vmul.f32 %v3500_v32, %v6634_v54 }
 0x1d2   : > { %3397 = vrot.lane.b32.xlu0 %v3374_v39, %s5653_s11  ;;  %4238 = vmatprep.subr.bf16.mxu0 %v2471_v30 }
 0x1d3   : > { %3401 = vrot.lane.b32.xlu1 %v3376_v55, %s5653_s11  ;;  %4345 = vmatpush1.bf16.msra.mxu1 %v2472_v6 }
 0x1d4   : > { %v2456_v44 = vpop.permute.xlu0 %2455 }
 0x1d5   : > { %v2470_v56 = vsel %vm1582_vm10, %v2456_v44, %v6807_v7  ;;  %v2598_v42 = vpop.permute.xlu1 %2597  ;;  %v3365_v7 = vmul.f32 %v6669_v16, %v6779_v15  ;;  %v3499_v16 = vsel %vm3411_vm13, %v6625_v34, %v6667_v35  ;;  %v6942_v44 = vld [vmem:[#allocation2 + $0x30] sm:$0xff] }
 0x1d6   : > { %3395 = vrot.lane.b32.xlu0 %v3373_v9, %s5653_s11  ;;  %4239 = vmatpush1.bf16.msra.mxu0 %v2470_v56  ;;  %v3522_v34 = vmul.f32 %v3499_v16, %v6677_v50  ;;  %v3528_v35 = vmul.f32 %v3499_v16, %v6679_v49  ;;  %v3510_v26 = vmul.f32 %v3499_v16, %v6704_v8  ;;  %v6944_v9 = vld [vmem:[#allocation2 + $0x78] sm:$0xff] }
 0x1d7   : > { %3564 = vrot.lane.b32.xlu1 %v3536_v51, %s5650_s18  ;;  %v3380_v15 = vpack.c.bf16 %v3370_v25, %v3365_v7  ;;  %v3516_v56 = vmul.f32 %v3499_v16, %v6706_v57  ;;  %v3538_v7 = vpack.c.bf16 %v3520_v29, %v3520_v29  ;;  %v6958_v25 = vsel %vm3341_vm11, %v6792_v59, %v6818_v47 }
 0x1d8   : > { %v2606_v14 = vpop.permute.xlu0 %2605  ;;  %v3540_v6 = vpack.c.bf16 %v3528_v35, %v3522_v34  ;;  %v3674_v46 = vmul.f32 %v6958_v25, %v6704_v8  ;;  %v3527_v29 = vmul.f32 %v6882_v0, %v6908_v21 }
 0x1d9   : > { %v2621_v27 = vsel %vm1411_vm12, %v6822_v60, %v2606_v14  ;;  %2640 = vst.msk [vmem:[#allocation4 + $0x110] sm:$0xff] %vm311_vm0, %v2606_v14  ;;  %v2616_v43 = vpop.permute.xlu1 %2615  ;;  %v3362_v60 = vmul.f32 %v6797_v63, %v6906_v58  ;;  %v6936_v63 = vsel %vm3341_vm11, %v6801_v12, %v6748_v11  ;;  %v3534_v14 = vpack.c.bf16 %v3516_v56, %v3510_v26 }
 0x1da   : > { %2645 = vst.msk [vmem:[#allocation4 + $0x138] sm:$0xff] %vm311_vm0, %v2616_v43  ;;  %3391 = vrot.lane.b32.xlu0 %v3376_v55, %s5653_s11  ;;  %4346 = vmatprep.subr.bf16.mxu1 %v2621_v27  ;;  %v3677_v11 = vmul.f32 %v6936_v63, %v6942_v44  ;;  %v3682_v51 = vmul.f32 %v6936_v63, %v6944_v9 }
 0x1db   : > { %3558 = vrot.lane.b32.xlu1 %v3533_v23, %s5650_s18  ;;  %4347 = vmatpush1.bf16.msra.mxu1 %v6842_v31  ;;  %v3511_v31 = vmul.f32 %v3500_v32, %v6632_v36  ;;  %v3377_v55 = vpack.c.bf16 %v3367_v38, %v3362_v60  ;;  %v3679_v27 = vmul.f32 %v6958_v25, %v6706_v57  ;;  %v6978_v60 = vld [vmem:[#allocation2 + $0x100] sm:$0xff] }
 0x1dc   : > { %v6917_v37 = vpop.permute.xlu0 %3812  ;;  %v3697_v33 = vpack.c.bf16 %v3682_v51, %v3677_v11 }
 0x1dd   : > { %v6925_v5 = vpop.permute.xlu1 %2611  ;;  %v3535_v17 = vpack.c.bf16 %v3517_v45, %v3511_v31  ;;  %v3694_v45 = vpack.c.bf16 %v3679_v27, %v3674_v46 }
 0x1de   : > { %3409 = vrot.lane.b32.xlu0 %v3380_v15, %s5653_s11 }
 0x1df   : > { %3574 = vrot.lane.b32.xlu1 %v3541_v62, %s5650_s18  ;;  %v3530_v62 = vmul.f32 %v6978_v60, %v6859_v53 }
 0x1e0   : > { %v6931_v39 = vpop.permute.xlu0 %3816 }
 0x1e1   : > { %v2608_v30 = vpop.permute.xlu1 %2607  ;;  %v7024_v46 = vsel %vm3411_vm13, %v6854_v1, %v6931_v39 }
 0x1e2   : > { %3403 = vrot.lane.b32.xlu0 %v3377_v55, %s5653_s11  ;;  %v3665_v55 = vsel %vm3341_vm11, %v6818_v47, %v6735_v20 }
 0x1e3   : > { %3572 = vrot.lane.b32.xlu1 %v3540_v6, %s5650_s18  ;;  %v3521_v6 = vmul.f32 %v6882_v0, %v6906_v58  ;;  %v3685_v11 = vmul.f32 %v3665_v55, %v6742_v24  ;;  %v3690_v51 = vmul.f32 %v3665_v55, %v6744_v22  ;;  %v3680_v27 = vmul.f32 %v3665_v55, %v6634_v54 }
 0x1e4   : > { %v2600_v10 = vpop.permute.xlu0 %2599 }
 0x1e5   : > { %v2618_v28 = vsel %vm1411_vm12, %v2598_v42, %v2600_v10  ;;  %v2619_v52 = vsel %vm1411_vm12, %v2600_v10, %v6837_v61  ;;  %v2758_v32 = vpop.permute.xlu1 %2757  ;;  %v3666_v42 = vsel %vm3341_vm11, %v6735_v20, %v6801_v12  ;;  %v6976_v12 = vld [vmem:[#allocation2 + $0xb8] sm:$0xff]  ;;  %v3539_v0 = vpack.c.bf16 %v3527_v29, %v3521_v6  ;;  %v7039_v6 = vld [vmem:[#allocation2 + $0x10] sm:$0xff] }
 0x1e6   : > { %2792 = vst.msk [vmem:[#allocation4 + $0x160] sm:$0xff] %vm311_vm0, %v2758_v32  ;;  %3562 = vrot.lane.b32.xlu0 %v3535_v17, %s5650_s18  ;;  %4240 = vmatprep.subr.bf16.mxu0 %v2619_v52  ;;  %v3686_v38 = vmul.f32 %v3666_v42, %v6976_v12  ;;  %v3691_v34 = vmul.f32 %v3666_v42, %v6978_v60  ;;  %v7041_v29 = vld [vmem:[#allocation2 + $0x58] sm:$0xff] }
 0x1e7   : > { %3568 = vrot.lane.b32.xlu1 %v3538_v7, %s5650_s18  ;;  %4241 = vmatpush1.bf16.msra.mxu0 %v2618_v28  ;;  %v3676_v28 = vmul.f32 %v3666_v42, %v6865_v19 }
 0x1e8   : > { %v2614_v61 = vpop.permute.xlu0 %2613 }
 0x1e9   : > { %v2624_v23 = vsel %vm1411_vm12, %v6925_v5, %v2614_v61  ;;  %v2625_v16 = vsel %vm1411_vm12, %v2614_v61, %v2616_v43  ;;  %v6973_v15 = vpop.permute.xlu1 %2751  ;;  %v3524_v43 = vmul.f32 %v6976_v12, %v6859_v53  ;;  %v3701_v53 = vpack.c.bf16 %v3691_v34, %v3686_v38 }
 0x1ea   : > { %3560 = vrot.lane.b32.xlu0 %v3534_v14, %s5650_s18  ;;  %4348 = vmatprep.subr.bf16.mxu1 %v2625_v16 }
 0x1eb   : > { %3721 = vrot.lane.b32.xlu1 %v3697_v33, %s5653_s11  ;;  %4349 = vmatpush1.bf16.msra.mxu1 %v2624_v23  ;;  %v3542_v56 = vpack.c.bf16 %v3530_v62, %v3524_v43  ;;  %v3700_v33 = vpack.c.bf16 %v3690_v51, %v3685_v11  ;;  %v3832_v62 = vmul.f32 %v7024_v46, %v6942_v44 }
 0x1ec   : > { %v6983_v35 = vpop.permute.xlu0 %3808  ;;  %v3819_v11 = vsel %vm3411_vm13, %v6873_v2, %v6917_v37 }
 0x1ed   : > { %v6989_v31 = vpop.permute.xlu1 %2765 }
 0x1ee   : > { %3556 = vrot.lane.b32.xlu0 %v3538_v7, %s5650_s18  ;;  %v3688_v7 = vmul.f32 %v6792_v59, %v6908_v21 }
 0x1ef   : > { %3715 = vrot.lane.b32.xlu1 %v3694_v45, %s5653_s11  ;;  %v3838_v45 = vmul.f32 %v7024_v46, %v6944_v9 }
 0x1f0   : > { %v2610_v26 = vpop.permute.xlu0 %2609 }
 0x1f1   : > { %v2622_v10 = vsel %vm1411_vm12, %v2608_v30, %v2610_v26  ;;  %v2623_v20 = vsel %vm1411_vm12, %v2610_v26, %v6925_v5  ;;  %v7005_v47 = vpop.permute.xlu1 %2763  ;;  %v3681_v30 = vmul.f32 %v3666_v42, %v6867_v40  ;;  %v3683_v5 = vmul.f32 %v6792_v59, %v6906_v58 }
 0x1f2   : > { %v7010_v17 = vsel %vm2769_vm8, %v7005_v47, %v6989_v31  ;;  %3576 = vrot.lane.b32.xlu0 %v3542_v56, %s5650_s18  ;;  %4242 = vmatprep.subr.bf16.mxu0 %v2623_v20  ;;  %v3675_v42 = vmul.f32 %v3665_v55, %v6632_v36  ;;  %v3673_v56 = vmul.f32 %v6792_v59, %v7039_v6 }
 0x1f3   : > { %3729 = vrot.lane.b32.xlu1 %v3701_v53, %s5653_s11  ;;  %4243 = vmatpush1.bf16.msra.mxu0 %v2622_v10  ;;  %v3696_v16 = vpack.c.bf16 %v3681_v30, %v3676_v28  ;;  %v3698_v38 = vpack.c.bf16 %v3688_v7, %v3683_v5  ;;  %v3678_v53 = vmul.f32 %v6792_v59, %v7041_v29  ;;  %v7058_v28 = vld [vmem:[#allocation2 + $0x108] sm:$0xff] }
 0x1f4   : > { %v2756_v52 = vpop.permute.xlu0 %2755  ;;  %v3695_v26 = vpack.c.bf16 %v3680_v27, %v3675_v42  ;;  %v3856_v20 = vpack.c.bf16 %v3838_v45, %v3832_v62  ;;  %v3692_v30 = vmul.f32 %v6936_v63, %v7058_v28  ;;  %v3830_v7 = vmul.f32 %v3819_v11, %v6632_v36 }
 0x1f5   : > { %v2773_v61 = vsel %vm2769_vm8, %v2756_v52, %v2758_v32  ;;  %v2760_v14 = vpop.permute.xlu1 %2759  ;;  %v3693_v42 = vpack.c.bf16 %v3678_v53, %v3673_v56 }
 0x1f6   : > { %3570 = vrot.lane.b32.xlu0 %v3539_v0, %s5650_s18  ;;  %4350 = vmatprep.subr.bf16.mxu1 %v2773_v61  ;;  %v7056_v0 = vld [vmem:[#allocation2 + $0xc0] sm:$0xff]  ;;  %v3836_v61 = vmul.f32 %v3819_v11, %v6634_v54  ;;  %v3684_v54 = vmul.f32 %v6958_v25, %v6677_v50 }
 0x1f7   : > { %3727 = vrot.lane.b32.xlu1 %v3700_v33, %s5653_s11  ;;  %v3687_v59 = vmul.f32 %v6936_v63, %v7056_v0  ;;  %v7078_v63 = vsel %vm3411_vm13, %v6983_v35, %v6873_v2 }
 0x1f8   : > { %v2754_v23 = vpop.permute.xlu0 %2753  ;;  %v3835_v50 = vmul.f32 %v7078_v63, %v6706_v57 }
 0x1f9   : > { %v2771_v32 = vsel %vm2769_vm8, %v6973_v15, %v2754_v23  ;;  %v2772_v34 = vsel %vm2769_vm8, %v2754_v23, %v2756_v52  ;;  %v7033_v43 = vpop.permute.xlu1 %2922  ;;  %v7066_v52 = vld [vmem:[#allocation10 + $0xf] sm:$0x1f]  ;;  %v3702_v36 = vpack.c.bf16 %v3692_v30, %v3687_v59 }
 0x1fa   : > { %3719 = vrot.lane.b32.xlu0 %v3696_v16, %s5653_s11  ;;  %4244 = vmatprep.subr.bf16.mxu0 %v2771_v32  ;;  %v3820_v16 = vsel %vm3411_vm13, %v6917_v37, %v6854_v1 }
 0x1fb   : > { %3723 = vrot.lane.b32.xlu1 %v3698_v38, %s5653_s11  ;;  %4351 = vmatpush1.bf16.msra.mxu1 %v2772_v34  ;;  %v3854_v38 = vpack.c.bf16 %v3836_v61, %v3830_v7  ;;  %v3831_v1 = vmul.f32 %v3820_v16, %v6865_v19  ;;  %v3837_v37 = vmul.f32 %v3820_v16, %v6867_v40 }
 0x1fc   : > { %v2750_v55 = vpop.permute.xlu0 %2749  ;;  %v722_v7 = vrot.slane %v7066_v52, %v5888_v3 }
 0x1fd   : > { %v2770_v51 = vsel %vm2769_vm8, %v2750_v55, %v6973_v15  ;;  %v7054_v10 = vpop.permute.xlu1 %2916  ;;  %v8896_v15 = vld [vmem:[#allocation16_spill] sm:$0xff]  ;;  %v3855_v53 = vpack.c.bf16 %v3837_v37, %v3831_v1  ;;  %v3844_v1 = vmul.f32 %v7024_v46, %v7056_v0  ;;  %v3850_v37 = vmul.f32 %v7024_v46, %v7058_v28 }
 0x1fe   : > { %3717 = vrot.lane.b32.xlu0 %v3695_v26, %s5653_s11  ;;  %4245 = vmatpush1.bf16.msra.mxu0 %v2770_v51  ;;  %v726_v5 = vrot.slane %v7066_v52, %v8896_v15  ;;  %v3842_v26 = vmul.f32 %v3819_v11, %v6742_v24  ;;  %v3848_v51 = vmul.f32 %v3819_v11, %v6744_v22 }
 0x1ff   : > { %3884 = vrot.lane.b32.xlu1 %v3856_v20, %s5650_s18 }
 0x200   : > { %v2768_v33 = vpop.permute.xlu0 %2767  ;;  %v3860_v61 = vpack.c.bf16 %v3848_v51, %v3842_v26  ;;  %v3525_v51 = vmul.f32 %v7056_v0, %v6685_v18 }
 0x201   : > { %v2777_v27 = vsel %vm2769_vm8, %v6989_v31, %v2768_v33  ;;  %2797 = vst.msk [vmem:[#allocation4 + $0x188] sm:$0xff] %vm311_vm0, %v2768_v33  ;;  %v2933_v23 = vpop.permute.xlu1 %2932  ;;  %v3689_v31 = vmul.f32 %v6958_v25, %v6679_v49  ;;  %v3840_v33 = vmul.f32 %v6983_v35, %v6906_v58 }
 0x202   : > { %3713 = vrot.lane.b32.xlu0 %v3693_v42, %s5653_s11  ;;  %4352 = vmatprep.subr.bf16.mxu1 %v2777_v27  ;;  %v3846_v42 = vmul.f32 %v6983_v35, %v6908_v21  ;;  %v730_v27 = vrot.slane %v7066_v52, %v5902_v13  ;;  %v8897_v21 = vld [vmem:[#allocation17_spill] sm:$0xff] }
 0x203   : > { %737 = vrot.lane.b32.xlu1 %v726_v5, %s5643_s27  ;;  %4353 = vmatpush1.bf16.msra.mxu1 %v7010_v17  ;;  %v3829_v17 = vmul.f32 %v7078_v63, %v6704_v8  ;;  %v3849_v8 = vmul.f32 %v3820_v16, %v6978_v60 }
 0x204   : > { %v2762_v2 = vpop.permute.xlu0 %2761  ;;  %v3858_v58 = vpack.c.bf16 %v3846_v42, %v3840_v33  ;;  %v7203_v33 = vld [vmem:[#allocation10 + $0x23] sm:$0x1f] }
 0x205   : > { %v2774_v32 = vsel %vm2769_vm8, %v2760_v14, %v2762_v2  ;;  %v2775_v34 = vsel %vm2769_vm8, %v2762_v2, %v7005_v47  ;;  %v2931_v62 = vpop.permute.xlu1 %2930  ;;  %v3699_v47 = vpack.c.bf16 %v3689_v31, %v3684_v54  ;;  %v3843_v14 = vmul.f32 %v3820_v16, %v6976_v12 }
 0x206   : > { %v2946_v49 = vsel %vm2699_vm6, %v2931_v62, %v2933_v23  ;;  %3731 = vrot.lane.b32.xlu0 %v3702_v36, %s5653_s11  ;;  %4246 = vmatprep.subr.bf16.mxu0 %v2775_v34  ;;  %v3853_v55 = vpack.c.bf16 %v3835_v50, %v3829_v17  ;;  %v718_v16 = vrot.slane %v7066_v52, %v8897_v21 }
 0x207   : > { %3880 = vrot.lane.b32.xlu1 %v3854_v38, %s5650_s18  ;;  %4247 = vmatpush1.bf16.msra.mxu0 %v2774_v32  ;;  %v3861_v5 = vpack.c.bf16 %v3849_v8, %v3843_v14  ;;  %v3828_v32 = vmul.f32 %v6983_v35, %v7039_v6  ;;  %v7168_v14 = vld [vmem:[#allocation2 + $0xa8] sm:$0xff]  ;;  %v7170_v8 = vld [vmem:[#allocation2 + $0xf0] sm:$0xff]  ;;  %v1154_v42 = vrot.slane %v7203_v33, %v8896_v15 }
 0x208   : > { %v2921_v25 = vpop.permute.xlu0 %2920 }
 0x209   : > { %v2942_v57 = vsel %vm2699_vm6, %v2921_v25, %v7033_v43  ;;  %v2927_v45 = vpop.permute.xlu1 %2926 }
 0x20a   : > { %3725 = vrot.lane.b32.xlu0 %v3699_v47, %s5653_s11  ;;  %4354 = vmatprep.subr.bf16.mxu1 %v2942_v57  ;;  %v3862_v57 = vpack.c.bf16 %v3850_v37, %v3844_v1  ;;  %s8672_s11 = scalar_lea.vmem [#allocation11], %s5315_s16  ;;  %s5316_s16 = smul.u32 2560, %s5716_s25 }
 0x20b   : > { %3878 = vrot.lane.b32.xlu1 %v3853_v55, %s5650_s18  ;;  %v3847_v55 = vmul.f32 %v7078_v63, %v7170_v8  ;;  %s5042_s25 = scalar_lea.sflag [#allocation7], %s5868_s10 }
 0x20c   : > { %v2919_v56 = vpop.permute.xlu0 %2918  ;;  %s8739_s14 = scalar_lea.hbm %s8795_s6, %s5316_s16 }
 0x20d   : > { %v2940_v20 = vsel %vm2699_vm6, %v7054_v10, %v2919_v56  ;;  %v2941_v59 = vsel %vm2699_vm6, %v2919_v56, %v2921_v25  ;;  %v3080_v30 = vpop.permute.xlu1 %3079 }
 0x20e   : > { %3113 = vst.msk [vmem:[#allocation4 + $0x200] sm:$0xff] %vm311_vm0, %v3080_v30  ;;  %3882 = vrot.lane.b32.xlu0 %v3855_v53, %s5650_s18  ;;  %4248 = vmatprep.subr.bf16.mxu0 %v2940_v20  ;;  %v3531_v20 = vmul.f32 %v7058_v28, %v6685_v18  ;;  %v7197_v28 = vld [vmem:[#allocation2 + $0x90] sm:$0xff] }
 0x20f   : > { %3894 = vrot.lane.b32.xlu1 %v3861_v5, %s5650_s18  ;;  %4355 = vmatpush1.bf16.msra.mxu1 %v2941_v59  ;;  %v3519_v5 = vmul.f32 %v6944_v9, %v6685_v18 }
 0x210   : > { %v2915_v24 = vpop.permute.xlu0 %2914 }
 0x211   : > { %v2939_v22 = vsel %vm2699_vm6, %v2915_v24, %v7054_v10  ;;  %v7120_v11 = vpop.permute.xlu1 %3073  ;;  %v7132_v10 = vld [vmem:[#allocation10 + $0x19] sm:$0x1f]  ;;  %v3543_v24 = vpack.c.bf16 %v3531_v20, %v3525_v51  ;;  %v3124_v51 = vld [vmem:[#allocation2 + $0x40] sm:$0xff]  ;;  %v3130_v20 = vld [vmem:[#allocation2 + $0x88] sm:$0xff] }
 0x212   : > { %735 = vrot.lane.b32.xlu0 %v722_v7, %s5643_s27  ;;  %4249 = vmatpush1.bf16.msra.mxu0 %v2939_v22  ;;  %v912_v2 = vrot.slane %v7132_v10, %v5888_v3  ;;  %v920_v6 = vrot.slane %v7132_v10, %v5902_v13  ;;  %v3833_v22 = vmul.f32 %v7197_v28, %v6931_v39 }
 0x213   : > { %3892 = vrot.lane.b32.xlu1 %v3860_v61, %s5650_s18  ;;  %v916_v39 = vrot.slane %v7132_v10, %v8896_v15 }
 0x214   : > { %v7130_v36 = vpop.permute.xlu0 %2934 }
 0x215   : > { %v2947_v54 = vsel %vm2699_vm6, %v2933_v23, %v7130_v36  ;;  %v7136_v31 = vpop.permute.xlu1 %3087  ;;  %v3834_v23 = vmul.f32 %v6983_v35, %v7041_v29  ;;  %v2871_v35 = vmul.f32 %v6865_v19, %v6241_v41  ;;  %v2877_v29 = vmul.f32 %v6867_v40, %v6241_v41 }
 0x216   : > { %739 = vrot.lane.b32.xlu0 %v730_v27, %s5643_s27  ;;  %4356 = vmatprep.subr.bf16.mxu1 %v2947_v54  ;;  %v8807_v19 = vmov 0  }
 0x217   : > { %3888 = vrot.lane.b32.xlu1 %v3858_v58, %s5650_s18  ;;  %4357 = vmatpush1.bf16.msra.mxu1 %v2946_v49  ;;  %v3852_v49 = vpack.c.bf16 %v3834_v23, %v3828_v32  ;;  %v2895_v46 = vpack.c.bf16 %v2877_v29, %v2871_v35  ;;  %v2883_v29 = vmul.f32 %v6976_v12, %v6241_v41 }
 0x218   : > { %v2929_v38 = vpop.permute.xlu0 %2928  ;;  %5408 = vset.pattern.permute.xlu1 %v8807_v19  ;;  %5407 = vset.pattern.permute.xlu0 %v8807_v19 }
 0x219   : > { %v2944_v34 = vsel %vm2699_vm6, %v2927_v45, %v2929_v38  ;;  %v2945_v17 = vsel %vm2699_vm6, %v2929_v38, %v2931_v62  ;;  %v7150_v50 = vpop.permute.xlu1 %3085  ;;  %v3841_v45 = vmul.f32 %v7078_v63, %v7168_v14  ;;  %v1146_v38 = vrot.slane %v7203_v33, %v8897_v21 }
 0x21a   : > { %v3097_v52 = vsel %vm2769_vm8, %v7150_v50, %v7136_v31  ;;  %733 = vrot.lane.b32.xlu0 %v718_v16, %s5643_s27  ;;  %4250 = vmatprep.subr.bf16.mxu0 %v2945_v17  ;;  %v904_v17 = vrot.slane %v7132_v10, %v5890_v4 }
 0x21b   : > { %925 = vrot.lane.b32.xlu1 %v912_v2, %s5643_s27  ;;  %4251 = vmatpush1.bf16.msra.mxu0 %v2944_v34  ;;  %v3859_v59 = vpack.c.bf16 %v3847_v55, %v3841_v45  ;;  %v908_v2 = vrot.slane %v7132_v10, %v8897_v21 }
 0x21c   : > { %v3078_v62 = vpop.permute.xlu0 %3077 }
 0x21d   : > { %v3094_v25 = vsel %vm2769_vm8, %v3078_v62, %v3080_v30  ;;  %v3082_v47 = vpop.permute.xlu1 %3081  ;;  %v3513_v30 = vmul.f32 %v6942_v44, %v6685_v18 }
 0x21e   : > { %3876 = vrot.lane.b32.xlu0 %v3852_v49, %s5650_s18  ;;  %4358 = vmatprep.subr.bf16.mxu1 %v3094_v25 }
 0x21f   : > { %929 = vrot.lane.b32.xlu1 %v920_v6, %s5643_s27  ;;  %v3537_v44 = vpack.c.bf16 %v3519_v5, %v3513_v30  ;;  %v1142_v6 = vrot.slane %v7203_v33, %v5890_v4  ;;  %v3191_v5 = vmul.f32 %v6329_v48, %v3124_v51 }
 0x220   : > { %v3076_v40 = vpop.permute.xlu0 %3075 }
 0x221   : > { %v3092_v26 = vsel %vm2769_vm8, %v7120_v11, %v3076_v40  ;;  %v3093_v56 = vsel %vm2769_vm8, %v3076_v40, %v3078_v62  ;;  %v7183_v53 = vpop.permute.xlu1 %3242  ;;  %v2889_v62 = vmul.f32 %v6978_v60, %v6241_v41 }
 0x222   : > { %3896 = vrot.lane.b32.xlu0 %v3862_v57, %s5650_s18  ;;  %4252 = vmatprep.subr.bf16.mxu0 %v3092_v26  ;;  %v1150_v57 = vrot.slane %v7203_v33, %v5888_v3 }
 0x223   : > { %2924 = vrot.lane.b32.xlu1 %v2895_v46, %s5648_s20  ;;  %4359 = vmatpush1.bf16.msra.mxu1 %v3093_v56  ;;  %v7252_v46 = vld [vmem:[#allocation10 + $0x2d] sm:$0x1f] }
 0x224   : > { %v3072_v63 = vpop.permute.xlu0 %3071  ;;  %v1396_v45 = vrot.slane %v7252_v46, %v8896_v15 }
 0x225   : > { %v3091_v0 = vsel %vm2769_vm8, %v3072_v63, %v7120_v11  ;;  %v3237_v7 = vpop.permute.xlu1 %3236  ;;  %v7208_v11 = vpack.c.bf16 %v3833_v22, %v3833_v22  ;;  %v1158_v63 = vrot.slane %v7203_v33, %v5902_v13  ;;  %v7275_v33 = vld [vmem:[#allocation10 + $0x32] sm:$0x1f] }
 0x226   : > { %3890 = vrot.lane.b32.xlu0 %v3859_v59, %s5650_s18  ;;  %4253 = vmatpush1.bf16.msra.mxu0 %v3091_v0  ;;  %v5411_v59 = vld [vmem:[#allocation8] ss:$12 sps:$4 sm:$0xff]   ;;  %v3197_v0 = vmul.f32 %v6329_v48, %v3130_v20 }
 0x227   : > { %3578 = vrot.lane.b32.xlu1 %v3543_v24, %s5650_s18  ;;  %v5412_v24 = vld [vmem:[#allocation8 + $0x1c] ss:$12 sps:$4 sm:$0xff]  }
 0x228   : > { %v3090_v61 = vpop.permute.xlu0 %3089 }
 0x229   : > { %v3098_v18 = vsel %vm2769_vm8, %v7136_v31, %v3090_v61  ;;  %3118 = vst.msk [vmem:[#allocation4 + $0x228] sm:$0xff] %vm311_vm0, %v3090_v61  ;;  %v3253_v9 = vpop.permute.xlu1 %3252 }
 0x22a   : > { %3566 = vrot.lane.b32.xlu0 %v3537_v44, %s5650_s18  ;;  %4360 = vmatprep.subr.bf16.mxu1 %v3098_v18 }
 0x22b   : > { %3886 = vrot.lane.b32.xlu1 %v7208_v11, %s5650_s18  ;;  %4361 = vmatpush1.bf16.msra.mxu1 %v3097_v52  ;;  %v3142_v52 = vld [vmem:[#allocation2 + $0x118] sm:$0xff] }
 0x22c   : > { %v3084_v27 = vpop.permute.xlu0 %3083  ;;  %v3209_v25 = vmul.f32 %v6329_v48, %v3142_v52 }
 0x22d   : > { %v3095_v54 = vsel %vm2769_vm8, %v3082_v47, %v3084_v27  ;;  %v3096_v31 = vsel %vm2769_vm8, %v3084_v27, %v7150_v50  ;;  %v3251_v58 = vpop.permute.xlu1 %3250  ;;  %v3136_v50 = vld [vmem:[#allocation2 + $0xd0] sm:$0xff]  ;;  %v2901_v47 = vpack.c.bf16 %v2889_v62, %v2883_v29 }
 0x22e   : > { %v3265_v16 = vsel %vm2699_vm6, %v3251_v58, %v3253_v9  ;;  %927 = vrot.lane.b32.xlu0 %v916_v39, %s5643_s27  ;;  %4254 = vmatprep.subr.bf16.mxu0 %v3096_v31  ;;  %v3203_v37 = vmul.f32 %v6329_v48, %v3136_v50  ;;  %v1563_v39 = vrot.slane %v7275_v33, %v5888_v3  ;;  %v7308_v29 = vld [vmem:[#allocation2 + $0x10] sm:$0xff] }
 0x22f   : > { %1165 = vrot.lane.b32.xlu1 %v1154_v42, %s5643_s27  ;;  %4255 = vmatpush1.bf16.msra.mxu0 %v3095_v54  ;;  %v382_v54 = vld [vmem:[#allocation10] sm:$0x1f]  ;;  %v1392_v31 = vrot.slane %v7252_v46, %v5888_v3 }
 0x230   : > { %v3241_v32 = vpop.permute.xlu0 %3240  ;;  %v3221_v40 = vpack.c.bf16 %v3209_v25, %v3203_v37  ;;  %v395_v50 = vrot.slane %v382_v54, %v5888_v3 }
 0x231   : > { %v3261_v23 = vsel %vm2699_vm6, %v3241_v32, %v7183_v53  ;;  %v3247_v34 = vpop.permute.xlu1 %3246 }
 0x232   : > { %923 = vrot.lane.b32.xlu0 %v908_v2, %s5643_s27  ;;  %4362 = vmatprep.subr.bf16.mxu1 %v3261_v23  ;;  %v7299_v23 = vld [vmem:[#allocation2 + $0x60] sm:$0xff]  ;;  %v7323_v25 = vmul.f32 %v7308_v29, %v395_v50 }
 0x233   : > { %1161 = vrot.lane.b32.xlu1 %v1146_v38, %s5643_s27  ;;  %v1571_v38 = vrot.slane %v7275_v33, %v5902_v13 }
 0x234   : > { %v3239_v35 = vpop.permute.xlu0 %3238  ;;  %8900 = vst [vmem:[#allocation16_spill] sm:$0xff] %v7323_v25 }
 0x235   : > { %v3259_v49 = vsel %vm2699_vm6, %v3237_v7, %v3239_v35  ;;  %v3260_v1 = vsel %vm2699_vm6, %v3239_v35, %v3241_v32  ;;  %v3400_v10 = vpop.permute.xlu1 %3399  ;;  %v7297_v32 = vld [vmem:[#allocation2 + $0x18] sm:$0xff] }
 0x236   : > { %3434 = vst.msk [vmem:[#allocation4 + $0x2a0] sm:$0xff] %vm311_vm0, %v3400_v10  ;;  %921 = vrot.lane.b32.xlu0 %v904_v17, %s5643_s27  ;;  %4256 = vmatprep.subr.bf16.mxu0 %v3259_v49  ;;  %v387_v17 = vrot.slane %v382_v54, %v5890_v4 }
 0x237   : > { %1159 = vrot.lane.b32.xlu1 %v1142_v6, %s5643_s27  ;;  %4363 = vmatpush1.bf16.msra.mxu1 %v3260_v1  ;;  %v7318_v1 = vld [vmem:[#allocation2 + $0x58] sm:$0xff] }
 0x238   : > { %v3235_v12 = vpop.permute.xlu0 %3234  ;;  %v409_v37 = vmul.f32 %v7197_v28, %v387_v17 }
 0x239   : > { %v3258_v41 = vsel %vm2699_vm6, %v3235_v12, %v3237_v7  ;;  %v7247_v60 = vpop.permute.xlu1 %3393  ;;  %v1388_v7 = vrot.slane %v7252_v46, %v8897_v21  ;;  %v1555_v12 = vrot.slane %v7275_v33, %v5890_v4 }
 0x23a   : > { %2936 = vrot.lane.b32.xlu0 %v2901_v47, %s5648_s20  ;;  %4257 = vmatpush1.bf16.msra.mxu0 %v3258_v41  ;;  %v7327_v47 = vld [vmem:[#allocation2 + $0xa8] sm:$0xff]  ;;  %v7480_v41 = vld [vmem:[#allocation2 + $0x70] sm:$0xff] }
 0x23b   : > { %3256 = vrot.lane.b32.xlu1 %v3221_v40, %s5648_s20 }
 0x23c   : > { %v7257_v55 = vpop.permute.xlu0 %3254 }
 0x23d   : > { %v3266_v26 = vsel %vm2699_vm6, %v3253_v9, %v7257_v55  ;;  %v7261_v56 = vpop.permute.xlu1 %3407  ;;  %v3215_v9 = vpack.c.bf16 %v3197_v0, %v3191_v5 }
 0x23e   : > { %1163 = vrot.lane.b32.xlu0 %v1150_v57, %s5643_s27  ;;  %4364 = vmatprep.subr.bf16.mxu1 %v3266_v26  ;;  %v7335_v57 = vld [vmem:[#allocation2 + $0xf0] sm:$0xff]  ;;  %v7339_v26 = vpack.c.bf16 %v409_v37, %v409_v37 }
 0x23f   : > { %4365 = vmatpush1.bf16.msra.mxu1 %v3265_v16  ;;  %1407 = vrot.lane.b32.xlu1 %v1396_v45, %s5655_s8  ;;  %v391_v16 = vrot.slane %v382_v54, %v8897_v21 }
 0x240   : > { %v3249_v30 = vpop.permute.xlu0 %3248  ;;  %8902 = vst [vmem:[#allocation22_spill] sm:$0xff] %v7339_v26 }
 0x241   : > { %v3263_v22 = vsel %vm2699_vm6, %v3247_v34, %v3249_v30  ;;  %v3264_v61 = vsel %vm2699_vm6, %v3249_v30, %v3251_v58  ;;  %v7273_v44 = vpop.permute.xlu1 %3405  ;;  %v399_v58 = vrot.slane %v382_v54, %v8896_v15  ;;  %v5414_v34 = vld [vmem:[#allocation8 + $0x18] ss:$12 sps:$4 sm:$0xff]  }
 0x242   : > { %v7280_v18 = vsel %vm3411_vm13, %v7273_v44, %v7261_v56  ;;  %1167 = vrot.lane.b32.xlu0 %v1158_v63, %s5643_s27  ;;  %4258 = vmatprep.subr.bf16.mxu0 %v3264_v61  ;;  %v7348_v30 = vld [vmem:[#allocation2 + $0xe8] sm:$0xff] }
 0x243   : > { %4259 = vmatpush1.bf16.msra.mxu0 %v3263_v22  ;;  %4367 = vmatmul.mubr.bf16.vlgmr.msra.gmra.mrb[0].mxu1 %v5411_v59  ;;  %v7311_v62 = vmul.f32 %v7297_v32, %v399_v58  ;;  %v7314_v49 = vmul.f32 %v7299_v23, %v399_v58  ;;  %v7342_v51 = vmul.f32 %v7327_v47, %v399_v58 }
 0x244   : > { %v3398_v48 = vpop.permute.xlu0 %3397  ;;  %1403 = vrot.lane.b32.xlu1 %v1388_v7, %s5655_s8  ;;  %4376 = vmatprep.mubr.bf16.mxu1 %v5412_v24  ;;  %v7354_v0 = vmul.f32 %v7335_v57, %v399_v58  ;;  %v1400_v7 = vrot.slane %v7252_v46, %v5902_v13 }
 0x245   : > { %v3415_v42 = vsel %vm3411_vm13, %v3398_v48, %v3400_v10  ;;  %v7287_v27 = vpop.permute.xlu1 %3401  ;;  %8898 = vst [vmem:[#allocation21_spill] sm:$0xff] %v7311_v62  ;;  %8899 = vst [vmem:[#allocation20_spill] sm:$0xff] %v7314_v49  ;;  %v410_v10 = vmul.f32 %v7197_v28, %v391_v16  ;;  %v7570_v49 = vld [vmem:[#allocation2 + $0x100] sm:$0xff] }
 0x246   : > { %3244 = vrot.lane.b32.xlu0 %v3215_v9, %s5648_s20  ;;  %4387 = vmatprep.subr.bf16.mxu1 %v3415_v42  ;;  %8903 = vst [vmem:[#allocation23_spill] sm:$0xff] %v7342_v51  ;;  %8904 = vst [vmem:[#allocation24_spill] sm:$0xff] %v7354_v0  ;;  %v1384_v42 = vrot.slane %v7252_v46, %v5890_v4 }
 0x247   : > { %4261 = vmatmul.mubr.bf16.vlgmr.msra.gmra.mrb[0].mxu0 %v5411_v59  ;;  %v7337_v45 = vpack.c.bf16 %v410_v10, %v410_v10  ;;  %v7346_v59 = vld [vmem:[#allocation2 + $0xa0] sm:$0xff] }
 0x248   : > { %v3396_v2 = vpop.permute.xlu0 %3395  ;;  %1576 = vrot.lane.b32.xlu1 %v1563_v39, %s5654_s7  ;;  %4270 = vmatprep.mubr.bf16.mxu0 %v5412_v24  ;;  %v7363_v24 = vmul.f32 %v7348_v30, %v395_v50 }
 0x249   : > { %v3413_v52 = vsel %vm3411_vm13, %v7247_v60, %v3396_v2  ;;  %v3414_v6 = vsel %vm3411_vm13, %v3396_v2, %v3398_v48  ;;  %v7306_v35 = vpop.permute.xlu1 %3564  ;;  %v1567_v2 = vrot.slane %v7275_v33, %v8896_v15  ;;  %v7468_v48 = vld [vmem:[#allocation2 + $0x68] sm:$0xff] }
 0x24a   : > { %3898 = vrot.lane.b32.xlu0 %v7208_v11, %s5650_s18  ;;  %4281 = vmatprep.subr.bf16.mxu0 %v3413_v52  ;;  %v7332_v11 = vmul.f32 %v7318_v1, %v395_v50  ;;  %8906 = vst [vmem:[#allocation26_spill] sm:$0xff] %v7363_v24 }
 0x24b   : > { %4388 = vmatpush1.bf16.msra.mxu1 %v3414_v6 }
 0x24c   : > { %8901 = vst [vmem:[#allocation17_spill] sm:$0xff] %v7332_v11  ;;  %v3392_v40 = vpop.permute.xlu0 %3391  ;;  %1580 = vrot.lane.b32.xlu1 %v1571_v38, %s5654_s7  ;;  %4377 = vmatmul.mubr.bf16.gmra.mrb[4].mxu1 %v5414_v34 }
 0x24d   : > { %v3412_v20 = vsel %vm3411_vm13, %v3392_v40, %v7247_v60  ;;  %v3559_v63 = vpop.permute.xlu1 %3558  ;;  %4419 = vmatprep.mubr.bf16.mxu1 %v8807_v19  ;;  %v7360_v60 = vmul.f32 %v7346_v59, %v395_v50 }
 0x24e   : > { %4282 = vmatpush1.bf16.msra.mxu0 %v3412_v20  ;;  %1405 = vrot.lane.b32.xlu0 %v1392_v31, %s5655_s8 }
 0x24f   : > { %8905 = vst [vmem:[#allocation25_spill] sm:$0xff] %v7360_v60  ;;  %4271 = vmatmul.mubr.bf16.gmra.mrb[4].mxu0 %v5414_v34 }
 0x250   : > { %v3410_v61 = vpop.permute.xlu0 %3409  ;;  %1572 = vrot.lane.b32.xlu1 %v1555_v12, %s5654_s7  ;;  %4313 = vmatprep.mubr.bf16.mxu0 %v8807_v19 }
 0x251   : > { %v3419_v9 = vsel %vm3411_vm13, %v7261_v56, %v3410_v61  ;;  %3439 = vst.msk [vmem:[#allocation4 + $0x2c8] sm:$0xff] %vm311_vm0, %v3410_v61  ;;  %v3575_v39 = vpop.permute.xlu1 %3574 }
 0x252   : > { %4389 = vmatprep.subr.bf16.mxu1 %v3419_v9  ;;  %1409 = vrot.lane.b32.xlu0 %v1400_v7, %s5655_s8 }
 0x253   : > { %4390 = vmatpush1.bf16.msra.mxu1 %v7280_v18 }
 0x254   : > { %v3404_v54 = vpop.permute.xlu0 %3403 }
 0x255   : > { %v3416_v31 = vsel %vm3411_vm13, %v7287_v27, %v3404_v54  ;;  %v3417_v58 = vsel %vm3411_vm13, %v3404_v54, %v7273_v44  ;;  %v3573_v16 = vpop.permute.xlu1 %3572  ;;  %v1559_v44 = vrot.slane %v7275_v33, %v8897_v21 }
 0x256   : > { %v3588_v56 = vsel %vm3341_vm11, %v3573_v16, %v3575_v39  ;;  %4283 = vmatprep.subr.bf16.mxu0 %v3417_v58  ;;  %1401 = vrot.lane.b32.xlu0 %v1384_v42, %s5655_s8 }
 0x257   : > { %4284 = vmatpush1.bf16.msra.mxu0 %v3416_v31 }
 0x258   : > { %v3563_v46 = vpop.permute.xlu0 %3562 }
 0x259   : > { %v3584_v18 = vsel %vm3341_vm11, %v3563_v46, %v7306_v35  ;;  %v3569_v38 = vpop.permute.xlu1 %3568 }
 0x25a   : > { %4391 = vmatprep.subr.bf16.mxu1 %v3584_v18  ;;  %1578 = vrot.lane.b32.xlu0 %v1567_v2, %s5654_s7 }
 0x25c   : > { %v3561_v27 = vpop.permute.xlu0 %3560 }
 0x25d   : > { %v3582_v34 = vsel %vm3341_vm11, %v3559_v63, %v3561_v27  ;;  %v3583_v17 = vsel %vm3341_vm11, %v3561_v27, %v3563_v46  ;;  %v3722_v50 = vpop.permute.xlu1 %3721 }
 0x25e   : > { %3755 = vst.msk [vmem:[#allocation4 + $0x340] sm:$0xff] %vm311_vm0, %v3722_v50  ;;  %4285 = vmatprep.subr.bf16.mxu0 %v3582_v34  ;;  %4392 = vmatpush1.bf16.msra.mxu1 %v3583_v17  ;;  %v7412_v17 = vld [vmem:[#allocation2 + $0x20] sm:$0xff] }
 0x25f   : > { %1574 = vrot.lane.b32.xlu0 %v1559_v44, %s5654_s7  ;;  %8907 = vst [vmem:[#allocation27_spill] sm:$0xff] %v7412_v17  ;;  %s5055_s7 = sshll.u32 %s8672_s11, 4  ;;  %s8741_s7 = int_to_ptr.vmem [resolvable:$true] %s5055_s7 }
 0x260   : > { %v3557_v52 = vpop.permute.xlu0 %3556 }
 0x261   : > { %v3581_v6 = vsel %vm3341_vm11, %v3557_v52, %v3559_v63  ;;  %v3716_v10 = vpop.permute.xlu1 %3715 }
 0x262   : > { %4286 = vmatpush1.bf16.msra.mxu0 %v3581_v6 }
 0x264   : > { %v7396_v37 = vpop.permute.xlu0 %3576 }
 0x265   : > { %v3589_v33 = vsel %vm3341_vm11, %v3575_v39, %v7396_v37  ;;  %v3730_v12 = vpop.permute.xlu1 %3729 }
 0x266   : > { %4393 = vmatprep.subr.bf16.mxu1 %v3589_v33  ;;  %v7423_v33 = vld [vmem:[#allocation2 + $0x18] sm:$0xff] }
 0x267   : > { %4394 = vmatpush1.bf16.msra.mxu1 %v3588_v56  ;;  %8911 = vst [vmem:[#allocation31_spill] sm:$0xff] %v7423_v33 }
 0x268   : > { %v3571_v40 = vpop.permute.xlu0 %3570 }
 0x269   : > { %v3586_v20 = vsel %vm3341_vm11, %v3569_v38, %v3571_v40  ;;  %v3587_v7 = vsel %vm3341_vm11, %v3571_v40, %v3573_v16  ;;  %v3728_v61 = vpop.permute.xlu1 %3727  ;;  %v621_v38 = vld [vmem:[#allocation10 + $0xa] sm:$0x1f] }
 0x26a   : > { %v3739_v9 = vsel %vm3411_vm13, %v3728_v61, %v3730_v12  ;;  %4287 = vmatprep.subr.bf16.mxu0 %v3587_v7  ;;  %v638_v34 = vrot.slane %v621_v38, %v8896_v15  ;;  %v634_v52 = vrot.slane %v621_v38, %v5888_v3 }
 0x26b   : > { %4288 = vmatpush1.bf16.msra.mxu0 %v3586_v20 }
 0x26c   : > { %v3720_v63 = vpop.permute.xlu0 %3719  ;;  %v7418_v6 = vmul.f32 %v7412_v17, %v638_v34  ;;  %v7428_v20 = vmul.f32 %v634_v52, %v7423_v33 }
 0x26d   : > { %v3736_v42 = vsel %vm3411_vm13, %v3720_v63, %v3722_v50  ;;  %v3724_v54 = vpop.permute.xlu1 %3723  ;;  %v7414_v50 = vld [vmem:[#allocation2 + $0x68] sm:$0xff] }
 0x26e   : > { %4395 = vmatprep.subr.bf16.mxu1 %v3736_v42  ;;  %8908 = vst [vmem:[#allocation28_spill] sm:$0xff] %v7414_v50  ;;  %8909 = vst [vmem:[#allocation29_spill] sm:$0xff] %v7418_v6 }
 0x26f   : > { %8913 = vst [vmem:[#allocation33_spill] sm:$0xff] %v7428_v20 }
 0x270   : > { %v3718_v31 = vpop.permute.xlu0 %3717 }
 0x271   : > { %v3734_v39 = vsel %vm3411_vm13, %v3716_v10, %v3718_v31  ;;  %v3735_v58 = vsel %vm3411_vm13, %v3718_v31, %v3720_v63  ;;  %v7406_v56 = vpop.permute.xlu1 %3884 }
 0x272   : > { %4289 = vmatprep.subr.bf16.mxu0 %v3734_v39  ;;  %4396 = vmatpush1.bf16.msra.mxu1 %v3735_v58  ;;  %v7441_v58 = vld [vmem:[#allocation2 + $0xb0] sm:$0xff] }
 0x273   : > { %8915 = vst [vmem:[#allocation35_spill] sm:$0xff] %v7441_v58 }
 0x274   : > { %v3714_v16 = vpop.permute.xlu0 %3713 }
 0x275   : > { %v3733_v2 = vsel %vm3411_vm13, %v3714_v16, %v3716_v10  ;;  %v738_v46 = vpop.permute.xlu1 %737  ;;  %v7421_v10 = vmul.f32 %v7414_v50, %v638_v34  ;;  %v7443_v16 = vld [vmem:[#allocation2 + $0xf8] sm:$0xff] }
 0x276   : > { %4290 = vmatpush1.bf16.msra.mxu0 %v3733_v2  ;;  %8916 = vst [vmem:[#allocation36_spill] sm:$0xff] %v7443_v16 }
 0x277   : > { %8910 = vst [vmem:[#allocation30_spill] sm:$0xff] %v7421_v10 }
 0x278   : > { %v3732_v18 = vpop.permute.xlu0 %3731 }
 0x279   : > { %v3740_v44 = vsel %vm3411_vm13, %v3730_v12, %v3732_v18  ;;  %3760 = vst.msk [vmem:[#allocation4 + $0x368] sm:$0xff] %vm311_vm0, %v3732_v18  ;;  %v3881_v27 = vpop.permute.xlu1 %3880  ;;  %v7425_v12 = vld [vmem:[#allocation2 + $0x60] sm:$0xff] }
 0x27a   : > { %4397 = vmatprep.subr.bf16.mxu1 %v3740_v44  ;;  %8912 = vst [vmem:[#allocation32_spill] sm:$0xff] %v7425_v12  ;;  %v7431_v7 = vmul.f32 %v634_v52, %v7425_v12  ;;  %v7454_v44 = vmul.f32 %v7327_v47, %v634_v52  ;;  %v7722_v12 = vld [vmem:[#allocation2 + $0x10] sm:$0xff] }
 0x27b   : > { %4398 = vmatpush1.bf16.msra.mxu1 %v3739_v9  ;;  %8930 = vst [vmem:[#allocation47_spill] sm:$0xff] %v7722_v12 }
 0x27c   : > { %v3726_v40 = vpop.permute.xlu0 %3725  ;;  %8914 = vst [vmem:[#allocation34_spill] sm:$0xff] %v7431_v7  ;;  %8919 = vst [vmem:[#allocation39_spill] sm:$0xff] %v7454_v44  ;;  %v626_v44 = vrot.slane %v621_v38, %v5890_v4 }
 0x27d   : > { %v3737_v63 = vsel %vm3411_vm13, %v3724_v54, %v3726_v40  ;;  %v3738_v9 = vsel %vm3411_vm13, %v3726_v40, %v3728_v61  ;;  %v7435_v42 = vpop.permute.xlu1 %3878  ;;  %v7448_v54 = vmul.f32 %v7441_v58, %v638_v34  ;;  %v7451_v61 = vmul.f32 %v7443_v16, %v638_v34  ;;  %v7478_v34 = vld [vmem:[#allocation2 + $0x28] sm:$0xff] }
 0x27e   : > { %v3901_v39 = vsel %vm3341_vm11, %v7435_v42, %v3881_v27  ;;  %4291 = vmatprep.subr.bf16.mxu0 %v3738_v9  ;;  %v7457_v40 = vmul.f32 %v7335_v57, %v634_v52  ;;  %v648_v6 = vmul.f32 %v7197_v28, %v626_v44 }
 0x27f   : > { %4292 = vmatpush1.bf16.msra.mxu0 %v3737_v63  ;;  %8917 = vst [vmem:[#allocation37_spill] sm:$0xff] %v7448_v54  ;;  %8918 = vst [vmem:[#allocation38_spill] sm:$0xff] %v7451_v61 }
 0x280   : > { %v3883_v18 = vpop.permute.xlu0 %3882  ;;  %4293 = vmatprep.subr.bf16.mxu0 %v3901_v39  ;;  %8920 = vst [vmem:[#allocation40_spill] sm:$0xff] %v7457_v40  ;;  %v7466_v39 = vld [vmem:[#allocation2 + $0x20] sm:$0xff] }
 0x281   : > { %v3902_v9 = vsel %vm3341_vm11, %v3881_v27, %v3883_v18  ;;  %v3903_v2 = vsel %vm3341_vm11, %v3883_v18, %v7406_v56  ;;  %v3895_v63 = vpop.permute.xlu1 %3894  ;;  %v630_v18 = vrot.slane %v621_v38, %v8897_v21  ;;  %v7500_v38 = vld [vmem:[#allocation2 + $0xa0] sm:$0xff] }
 0x282   : > { %4399 = vmatprep.subr.bf16.mxu1 %v3903_v2 }
 0x283   : > { %4400 = vmatpush1.bf16.msra.mxu1 %v3902_v9  ;;  %v7483_v9 = vmul.f32 %v7308_v29, %v630_v18  ;;  %v7486_v19 = vmul.f32 %v7318_v1, %v630_v18 }
 0x284   : > { %v736_v52 = vpop.permute.xlu0 %735 }
 0x285   : > { %v743_v22 = vsel %vm311_vm0, %v736_v52, %v738_v46  ;;  %v7471_v27 = vpop.permute.xlu1 %3892  ;;  %8921 = vst [vmem:[#allocation41_spill] sm:$0xff] %v7483_v9  ;;  %8922 = vst [vmem:[#allocation42_spill] sm:$0xff] %v7486_v19 }
 0x286   : > { %v753_v5 = vmul.f32 %v743_v22, %v7466_v39  ;;  %v758_v31 = vmul.f32 %v743_v22, %v7468_v48  ;;  %v3907_v2 = vsel %vm3341_vm11, %v7471_v27, %v3895_v63 }
 0x288   : > { %v740_v40 = vpop.permute.xlu0 %739  ;;  %v773_v54 = vpack.c.bf16 %v758_v31, %v753_v5  ;;  %v7502_v5 = vld [vmem:[#allocation2 + $0xe8] sm:$0xff]  ;;  %v7506_v31 = vpack.c.bf16 %v648_v6, %v648_v6 }
 0x289   : > { %v7490_v61 = vsel %vm311_vm0, %v738_v46, %v740_v40  ;;  %v3889_v20 = vpop.permute.xlu1 %3888  ;;  %v7504_v46 = vld [vmem:[#allocation10 + $0x37] sm:$0x1f]  ;;  %v7509_v40 = vmul.f32 %v7500_v38, %v630_v18  ;;  %v7512_v44 = vmul.f32 %v7502_v5, %v630_v18 }
 0x28a   : > { %v754_v10 = vmul.f32 %v7490_v61, %v7478_v34  ;;  %v759_v60 = vmul.f32 %v7490_v61, %v7480_v41  ;;  %796 = vrot.lane.b32.xlu0 %v773_v54, %s5643_s27  ;;  %8923 = vst [vmem:[#allocation43_spill] sm:$0xff] %v7506_v31  ;;  %v1734_v18 = vrot.slane %v7504_v46, %v5888_v3 }
 0x28b   : > { %8924 = vst [vmem:[#allocation44_spill] sm:$0xff] %v7509_v40  ;;  %8925 = vst [vmem:[#allocation45_spill] sm:$0xff] %v7512_v44  ;;  %v1738_v44 = vrot.slane %v7504_v46, %v8896_v15 }
 0x28c   : > { %v734_v7 = vpop.permute.xlu0 %733  ;;  %v774_v9 = vpack.c.bf16 %v759_v60, %v754_v10 }
 0x28d   : > { %v7515_v19 = vsel %vm311_vm0, %v734_v7, %v736_v52  ;;  %v7517_v54 = vpop.permute.xlu1 %925  ;;  %v8926_v52 = vld [vmem:[#allocation19_spill] sm:$0xff] }
 0x28e   : > { %v752_v6 = vmul.f32 %v7515_v19, %v7297_v32  ;;  %v757_v31 = vmul.f32 %v7515_v19, %v7299_v23  ;;  %798 = vrot.lane.b32.xlu1 %v774_v9, %s5643_s27  ;;  %v7530_v51 = vsel %vm311_vm0, %v8926_v52, %v734_v7  ;;  %v1742_v9 = vrot.slane %v7504_v46, %v5902_v13 }
 0x290   : > { %v3877_v60 = vpop.permute.xlu0 %3876  ;;  %v772_v10 = vpack.c.bf16 %v757_v31, %v752_v6  ;;  %v5449_v31 = vld [vmem:[#allocation2 + $0x10] sm:$0xff]  ;;  %v5450_v6 = vld [vmem:[#allocation2 + $0x58] sm:$0xff] }
 0x291   : > { %v3900_v24 = vsel %vm3341_vm11, %v3877_v60, %v7435_v42  ;;  %v7534_v40 = vpop.permute.xlu1 %929  ;;  %v751_v7 = vmul.f32 %v5449_v31, %v7530_v51  ;;  %v756_v0 = vmul.f32 %v5450_v6, %v7530_v51  ;;  %v7546_v60 = vld [vmem:[#allocation2 + $0xb0] sm:$0xff]  ;;  %v7559_v31 = vld [vmem:[#allocation8 + $0x8] ss:$12 sps:$4 sm:$0xff]  }
 0x292   : > { %1747 = vrot.lane.b32.xlu1 %v1734_v18, %s5652_s26  ;;  %794 = vrot.lane.b32.xlu0 %v772_v10, %s5643_s27  ;;  %v7548_v18 = vld [vmem:[#allocation2 + $0xf8] sm:$0xff]  ;;  %v763_v6 = vmul.f32 %v743_v22, %v7546_v60 }
 0x293   : > { %4294 = vmatpush1.bf16.msra.mxu0 %v3900_v24  ;;  %v1730_v24 = vrot.slane %v7504_v46, %v8897_v21  ;;  %v771_v62 = vpack.c.bf16 %v756_v0, %v751_v7 }
 0x294   : > { %v7544_v42 = vpop.permute.xlu0 %3896 }
 0x295   : > { %v3908_v10 = vsel %vm3341_vm11, %v3895_v63, %v7544_v42  ;;  %v2925_v25 = vpop.permute.xlu1 %2924  ;;  %v768_v63 = vmul.f32 %v743_v22, %v7548_v18 }
 0x296   : > { %v2943_v11 = vsel %vm2699_vm6, %v7033_v43, %v2925_v25  ;;  %1751 = vrot.lane.b32.xlu1 %v1742_v9, %s5652_s26  ;;  %1749 = vrot.lane.b32.xlu0 %v1738_v44, %s5652_s26  ;;  %v750_v43 = vmul.f32 %v7197_v28, %v8926_v52  ;;  %v4160_v25 = vld [vmem:[#allocation4 + $0x2a0] sm:$0xff] }
 0x297   : > { %2963 = vst.msk [vmem:[#allocation4 + $0x1b0] sm:$0xff] %vm311_vm0, %v2943_v11  ;;  %4401 = vmatprep.subr.bf16.mxu1 %v3908_v10  ;;  %v7568_v10 = vld [vmem:[#allocation2 + $0xb8] sm:$0xff] }
 0x298   : > { %v3891_v26 = vpop.permute.xlu0 %3890  ;;  %4402 = vmatpush1.bf16.msra.mxu1 %v3907_v2  ;;  %v7578_v0 = vpack.c.bf16 %v750_v43, %v750_v43  ;;  %v4125_v43 = vld [vmem:[#allocation4 + $0x188] sm:$0xff] }
 0x299   : > { %v3905_v44 = vsel %vm3341_vm11, %v3889_v20, %v3891_v26  ;;  %v3906_v9 = vsel %vm3341_vm11, %v3891_v26, %v7471_v27  ;;  %v3579_v11 = vpop.permute.xlu1 %3578  ;;  %5245 = vmatprep.subr.bf16.mxu1 %v4160_v25  ;;  %v778_v26 = vpack.c.bf16 %v768_v63, %v763_v6  ;;  %v4120_v20 = vld [vmem:[#allocation4 + $0x160] sm:$0xff]  ;;  %v4165_v27 = vld [vmem:[#allocation4 + $0x2c8] sm:$0xff]  ;;  %v761_v6 = vmul.f32 %v7530_v51, %v7346_v59 }
 0x29a   : > { %v3590_v22 = vsel %vm3341_vm11, %v7396_v37, %v3579_v11  ;;  %792 = vrot.lane.b32.xlu1 %v771_v62, %s5643_s27  ;;  %1745 = vrot.lane.b32.xlu0 %v1730_v24, %s5652_s26  ;;  %v764_v37 = vmul.f32 %v7490_v61, %v7568_v10  ;;  %v769_v62 = vmul.f32 %v7490_v61, %v7570_v49  ;;  %v8927_v61 = vmov 0  }
 0x29b   : > { %3610 = vst.msk [vmem:[#allocation4 + $0x318] sm:$0xff] %vm311_vm0, %v3590_v22  ;;  %4295 = vmatprep.subr.bf16.mxu0 %v3906_v9  ;;  %4420 = vmatmul.mubr.bf16.vlgmr.msra.gmra.mrb[0].mxu1 %v7559_v31  ;;  %v1726_v24 = vrot.slane %v7504_v46, %v5890_v4  ;;  %v762_v46 = vmul.f32 %v7168_v14, %v7515_v19  ;;  %v4085_v22 = vld [vmem:[#allocation4 + $0x48] sm:$0xff] }
 0x29c   : > { %v3567_v28 = vpop.permute.xlu0 %3566  ;;  %4296 = vmatpush1.bf16.msra.mxu0 %v3905_v44  ;;  %5246 = vmatpush3.bf16.msra.mxu1 %v4160_v25  ;;  %v7601_v25 = vld [vmem:[#allocation8 + $0x20] ss:$12 sps:$4 sm:$0xff]   ;;  %v767_v44 = vmul.f32 %v7170_v8, %v7515_v19  ;;  %v779_v11 = vpack.c.bf16 %v769_v62, %v764_v37  ;;  %v4090_v37 = vld [vmem:[#allocation4 + $0x70] sm:$0xff] }
 0x29d   : > { %v3585_v2 = vsel %vm3341_vm11, %v7306_v35, %v3567_v28  ;;  %v3887_v52 = vpop.permute.xlu1 %3886  ;;  %5179 = vmatprep.subr.bf16.mxu0 %v4120_v20  ;;  %5247 = vmatprep.subr.bf16.mxu1 %v4165_v27  ;;  %v4080_v35 = vld [vmem:[#allocation4 + $0x20] sm:$0xff] }
 0x29e   : > { %3605 = vst.msk [vmem:[#allocation4 + $0x2f0] sm:$0xff] %vm311_vm0, %v3585_v2  ;;  %v3904_v7 = vsel %vm3341_vm11, %v7406_v56, %v3887_v52  ;;  %806 = vrot.lane.b32.xlu1 %v778_v26, %s5643_s27  ;;  %790 = vrot.lane.b32.xlu0 %v7578_v0, %s5643_s27  ;;  %v766_v56 = vmul.f32 %v7530_v51, %v7348_v30  ;;  %v7612_v51 = vld [vmem:[#allocation10 + $0x3c] sm:$0x1f] }
 0x29f   : > { %3924 = vst.msk [vmem:[#allocation4 + $0x390] sm:$0xff] %vm311_vm0, %v3904_v7  ;;  %4314 = vmatmul.mubr.bf16.vlgmr.msra.gmra.mrb[0].mxu0 %v7559_v31  ;;  %4429 = vmatprep.mubr.bf16.mxu1 %v8927_v61  ;;  %v4130_v14 = vld [vmem:[#allocation4 + $0x1b0] sm:$0xff]  ;;  %v777_v19 = vpack.c.bf16 %v767_v44, %v762_v46  ;;  %v7627_v7 = vld [vmem:[#allocation2 + $0x78] sm:$0xff]  ;;  %v4180_v46 = vld [vmem:[#allocation4 + $0x340] sm:$0xff] }
 0x2a0   : > { %v928_v63 = vpop.permute.xlu0 %927  ;;  %5180 = vmatpush3.bf16.msra.mxu0 %v4080_v35  ;;  %5248 = vmatpush3.bf16.msra.mxu1 %v4165_v27  ;;  %v776_v26 = vpack.c.bf16 %v766_v56, %v761_v6  ;;  %v1905_v27 = vrot.slane %v7612_v51, %v5888_v3  ;;  %v1913_v6 = vrot.slane %v7612_v51, %v5902_v13  ;;  %v5451_v44 = vld [vmem:[#allocation8 + $0x4] ss:$12 sps:$4 sm:$0xff]  }
 0x2a1   : > { %v7607_v9 = vpop.permute.xlu1 %1165  ;;  %5181 = vmatprep.subr.bf16.mxu0 %v4125_v43  ;;  %4323 = vmatprep.mubr.bf16.mxu0 %v8927_v61  ;;  %v1909_v56 = vrot.slane %v7612_v51, %v8896_v15  ;;  %v933_v43 = vsel %vm311_vm0, %v7517_v54, %v928_v63  ;;  %v4185_v61 = vld [vmem:[#allocation4 + $0x368] sm:$0xff] }
 0x2a2   : > { %1743 = vrot.lane.b32.xlu1 %v1726_v24, %s5652_s26  ;;  %808 = vrot.lane.b32.xlu0 %v779_v11, %s5643_s27  ;;  %v4175_v2 = vld [vmem:[#allocation4 + $0x318] sm:$0xff]  ;;  %v7631_v24 = vsel %vm311_vm0, %v928_v63, %v7534_v40  ;;  %v953_v50 = vmul.f32 %v933_v43, %v7568_v10 }
 0x2a3   : > { %4430 = vmatmul.mubr.bf16.gmra.mrb[4].mxu1 %v7601_v25 }
 0x2a4   : > { %v924_v28 = vpop.permute.xlu0 %923  ;;  %5182 = vmatpush3.bf16.msra.mxu0 %v4085_v22  ;;  %5261 = vmatprep.mubr.bf16.mxu1 %v7559_v31  ;;  %v7625_v31 = vld [vmem:[#allocation2 + $0x30] sm:$0xff] }
 0x2a5   : > { %v1162_v8 = vpop.permute.xlu1 %1161  ;;  %v4170_v20 = vld [vmem:[#allocation4 + $0x2f0] sm:$0xff]  ;;  %5183 = vmatprep.subr.bf16.mxu0 %v4130_v14 }
 0x2a6   : > { %802 = vrot.lane.b32.xlu1 %v776_v26, %s5643_s27  ;;  %804 = vrot.lane.b32.xlu0 %v777_v19, %s5643_s27  ;;  %v949_v26 = vmul.f32 %v7631_v24, %v7627_v7 }
 0x2a7   : > { %5249 = vmatprep.subr.bf16.mxu1 %v4170_v20  ;;  %4324 = vmatmul.mubr.bf16.gmra.mrb[4].mxu0 %v7601_v25 }
 0x2a8   : > { %v7620_v62 = vpop.permute.xlu0 %921  ;;  %5250 = vmatpush3.bf16.msra.mxu1 %v4170_v20  ;;  %5184 = vmatpush3.bf16.msra.mxu0 %v4090_v37  ;;  %v1897_v20 = vrot.slane %v7612_v51, %v5890_v4 }
 0x2a9   : > { %v7622_v52 = vpop.permute.xlu1 %1159  ;;  %5251 = vmatprep.subr.bf16.mxu1 %v4175_v2  ;;  %4472 = vmatprep.mubr.bf16.mxu0 %v5451_v44  ;;  %v948_v44 = vmul.f32 %v933_v43, %v7480_v41  ;;  %v940_v16 = vmul.f32 %v7620_v62, %v7308_v29  ;;  %v4100_v29 = vld [vmem:[#allocation4 + $0xc0] sm:$0xff] }
 0x2aa   : > { %v7635_v35 = vsel %vm311_vm0, %v7622_v52, %v1162_v8  ;;  %1918 = vrot.lane.b32.xlu1 %v1905_v27, %s5651_s9  ;;  %800 = vrot.lane.b32.xlu0 %v7578_v0, %s5643_s27  ;;  %v944_v0 = vmul.f32 %v7631_v24, %v7625_v31  ;;  %v1901_v27 = vrot.slane %v7612_v51, %v8897_v21  ;;  %v7682_v51 = vld [vmem:[#allocation2 + $0xb8] sm:$0xff] }
 0x2ab   : > { %v7648_v11 = vmul.f32 %v7635_v35, %v7466_v39  ;;  %v7652_v22 = vmul.f32 %v7635_v35, %v7468_v48  ;;  %8928 = vst [vmem:[#allocation19_spill] sm:$0xff] %v7682_v51  ;;  %v4140_v51 = vld [vmem:[#allocation4 + $0x200] sm:$0xff] }
 0x2ac   : > { %v2937_v40 = vpop.permute.xlu0 %2936  ;;  %5252 = vmatpush3.bf16.msra.mxu1 %v4175_v2  ;;  %v7670_v2 = vld [vmem:[#allocation2 + $0x28] sm:$0xff] }
 0x2ad   : > { %v2948_v63 = vsel %vm2699_vm6, %v7130_v36, %v2937_v40  ;;  %v3257_v14 = vpop.permute.xlu1 %3256  ;;  %5253 = vmatprep.subr.bf16.mxu1 %v4180_v46  ;;  %v7672_v36 = vld [vmem:[#allocation2 + $0x70] sm:$0xff]  ;;  %v943_v40 = vmul.f32 %v933_v43, %v7478_v34 }
 0x2ae   : > { %2968 = vst.msk [vmem:[#allocation4 + $0x1d8] sm:$0xff] %vm311_vm0, %v2948_v63  ;;  %v3267_v19 = vsel %vm2699_vm6, %v7257_v55, %v3257_v14  ;;  %1922 = vrot.lane.b32.xlu1 %v1913_v6, %s5651_s9  ;;  %v7678_v55 = vsel %vm311_vm0, %v7620_v62, %v924_v28  ;;  %1920 = vrot.lane.b32.xlu0 %v1909_v56, %s5651_s9  ;;  %v7684_v6 = vld [vmem:[#allocation2 + $0x100] sm:$0xff]  ;;  %v7717_v56 = vld [vmem:[#allocation2 + $0xf0] sm:$0xff] }
 0x2af   : > { %3287 = vst.msk [vmem:[#allocation4 + $0x278] sm:$0xff] %vm311_vm0, %v3267_v19  ;;  %8929 = vst [vmem:[#allocation46_spill] sm:$0xff] %v7684_v6  ;;  %v932_v14 = vsel %vm311_vm0, %v924_v28, %v7517_v54  ;;  %v964_v63 = vpack.c.bf16 %v949_v26, %v944_v0  ;;  %v946_v19 = vmul.f32 %v7678_v55, %v7299_v23 }
 0x2b0   : > { %v7690_v37 = vpop.permute.xlu0 %1163  ;;  %5254 = vmatpush3.bf16.msra.mxu1 %v4180_v46  ;;  %v941_v46 = vmul.f32 %v7678_v55, %v7297_v32  ;;  %v942_v0 = vmul.f32 %v932_v14, %v7466_v39  ;;  %v947_v26 = vmul.f32 %v932_v14, %v7468_v48  ;;  %v963_v13 = vpack.c.bf16 %v948_v44, %v943_v40  ;;  %v4190_v32 = vld [vmem:[#allocation4 + $0x390] sm:$0xff] }
 0x2b1   : > { %v7700_v4 = vsel %vm311_vm0, %v1162_v8, %v7690_v37  ;;  %5255 = vmatprep.subr.bf16.mxu1 %v4185_v61  ;;  %v7715_v8 = vld [vmem:[#allocation2 + $0xa8] sm:$0xff]  ;;  %v958_v44 = vmul.f32 %v933_v43, %v7570_v49  ;;  %v945_v40 = vmul.f32 %v7620_v62, %v7318_v1  ;;  %v7744_v43 = vld [vmem:[#allocation2 + $0xc0] sm:$0xff] }
 0x2b2   : > { %v7704_v54 = vmul.f32 %v7700_v4, %v7478_v34  ;;  %v7708_v28 = vmul.f32 %v7700_v4, %v7480_v41  ;;  %1914 = vrot.lane.b32.xlu1 %v1897_v20, %s5651_s9  ;;  %1916 = vrot.lane.b32.xlu0 %v1901_v27, %s5651_s9  ;;  %v7724_v20 = vld [vmem:[#allocation2 + $0x58] sm:$0xff]  ;;  %v961_v23 = vpack.c.bf16 %v946_v19, %v941_v46 }
 0x2b3   : > { %8931 = vst [vmem:[#allocation48_spill] sm:$0xff] %v7724_v20  ;;  %v962_v58 = vpack.c.bf16 %v947_v26, %v942_v0  ;;  %v957_v46 = vmul.f32 %v932_v14, %v7548_v18  ;;  %v968_v1 = vpack.c.bf16 %v958_v44, %v953_v50  ;;  %v954_v0 = vmul.f32 %v7631_v24, %v7744_v43  ;;  %v8971_v20 = vld [vmem:[#allocation32_spill] sm:$0xff] }
 0x2b4   : > { %v1168_v33 = vpop.permute.xlu0 %1167  ;;  %5256 = vmatpush3.bf16.msra.mxu1 %v4185_v61  ;;  %v4095_v61 = vld [vmem:[#allocation4 + $0x98] sm:$0xff]  ;;  %v960_v26 = vpack.c.bf16 %v945_v40, %v940_v16  ;;  %v950_v16 = vmul.f32 %v7620_v62, %v7346_v59  ;;  %v7775_v40 = vld [vmem:[#allocation2 + $0x30] sm:$0xff] }
 0x2b5   : > { %v4135_v27 = vld [vmem:[#allocation4 + $0x1d8] sm:$0xff]  ;;  %5257 = vmatprep.subr.bf16.mxu1 %v4190_v32 }
 0x2b6   : > { %988 = vrot.lane.b32.xlu1 %v964_v63, %s5643_s27  ;;  %5185 = vmatprep.subr.bf16.mxu0 %v4135_v27  ;;  %v7746_v63 = vld [vmem:[#allocation2 + $0x108] sm:$0xff] }
 0x2b7   : > { %986 = vrot.lane.b32.xlu0 %v963_v13, %s5643_s27  ;;  %5186 = vmatpush3.bf16.msra.mxu0 %v4095_v61  ;;  %v952_v13 = vmul.f32 %v932_v14, %v7546_v60  ;;  %v7777_v61 = vld [vmem:[#allocation2 + $0x78] sm:$0xff] }
 0x2b8   : > { %v3245_v27 = vpop.permute.xlu0 %3244  ;;  %5187 = vmatprep.subr.bf16.mxu0 %v4140_v51  ;;  %5258 = vmatpush3.bf16.msra.mxu1 %v4190_v32  ;;  %v959_v51 = vmul.f32 %v7631_v24, %v7746_v63  ;;  %v7759_v32 = vld [vmem:[#allocation10 + $0x1e] sm:$0x1f]  ;;  %v955_v24 = vmul.f32 %v7620_v62, %v7348_v30 }
 0x2b9   : > { %v3262_v19 = vsel %vm2699_vm6, %v7183_v53, %v3245_v27  ;;  %v4145_v53 = vld [vmem:[#allocation4 + $0x228] sm:$0xff]  ;;  %8932 = vst [vmem:[#allocation49_spill] sm:$0xff] %v7759_v32  ;;  %v7765_v50 = vrot.slane %v7759_v32, %v8896_v15  ;;  %v967_v27 = vpack.c.bf16 %v957_v46, %v952_v13  ;;  %v7799_v13 = vld [vmem:[#allocation2 + $0x90] sm:$0xff] }
 0x2ba   : > { %3282 = vst.msk [vmem:[#allocation4 + $0x250] sm:$0xff] %vm311_vm0, %v3262_v19  ;;  %982 = vrot.lane.b32.xlu1 %v961_v23, %s5643_s27  ;;  %v951_v23 = vmul.f32 %v7678_v55, %v7327_v47  ;;  %v1172_v47 = vsel %vm311_vm0, %v7607_v9, %v1168_v33  ;;  %v969_v62 = vpack.c.bf16 %v959_v51, %v954_v0  ;;  %v4110_v0 = vld [vmem:[#allocation4 + $0x110] sm:$0xff] }
 0x2bb   : > { %984 = vrot.lane.b32.xlu0 %v962_v58, %s5643_s27  ;;  %5188 = vmatpush3.bf16.msra.mxu0 %v4100_v29  ;;  %v956_v58 = vmul.f32 %v7678_v55, %v7335_v57  ;;  %v1408_v57 = vpop.permute.xlu1 %1407  ;;  %v7785_v59 = vmul.f32 %v7775_v40, %v7765_v50  ;;  %v7789_v30 = vmul.f32 %v7777_v61, %v7765_v50  ;;  %v8946_v19 = vld [vmem:[#allocation23_spill] sm:$0xff] }
 0x2bc   : > { %v3899_v14 = vpop.permute.xlu0 %3898  ;;  %5189 = vmatprep.subr.bf16.mxu0 %v4145_v53  ;;  %v1171_v33 = vsel %vm311_vm0, %v7690_v37, %v7607_v9  ;;  %v1182_v46 = vmul.f32 %v7799_v13, %v1172_v47  ;;  %v965_v53 = vpack.c.bf16 %v955_v24, %v950_v16  ;;  %v4115_v47 = vld [vmem:[#allocation4 + $0x138] sm:$0xff] }
 0x2bd   : > { %v3909_v44 = vsel %vm3341_vm11, %v7544_v42, %v3899_v14  ;;  %v4105_v42 = vld [vmem:[#allocation4 + $0xe8] sm:$0xff]  ;;  %8933 = vst [vmem:[#allocation50_spill] sm:$0xff] %v7785_v59  ;;  %8934 = vst [vmem:[#allocation51_spill] sm:$0xff] %v7789_v30  ;;  %v1181_v14 = vmul.f32 %v1171_v33, %v7625_v31  ;;  %v8964_v59 = vld [vmem:[#allocation29_spill] sm:$0xff] }
 0x2be   : > { %3929 = vst.msk [vmem:[#allocation4 + $0x3b8] sm:$0xff] %vm311_vm0, %v3909_v44  ;;  %996 = vrot.lane.b32.xlu1 %v968_v1, %s5643_s27  ;;  %v966_v1 = vpack.c.bf16 %v956_v58, %v951_v23  ;;  %v1186_v23 = vmul.f32 %v1171_v33, %v7627_v7  ;;  %v4155_v44 = vld [vmem:[#allocation4 + $0x278] sm:$0xff]  ;;  %v7824_v24 = vpack.c.bf16 %v1182_v46, %v1182_v46 }
 0x2bf   : > { %980 = vrot.lane.b32.xlu0 %v960_v26, %s5643_s27  ;;  %5190 = vmatpush3.bf16.msra.mxu0 %v4105_v42 }
 0x2c0   : > { %v7795_v55 = vpop.permute.xlu0 %1405 }
 0x2c1   : > { %v4150_v29 = vld [vmem:[#allocation4 + $0x250] sm:$0xff]  ;;  %v1414_v26 = vsel %vm1411_vm12, %v7795_v55, %v1408_v57 }
 0x2c2   : > { %994 = vrot.lane.b32.xlu1 %v967_v27, %s5643_s27  ;;  %5191 = vmatprep.subr.bf16.mxu0 %v4150_v29  ;;  %v7806_v9 = vmul.f32 %v1414_v26, %v7466_v39  ;;  %v7809_v37 = vmul.f32 %v1414_v26, %v7468_v48  ;;  %v7812_v51 = vmul.f32 %v1414_v26, %v7546_v60  ;;  %v8936_v29 = vld [vmem:[#allocation20_spill] sm:$0xff]  ;;  %v7967_v48 = vld [vmem:[#allocation2 + $0xb0] sm:$0xff] }
 0x2c3   : > { %998 = vrot.lane.b32.xlu0 %v969_v62, %s5643_s27  ;;  %5192 = vmatpush3.bf16.msra.mxu0 %v4110_v0  ;;  %v7818_v58 = vmul.f32 %v1414_v26, %v7548_v18  ;;  %v1191_v0 = vmul.f32 %v1171_v33, %v7744_v43 }
 0x2c4   : > { %5193 = vmatprep.subr.bf16.mxu0 %v4155_v44  ;;  %v7820_v39 = vpop.permute.xlu0 %1409  ;;  %v7862_v44 = vld [vmem:[#allocation2 + $0x18] sm:$0xff] }
 0x2c5   : > { %8935 = vst [vmem:[#allocation52_spill] sm:$0xff] %v7820_v39  ;;  %v4195_v16 = vld [vmem:[#allocation4 + $0x3b8] sm:$0xff]  ;;  %v1415_v31 = vsel %vm1411_vm12, %v1408_v57, %v7820_v39  ;;  %v1201_v57 = vpack.c.bf16 %v1186_v23, %v1181_v14  ;;  %v1196_v14 = vmul.f32 %v1171_v33, %v7746_v63  ;;  %v5453_v23 = vld [vmem:[#allocation8] ss:$12 sps:$4 sm:$0xff]   ;;  %v1404_v63 = vpop.permute.xlu1 %1403 }
 0x2c6   : > { %990 = vrot.lane.b32.xlu1 %v965_v53, %s5643_s27  ;;  %5259 = vmatprep.subr.bf16.mxu1 %v4195_v16  ;;  %v7832_v42 = vmul.f32 %v1415_v31, %v7478_v34  ;;  %v7835_v27 = vmul.f32 %v1415_v31, %v7480_v41  ;;  %v7838_v62 = vmul.f32 %v1415_v31, %v7568_v10  ;;  %v8937_v53 = vld [vmem:[#allocation21_spill] sm:$0xff]  ;;  %v8939_v33 = vld [vmem:[#allocation22_spill] sm:$0xff]  ;;  %v8969_v39 = vld [vmem:[#allocation31_spill] sm:$0xff] }
 0x2c7   : > { %992 = vrot.lane.b32.xlu0 %v966_v1, %s5643_s27  ;;  %5194 = vmatpush3.bf16.msra.mxu0 %v4115_v47  ;;  %v7842_v46 = vmul.f32 %v1415_v31, %v7570_v49  ;;  %v7849_v41 = vrot.slane %v7759_v32, %v5888_v3  ;;  %v8938_v26 = vpack.c.bf16 %v8936_v29, %v8937_v53  ;;  %v7866_v31 = vld [vmem:[#allocation2 + $0x60] sm:$0xff]  ;;  %v8940_v47 = vld [vmem:[#allocation17_spill] sm:$0xff]  ;;  %v7969_v34 = vld [vmem:[#allocation2 + $0xf8] sm:$0xff] }
 0x2c8   : > { %5260 = vmatpush3.bf16.msra.mxu1 %v4195_v16  ;;  %4583 = vmatprep.subr.bf16.mxu0 %v7337_v45  ;;  %v1178_v16 = vmul.f32 %v7862_v44, %v7622_v52  ;;  %v1183_v43 = vmul.f32 %v7866_v31, %v7622_v52  ;;  %v8941_v29 = vld [vmem:[#allocation16_spill] sm:$0xff]  ;;  %v1402_v1 = vpop.permute.xlu0 %1401  ;;  %v7896_v7 = vsel %vm1411_vm12, %v1404_v63, %v7795_v55 }
 0x2c9   : > { %4689 = vmatprep.subr.bf16.mxu1 %v8938_v26  ;;  %v8942_v53 = vpack.c.bf16 %v8940_v47, %v8941_v29  ;;  %v1190_v26 = vmul.f32 %v7700_v4, %v7568_v10  ;;  %v1195_v47 = vmul.f32 %v7700_v4, %v7570_v49  ;;  %v8948_v29 = vpack.c.bf16 %v7652_v22, %v7648_v11  ;;  %v8950_v22 = vld [vmem:[#allocation26_spill] sm:$0xff] }
 0x2ca   : > { %1226 = vrot.lane.b32.xlu1 %v7824_v24, %s5643_s27  ;;  %4473 = vmatmul.mubr.bf16.vlgmr.msra.gmra.mrb[8].mxu0 %v5453_v23  ;;  %v8945_v23 = vld [vmem:[#allocation24_spill] sm:$0xff]  ;;  %v7900_v10 = vrot.slane %v7759_v32, %v8897_v21  ;;  %v1198_v4 = vpack.c.bf16 %v1183_v43, %v1178_v16  ;;  %v7908_v49 = vmul.f32 %v7635_v35, %v7546_v60 }
 0x2cb   : > { %1224 = vrot.lane.b32.xlu0 %v1201_v57, %s5643_s27  ;;  %5262 = vmatmul.mubr.bf16.vlgmr.msra.gmra.mrb[8].mxu1 %v7601_v25  ;;  %v7876_v25 = vmul.f32 %v7670_v2, %v7849_v41  ;;  %v7880_v57 = vmul.f32 %v7672_v36, %v7849_v41  ;;  %v8947_v6 = vpack.c.bf16 %v8945_v23, %v8946_v19  ;;  %v3949_v19 = vld [vmem:[#allocation3 + $0x58] sm:$0xff] }
 0x2cc   : > { %4584 = vmatpush1.bf16.msra.mxu0 %v8939_v33  ;;  %4690 = vmatpush1.bf16.msra.mxu1 %v8942_v53  ;;  %v1206_v53 = vpack.c.bf16 %v1196_v14, %v1191_v0  ;;  %v7912_v11 = vmul.f32 %v7635_v35, %v7548_v18  ;;  %v3951_v0 = vld [vmem:[#allocation3 + $0x68] sm:$0xff]  ;;  %v7923_v60 = vsel %vm1411_vm12, %v1402_v1, %v1404_v63  ;;  %v7927_v35 = vld [vmem:[#allocation2 + $0xf0] sm:$0xff]  ;;  %v7965_v18 = vld [vmem:[#allocation2 + $0xc0] sm:$0xff] }
 0x2cd   : > { %8943 = vst [vmem:[#allocation20_spill] sm:$0xff] %v7876_v25  ;;  %8944 = vst [vmem:[#allocation21_spill] sm:$0xff] %v7880_v57  ;;  %4691 = vmatprep.subr.bf16.mxu1 %v8947_v6  ;;  %4585 = vmatprep.subr.bf16.mxu0 %v7337_v45  ;;  %v8949_v45 = vpack.c.bf16 %v7708_v28, %v7704_v54  ;;  %v8951_v6 = vld [vmem:[#allocation25_spill] sm:$0xff]  ;;  %v1193_v28 = vmul.f32 %v7927_v35, %v7622_v52  ;;  %v8012_v25 = vld [vmem:[#allocation10 + $0x28] sm:$0x1f] }
 0x2ce   : > { %1220 = vrot.lane.b32.xlu1 %v8948_v29, %s5643_s27  ;;  %v8952_v55 = vpack.c.bf16 %v8950_v22, %v8951_v6  ;;  %v7918_v14 = vld [vmem:[#allocation2 + $0xa8] sm:$0xff]  ;;  %v7933_v16 = vmul.f32 %v7862_v44, %v7896_v7  ;;  %v7937_v43 = vmul.f32 %v7866_v31, %v7896_v7  ;;  %v1205_v63 = vpack.c.bf16 %v1195_v47, %v1190_v26  ;;  %v3950_v22 = vld [vmem:[#allocation3 + $0x60] sm:$0xff]  ;;  %v7949_v6 = vld [vmem:[#allocation2 + $0x10] sm:$0xff] }
 0x2cf   : > { %1222 = vrot.lane.b32.xlu0 %v8949_v45, %s5643_s27  ;;  %v1188_v54 = vmul.f32 %v7918_v14, %v7622_v52  ;;  %v7942_v23 = vmul.f32 %v7412_v17, %v7900_v10  ;;  %v8954_v29 = vld [vmem:[#allocation28_spill] sm:$0xff]  ;;  %v3948_v45 = vld [vmem:[#allocation3 + $0x50] sm:$0xff]  ;;  %v7955_v26 = vld [vmem:[#allocation2 + $0x58] sm:$0xff] }
 0x2d0   : > { %4586 = vmatpush1.bf16.msra.mxu0 %v8939_v33  ;;  %4692 = vmatpush1.bf16.msra.mxu1 %v8952_v55  ;;  %v5458_v33 = vld [vmem:[#allocation8 + $0x1c] ss:$12 sps:$4 sm:$0xff]   ;;  %v7946_v52 = vmul.f32 %v8954_v29, %v7900_v10  ;;  %v7959_v47 = vmul.f32 %v7955_v26, %v7923_v60  ;;  %v3954_v55 = vld [vmem:[#allocation3 + $0x80] sm:$0xff] }
 0x2d1   : > { %4587 = vmatprep.subr.bf16.mxu0 %v3949_v19  ;;  %4693 = vmatprep.subr.bf16.mxu1 %v3951_v0  ;;  %8953 = vst [vmem:[#allocation22_spill] sm:$0xff] %v7942_v23  ;;  %v3956_v19 = vld [vmem:[#allocation3 + $0x90] sm:$0xff]  ;;  %v1203_v0 = vpack.c.bf16 %v1193_v28, %v1188_v54  ;;  %v3953_v54 = vld [vmem:[#allocation3 + $0x78] sm:$0xff]  ;;  %v3955_v28 = vld [vmem:[#allocation3 + $0x88] sm:$0xff] }
 0x2d2   : > { %1234 = vrot.lane.b32.xlu1 %v1206_v53, %s5643_s27  ;;  %4480 = vmatprep.mubr.bf16.mxu0 %v5458_v33  ;;  %8955 = vst [vmem:[#allocation17_spill] sm:$0xff] %v7946_v52  ;;  %v7953_v53 = vmul.f32 %v7949_v6, %v7923_v60  ;;  %v8959_v23 = vld [vmem:[#allocation46_spill] sm:$0xff]  ;;  %v8010_v52 = vmul.f32 %v7900_v10, %v7969_v34 }
 0x2d3   : > { %1218 = vrot.lane.b32.xlu0 %v1198_v4, %s5643_s27  ;;  %v1204_v4 = vpack.c.bf16 %v7912_v11, %v7908_v49  ;;  %v7981_v11 = vmul.f32 %v7965_v18, %v7765_v50  ;;  %v8957_v49 = vld [vmem:[#allocation19_spill] sm:$0xff]  ;;  %v8963_v57 = vld [vmem:[#allocation30_spill] sm:$0xff] }
 0x2d4   : > { %4588 = vmatpush1.bf16.msra.mxu0 %v3948_v45  ;;  %4694 = vmatpush1.bf16.msra.mxu1 %v3950_v22  ;;  %v7973_v45 = vmul.f32 %v7799_v13, %v1402_v1  ;;  %v7975_v22 = vld [vmem:[#allocation2 + $0x108] sm:$0xff]  ;;  %v7995_v33 = vmul.f32 %v8957_v49, %v7849_v41  ;;  %v8002_v1 = vmul.f32 %v8959_v23, %v7849_v41 }
 0x2d5   : > { %4589 = vmatprep.subr.bf16.mxu0 %v3954_v55  ;;  %4695 = vmatprep.subr.bf16.mxu1 %v3956_v19  ;;  %v5461_v55 = vld [vmem:[#allocation8 + $0x18] ss:$12 sps:$4 sm:$0xff]   ;;  %v8956_v19 = vld [vmem:[#allocation15_spill] sm:$0xff]  ;;  %8962 = vst [vmem:[#allocation26_spill] sm:$0xff] %v8010_v52  ;;  %v8965_v30 = vpack.c.bf16 %v8963_v57, %v8964_v59  ;;  %v8048_v59 = vpop.permute.xlu1 %1576 }
 0x2d6   : > { %1232 = vrot.lane.b32.xlu1 %v1205_v63, %s5643_s27  ;;  %4481 = vmatmul.mubr.bf16.gmra.mrb[12].mxu0 %v5461_v55  ;;  %v7989_v63 = vmul.f32 %v7975_v22, %v7765_v50  ;;  %v1054_v55 = vrot.slane %v7759_v32, %v8956_v19  ;;  %8958 = vst [vmem:[#allocation16_spill] sm:$0xff] %v7995_v33  ;;  %8960 = vst [vmem:[#allocation24_spill] sm:$0xff] %v8002_v1  ;;  %v8976_v41 = vld [vmem:[#allocation33_spill] sm:$0xff]  ;;  %v8060_v52 = vld [vmem:[#allocation2 + $0x20] sm:$0xff] }
 0x2d7   : > { %1236 = vrot.lane.b32.xlu0 %v7824_v24, %s5643_s27  ;;  %v5419_v24 = vld [vmem:[%s8790_s1 + $0x4] ss:$16 sps:$4 sm:$0xff]   ;;  %v8006_v50 = vmul.f32 %v7900_v10, %v7967_v48 }
 0x2d8   : > { %4590 = vmatpush1.bf16.msra.mxu0 %v3953_v54  ;;  %4696 = vmatpush1.bf16.msra.mxu1 %v3955_v28  ;;  %v8966_v54 = vld [vmem:[#allocation42_spill] sm:$0xff]  ;;  %v8967_v28 = vld [vmem:[#allocation41_spill] sm:$0xff]  ;;  %v8023_v12 = vmul.f32 %v1054_v55, %v8969_v39  ;;  %v8026_v17 = vmul.f32 %v1054_v55, %v8971_v20 }
 0x2d9   : > { %8961 = vst [vmem:[#allocation23_spill] sm:$0xff] %v8006_v50  ;;  %4697 = vmatprep.subr.bf16.mxu1 %v8965_v30  ;;  %v8968_v32 = vpack.c.bf16 %v8966_v54, %v8967_v28  ;;  %v8034_v30 = vmul.f32 %v1054_v55, %v7715_v8  ;;  %4721 = vmatprep.mubr.bf16.mxu1 %v5419_v24  ;;  %v8046_v28 = vld [vmem:[#allocation2 + $0x28] sm:$0xff]  ;;  %v8975_v10 = vld [vmem:[#allocation34_spill] sm:$0xff]  ;;  %v8978_v50 = vld [vmem:[#allocation43_spill] sm:$0xff] }
 0x2da   : > { %8970 = vst [vmem:[#allocation25_spill] sm:$0xff] %v8023_v12  ;;  %8972 = vst [vmem:[#allocation28_spill] sm:$0xff] %v8026_v17  ;;  %1228 = vrot.lane.b32.xlu1 %v1203_v0, %s5643_s27  ;;  %v1304_v0 = vrot.slane %v8012_v25, %v8896_v15  ;;  %v1300_v54 = vrot.slane %v8012_v25, %v5888_v3  ;;  %v8056_v57 = vld [vmem:[#allocation2 + $0x70] sm:$0xff]  ;;  %v1296_v15 = vrot.slane %v8012_v25, %v8897_v21  ;;  %v8079_v17 = vld [vmem:[#allocation2 + $0xb8] sm:$0xff] }
 0x2db   : > { %4591 = vmatprep.subr.bf16.mxu0 %v8968_v32  ;;  %8973 = vst [vmem:[#allocation15_spill] sm:$0xff] %v8034_v30  ;;  %v8037_v32 = vmul.f32 %v1054_v55, %v7717_v56  ;;  %1230 = vrot.lane.b32.xlu0 %v1204_v4, %s5643_s27  ;;  %v8977_v55 = vpack.c.bf16 %v8975_v10, %v8976_v41  ;;  %v8979_v33 = vld [vmem:[#allocation38_spill] sm:$0xff]  ;;  %v8980_v1 = vld [vmem:[#allocation37_spill] sm:$0xff]  ;;  %v8983_v10 = vld [vmem:[#allocation44_spill] sm:$0xff]  ;;  %s5561_s27 = scalar_lea.vmem %s8741_s7, 2560 }
 0x2dc   : > { %4592 = vmatpush1.bf16.msra.mxu0 %v8978_v50  ;;  %v1292_v3 = vrot.slane %v8012_v25, %v8956_v19  ;;  %v8981_v12 = vpack.c.bf16 %v8979_v33, %v8980_v1  ;;  %v8982_v41 = vld [vmem:[#allocation45_spill] sm:$0xff]  ;;  %v1317_v4 = vmul.f32 %v7799_v13, %v1304_v0  ;;  %v8072_v30 = vmul.f32 %v7775_v40, %v1300_v54  ;;  %v8094_v0 = vld [vmem:[#allocation2 + $0x100] sm:$0xff]  ;;  %p5562_p11 = scmp.ne.s32.totalorder %s8741_s7, %s5561_s27 }
 0x2dd   : > { %8974 = vst [vmem:[#allocation19_spill] sm:$0xff] %v8037_v32  ;;  %4698 = vmatpush1.bf16.msra.mxu1 %v8977_v55  ;;  %v8984_v55 = vpack.c.bf16 %v8982_v41, %v8983_v10  ;;  %v8075_v21 = vmul.f32 %v7777_v61, %v1300_v54  ;;  %v8077_v32 = vld [vmem:[#allocation2 + $0x68] sm:$0xff]  ;;  %v8086_v33 = vmul.f32 %v7965_v18, %v1300_v54 }
 0x2de   : > { %4699 = vmatprep.subr.bf16.mxu1 %v8981_v12  ;;  %v8985_v12 = vpack.c.bf16 %v7835_v27, %v7832_v42  ;;  %v8089_v1 = vmul.f32 %v7975_v22, %v1300_v54  ;;  %4615 = vmatprep.mubr.bf16.mxu0 %v5419_v24  ;;  %v8092_v19 = vmul.f32 %v1296_v15, %v8046_v28  ;;  %v8990_v54 = vld [vmem:[#allocation40_spill] sm:$0xff]  ;;  %p5563_p1 = pnand %p5562_p11, %p9053_p0 }
 0x2df   : > { %4593 = vmatprep.subr.bf16.mxu0 %v8984_v55  ;;  %8986 = vst [vmem:[#allocation46_spill] sm:$0xff] %v8086_v33  ;;  %v8988_v41 = vpack.c.bf16 %v7809_v37, %v7806_v9  ;;  %v8100_v10 = vpack.c.bf16 %v1317_v4, %v1317_v4  ;;  %v8105_v27 = vmul.f32 %v1296_v15, %v8056_v57  ;;  %v8991_v55 = vld [vmem:[#allocation39_spill] sm:$0xff] }
 0x2e0   : > { %1478 = vrot.lane.b32.xlu1 %v8985_v12, %s5647_s19  ;;  %8987 = vst [vmem:[#allocation30_spill] sm:$0xff] %v8089_v1  ;;  %v8108_v24 = vmul.f32 %v1292_v3, %v8060_v52  ;;  %v8992_v12 = vpack.c.bf16 %v8990_v54, %v8991_v55  ;;  %4594 = vmatpush1.bf16.msra.mxu0 %v8978_v50  ;;  %v5462_v33 = vld [vmem:[#allocation2 + $0xa0] sm:$0xff]  ;;  %p5564_p3 = pneg %p5563_p1 }
 0x2e1   : > { %1476 = vrot.lane.b32.xlu0 %v8988_v41, %s5647_s19  ;;  %v8117_v37 = vmul.f32 %v1292_v3, %v8077_v32  ;;  %v8120_v4 = vmul.f32 %v1296_v15, %v8079_v17  ;;  %v8125_v42 = vmul.f32 %v1296_v15, %v8094_v0  ;;  %v8128_v54 = vmul.f32 %v1292_v3, %v7967_v48  ;;  %v1579_v41 = vpop.permute.xlu0 %1578  ;;  %v8141_v15 = vpop.permute.xlu1 %1580 }
 0x2e2   : > { %8989 = vst [vmem:[#allocation29_spill] sm:$0xff] %v8108_v24  ;;  %4700 = vmatpush1.bf16.msra.mxu1 %v8992_v12  ;;  %v8131_v50 = vmul.f32 %v1292_v3, %v7969_v34  ;;  %v1436_v55 = vmul.f32 %v7918_v14, %v7896_v7  ;;  %v1442_v12 = vmul.f32 %v7927_v35, %v7896_v7 }
 0x2e3   : > { %8993 = vst [vmem:[#allocation42_spill] sm:$0xff] %v8120_v4  ;;  %8994 = vst [vmem:[#allocation41_spill] sm:$0xff] %v8125_v42  ;;  %v8997_v9 = vpack.c.bf16 %v7959_v47, %v7953_v53  ;;  %v8998_v3 = vpack.c.bf16 %v7937_v43, %v7933_v16  ;;  %v1446_v1 = vpack.c.bf16 %v7973_v45, %v7973_v45  ;;  %v5463_v16 = vld [vmem:[#allocation2 + $0xe8] sm:$0xff]  ;;  %v8191_v42 = vld [vmem:[#allocation2 + $0xf8] sm:$0xff] }
 0x2e4   : > { %8995 = vst [vmem:[#allocation31_spill] sm:$0xff] %v8128_v54  ;;  %8996 = vst [vmem:[#allocation32_spill] sm:$0xff] %v8131_v50  ;;  %v8999_v47 = vpack.c.bf16 %v7818_v58, %v7812_v51  ;;  %v1435_v24 = vmul.f32 %v5462_v33, %v7923_v60  ;;  %v1441_v43 = vmul.f32 %v5463_v16, %v7923_v60  ;;  %v8173_v33 = vld [vmem:[#allocation2 + $0x20] sm:$0xff] }
 0x2e5   : > { %1472 = vrot.lane.b32.xlu1 %v8997_v9, %s5647_s19  ;;  %1474 = vrot.lane.b32.xlu0 %v8998_v3, %s5647_s19  ;;  %v1454_v9 = vpack.c.bf16 %v1442_v12, %v1436_v55  ;;  %v1586_v45 = vsel %vm1582_vm10, %v1579_v41, %v8141_v15  ;;  %v1585_v3 = vsel %vm1582_vm10, %v8048_v59, %v1579_v41  ;;  %v1575_v53 = vpop.permute.xlu0 %1574  ;;  %v1573_v7 = vpop.permute.xlu1 %1572  ;;  %v8176_v12 = vld [vmem:[#allocation2 + $0x68] sm:$0xff] }
 0x2e6   : > { %v1597_v51 = vmul.f32 %v1586_v45, %v7670_v2  ;;  %v1603_v58 = vmul.f32 %v1586_v45, %v7672_v36  ;;  %v9000_v60 = vpack.c.bf16 %v7842_v46, %v7838_v62  ;;  %v1596_v55 = vmul.f32 %v8173_v33, %v1585_v3 }
 0x2e7   : > { %v1602_v41 = vmul.f32 %v8176_v12, %v1585_v3  ;;  %v1584_v16 = vsel %vm1582_vm10, %v1575_v53, %v8048_v59  ;;  %v1614_v59 = vmul.f32 %v8191_v42, %v1585_v3 }
 0x2e8   : > { %v1621_v54 = vpack.c.bf16 %v1603_v58, %v1597_v51  ;;  %v1601_v50 = vmul.f32 %v7866_v31, %v1584_v16  ;;  %v1609_v58 = vmul.f32 %v1586_v45, %v8957_v49 }
 0x2e9   : > { %1488 = vrot.lane.b32.xlu1 %v8999_v47, %s5647_s19  ;;  %1470 = vrot.lane.b32.xlu0 %v1446_v1, %s5647_s19  ;;  %v1453_v47 = vpack.c.bf16 %v1441_v43, %v1435_v24  ;;  %v1620_v4 = vpack.c.bf16 %v1602_v41, %v1596_v55  ;;  %v8188_v24 = vld [vmem:[#allocation2 + $0xb0] sm:$0xff]  ;;  %v1615_v55 = vmul.f32 %v1586_v45, %v8959_v23 }
 0x2ea   : > { %v1608_v43 = vmul.f32 %v8188_v24, %v1585_v3  ;;  %v1607_v3 = vmul.f32 %v7918_v14, %v1584_v16 }
 0x2ed   : > { %1486 = vrot.lane.b32.xlu1 %v1454_v9, %s5647_s19  ;;  %1490 = vrot.lane.b32.xlu0 %v9000_v60, %s5647_s19  ;;  %v1583_v9 = vsel %vm1582_vm10, %v1573_v7, %v1575_v53  ;;  %v1595_v60 = vmul.f32 %v7862_v44, %v1584_v16  ;;  %v1593_v53 = vmul.f32 %v7799_v13, %v1573_v7 }
 0x2ee   : > { %v1594_v62 = vmul.f32 %v7949_v6, %v1583_v9  ;;  %v1600_v46 = vmul.f32 %v7955_v26, %v1583_v9  ;;  %v1626_v44 = vpack.c.bf16 %v1614_v59, %v1608_v43  ;;  %v1612_v7 = vmul.f32 %v1583_v9, %v7502_v5 }
 0x2ef   : > { %v1619_v51 = vpack.c.bf16 %v1601_v50, %v1595_v60  ;;  %v1617_v31 = vpack.c.bf16 %v1593_v53, %v1593_v53  ;;  %v1606_v50 = vmul.f32 %v1583_v9, %v7500_v38 }
 0x2f1   : > { %1482 = vrot.lane.b32.xlu1 %v1446_v1, %s5647_s19  ;;  %1484 = vrot.lane.b32.xlu0 %v1453_v47, %s5647_s19  ;;  %v1618_v1 = vpack.c.bf16 %v1600_v46, %v1594_v62  ;;  %v1624_v47 = vpack.c.bf16 %v1612_v7, %v1606_v50 }
 0x2f5   : > { %1649 = vrot.lane.b32.xlu1 %v1621_v54, %s5646_s17  ;;  %1647 = vrot.lane.b32.xlu0 %v1620_v4, %s5646_s17  ;;  %v1613_v54 = vmul.f32 %v7927_v35, %v1584_v16  ;;  %v1627_v4 = vpack.c.bf16 %v1615_v55, %v1609_v58 }
 0x2f7   : > { %v1625_v41 = vpack.c.bf16 %v1613_v54, %v1607_v3 }
 0x2f9   : > { %1643 = vrot.lane.b32.xlu1 %v1618_v1, %s5646_s17  ;;  %1645 = vrot.lane.b32.xlu0 %v1619_v51, %s5646_s17 }
 0x2fc   : > { %v797_v45 = vpop.permute.xlu0 %796 }
 0x2fd   : > { %1659 = vrot.lane.b32.xlu1 %v1626_v44, %s5646_s17  ;;  %1641 = vrot.lane.b32.xlu0 %v1617_v31, %s5646_s17 }
 0x300   : > { %v799_v62 = vpop.permute.xlu1 %798 }
 0x301   : > { %1657 = vrot.lane.b32.xlu1 %v1625_v41, %s5646_s17  ;;  %1661 = vrot.lane.b32.xlu0 %v1627_v4, %s5646_s17  ;;  %v813_v46 = vsel %vm311_vm0, %v797_v45, %v799_v62  ;;  %832 = vst.msk [vmem:[#allocation3 + $0x110] sm:$0xff] %vm311_vm0, %v799_v62  ;;  %v8225_v41 = vld [vmem:[#allocation2 + $0x18] sm:$0xff] }
 0x302   : > { %4701 = vmatprep.subr.bf16.mxu1 %v813_v46 }
 0x304   : > { %v795_v16 = vpop.permute.xlu0 %794  ;;  %v1748_v60 = vpop.permute.xlu1 %1747 }
 0x305   : > { %1653 = vrot.lane.b32.xlu1 %v1617_v31, %s5646_s17  ;;  %1655 = vrot.lane.b32.xlu0 %v1624_v47, %s5646_s17  ;;  %v812_v9 = vsel %vm311_vm0, %v795_v16, %v797_v45  ;;  %v8228_v45 = vld [vmem:[#allocation2 + $0x60] sm:$0xff] }
 0x306   : > { %4702 = vmatpush1.bf16.msra.mxu1 %v812_v9 }
 0x308   : > { %v1750_v43 = vpop.permute.xlu0 %1749  ;;  %v8214_v59 = vpop.permute.xlu1 %1751 }
 0x309   : > { %v1756_v1 = vsel %vm1753_vm9, %v1748_v60, %v1750_v43  ;;  %v1757_v53 = vsel %vm1753_vm9, %v1750_v43, %v8214_v59 }
 0x30a   : > { %v1767_v51 = vmul.f32 %v8173_v33, %v1756_v1  ;;  %v1773_v44 = vmul.f32 %v8176_v12, %v1756_v1  ;;  %v1768_v31 = vmul.f32 %v1757_v53, %v7670_v2  ;;  %v1774_v58 = vmul.f32 %v1757_v53, %v7672_v36 }
 0x30c   : > { %v1746_v55 = vpop.permute.xlu0 %1745  ;;  %v793_v3 = vpop.permute.xlu1 %792  ;;  %v1791_v54 = vpack.c.bf16 %v1773_v44, %v1767_v51  ;;  %v1792_v7 = vpack.c.bf16 %v1774_v58, %v1768_v31 }
 0x30d   : > { %v1755_v4 = vsel %vm1753_vm9, %v1746_v55, %v1748_v60  ;;  %v811_v50 = vsel %vm311_vm0, %v793_v3, %v795_v16 }
 0x30e   : > { %v1766_v47 = vmul.f32 %v8225_v41, %v1755_v4  ;;  %v1772_v62 = vmul.f32 %v8228_v45, %v1755_v4  ;;  %1818 = vrot.lane.b32.xlu0 %v1791_v54, %s5645_s15  ;;  %1820 = vrot.lane.b32.xlu1 %v1792_v7, %s5645_s15 }
 0x30f   : > { %4595 = vmatprep.subr.bf16.mxu0 %v811_v50 }
 0x310   : > { %v791_v46 = vpop.permute.xlu0 %790  ;;  %v807_v9 = vpop.permute.xlu1 %806  ;;  %v1790_v43 = vpack.c.bf16 %v1772_v62, %v1766_v47  ;;  %v1786_v47 = vmul.f32 %v1757_v53, %v8959_v23  ;;  %v1779_v62 = vmul.f32 %v8188_v24, %v1756_v1 }
 0x311   : > { %v810_v60 = vsel %vm311_vm0, %v791_v46, %v793_v3  ;;  %v1780_v3 = vmul.f32 %v1757_v53, %v8957_v49 }
 0x312   : > { %1816 = vrot.lane.b32.xlu0 %v1790_v43, %s5645_s15  ;;  %4596 = vmatpush1.bf16.msra.mxu0 %v810_v60 }
 0x314   : > { %v1744_v16 = vpop.permute.xlu1 %1743  ;;  %v809_v51 = vpop.permute.xlu0 %808 }
 0x315   : > { %v1754_v44 = vsel %vm1753_vm9, %v1744_v16, %v1746_v55  ;;  %v1764_v31 = vmul.f32 %v7799_v13, %v1744_v16  ;;  %v817_v58 = vsel %vm311_vm0, %v807_v9, %v809_v51  ;;  %837 = vst.msk [vmem:[#allocation3 + $0x138] sm:$0xff] %vm311_vm0, %v809_v51  ;;  %v1785_v55 = vmul.f32 %v8191_v42, %v1756_v1  ;;  %v8249_v51 = vld [vmem:[#allocation2 + $0xa0] sm:$0xff] }
 0x316   : > { %v1765_v54 = vmul.f32 %v7949_v6, %v1754_v44  ;;  %v1771_v50 = vmul.f32 %v7955_v26, %v1754_v44  ;;  %4703 = vmatprep.subr.bf16.mxu1 %v817_v58  ;;  %v1798_v26 = vpack.c.bf16 %v1786_v47, %v1780_v3  ;;  %v1777_v53 = vmul.f32 %v8249_v51, %v1754_v44 }
 0x317   : > { %v1788_v7 = vpack.c.bf16 %v1764_v31, %v1764_v31  ;;  %v8252_v31 = vld [vmem:[#allocation2 + $0xe8] sm:$0xff]  ;;  %v1778_v58 = vmul.f32 %v7918_v14, %v1755_v4 }
 0x318   : > { %v803_v46 = vpop.permute.xlu1 %802  ;;  %v1789_v43 = vpack.c.bf16 %v1771_v50, %v1765_v54  ;;  %v805_v60 = vpop.permute.xlu0 %804  ;;  %v1783_v1 = vmul.f32 %v8252_v31, %v1754_v44  ;;  %v1784_v54 = vmul.f32 %v7927_v35, %v1755_v4  ;;  %v1797_v50 = vpack.c.bf16 %v1785_v55, %v1779_v62 }
 0x319   : > { %1812 = vrot.lane.b32.xlu0 %v1788_v7, %s5645_s15  ;;  %v816_v16 = vsel %vm311_vm0, %v805_v60, %v807_v9  ;;  %v815_v6 = vsel %vm311_vm0, %v803_v46, %v805_v60  ;;  %v9002_v60 = vld [vmem:[#allocation27_spill] sm:$0xff]  ;;  %v9004_v55 = vpack.c.bf16 %v8959_v23, %v8957_v49 }
 0x31a   : > { %1814 = vrot.lane.b32.xlu1 %v1789_v43, %s5645_s15  ;;  %4704 = vmatpush1.bf16.msra.mxu1 %v816_v16  ;;  %v9001_v43 = vpack.c.bf16 %v7672_v36, %v7670_v2  ;;  %v1795_v44 = vpack.c.bf16 %v1783_v1, %v1777_v53  ;;  %v9003_v16 = vpack.c.bf16 %v8954_v29, %v9002_v60 }
 0x31b   : > { %4597 = vmatprep.subr.bf16.mxu0 %v815_v6  ;;  %v1796_v62 = vpack.c.bf16 %v1784_v54, %v1778_v58  ;;  %v9005_v6 = vpack.c.bf16 %v8971_v20, %v8969_v39  ;;  %v9006_v58 = vld [vmem:[#allocation48_spill] sm:$0xff]  ;;  %v9007_v54 = vld [vmem:[#allocation47_spill] sm:$0xff] }
 0x31c   : > { %v1919_v9 = vpop.permute.xlu1 %1918  ;;  %4705 = vmatprep.subr.bf16.mxu1 %v9001_v43  ;;  %v801_v3 = vpop.permute.xlu0 %800 }
 0x31d   : > { %1832 = vrot.lane.b32.xlu0 %v1798_v26, %s5645_s15  ;;  %v814_v47 = vsel %vm311_vm0, %v801_v3, %v803_v46  ;;  %v9009_v3 = vld [vmem:[#allocation36_spill] sm:$0xff] }
 0x31e   : > { %1830 = vrot.lane.b32.xlu1 %v1797_v50, %s5645_s15  ;;  %4598 = vmatpush1.bf16.msra.mxu0 %v814_v47  ;;  %v9008_v50 = vpack.c.bf16 %v9006_v58, %v9007_v54  ;;  %v9010_v47 = vld [vmem:[#allocation35_spill] sm:$0xff] }
 0x31f   : > { %4706 = vmatpush1.bf16.msra.mxu1 %v9003_v16  ;;  %4599 = vmatprep.subr.bf16.mxu0 %v9005_v6 }
 0x320   : > { %v8266_v4 = vpop.permute.xlu1 %1922  ;;  %4707 = vmatprep.subr.bf16.mxu1 %v9004_v55  ;;  %v1921_v46 = vpop.permute.xlu0 %1920 }
 0x321   : > { %1826 = vrot.lane.b32.xlu0 %v1795_v44, %s5645_s15  ;;  %v1927_v26 = vsel %vm1924_vm7, %v1919_v9, %v1921_v46  ;;  %v1928_v29 = vsel %vm1924_vm7, %v1921_v46, %v8266_v4  ;;  %v9011_v44 = vpack.c.bf16 %v9009_v3, %v9010_v47  ;;  %v1285_v3 = vld [vmem:[#allocation2 + $0x118] sm:$0xff] }
 0x322   : > { %1828 = vrot.lane.b32.xlu1 %v1796_v62, %s5645_s15  ;;  %v1938_v53 = vmul.f32 %v8173_v33, %v1927_v26  ;;  %v1944_v1 = vmul.f32 %v8176_v12, %v1927_v26  ;;  %4600 = vmatpush1.bf16.msra.mxu0 %v9008_v50  ;;  %v1939_v39 = vmul.f32 %v1928_v29, %v7670_v2  ;;  %v1280_v50 = vld [vmem:[#allocation2 + $0xd0] sm:$0xff] }
 0x323   : > { %v1945_v43 = vmul.f32 %v1928_v29, %v7672_v36  ;;  %4708 = vmatpush1.bf16.msra.mxu1 %v9011_v44  ;;  %v9012_v33 = vpack.c.bf16 %v7717_v56, %v7715_v8 }
 0x324   : > { %v1915_v20 = vpop.permute.xlu1 %1914  ;;  %v1917_v60 = vpop.permute.xlu0 %1916  ;;  %v1962_v16 = vpack.c.bf16 %v1944_v1, %v1938_v53  ;;  %v1270_v53 = vld [vmem:[#allocation2 + $0x40] sm:$0xff]  ;;  %v1275_v1 = vld [vmem:[#allocation2 + $0x88] sm:$0xff] }
 0x325   : > { %4601 = vmatprep.subr.bf16.mxu0 %v9012_v33  ;;  %v1926_v12 = vsel %vm1924_vm7, %v1917_v60, %v1919_v9  ;;  %v8294_v62 = vsel %vm1924_vm7, %v1915_v20, %v1917_v60  ;;  %v1935_v55 = vmul.f32 %v7799_v13, %v1915_v20  ;;  %v1963_v46 = vpack.c.bf16 %v1945_v43, %v1939_v39  ;;  %v5472_v43 = vld [vmem:[#allocation10] sm:$0x1f] }
 0x326   : > { %1824 = vrot.lane.b32.xlu1 %v1788_v7, %s5645_s15  ;;  %v1937_v2 = vmul.f32 %v8225_v41, %v1926_v12  ;;  %v1943_v36 = vmul.f32 %v8228_v45, %v1926_v12  ;;  %1989 = vrot.lane.b32.xlu0 %v1962_v16, %s5644_s29  ;;  %v1936_v56 = vmul.f32 %v8294_v62, %v9007_v54 }
 0x327   : > { %v1942_v8 = vmul.f32 %v8294_v62, %v9006_v58  ;;  %v9013_v9 = vpack.c.bf16 %v7502_v5, %v7500_v38  ;;  %v1950_v41 = vmul.f32 %v8188_v24, %v1927_v26  ;;  %v1956_v20 = vmul.f32 %v8191_v42, %v1927_v26  ;;  %v9014_v58 = vld [vmem:[#allocation18_spill] sm:$0xff] }
 0x328   : > { %v989_v6 = vpop.permute.xlu1 %988  ;;  %v1961_v45 = vpack.c.bf16 %v1943_v36, %v1937_v2  ;;  %v1308_v39 = vrot.slane %v8012_v25, %v9014_v58  ;;  %v842_v38 = vld [vmem:[#allocation2 + $0x30] sm:$0xff]  ;;  %v847_v5 = vld [vmem:[#allocation2 + $0x78] sm:$0xff]  ;;  %v403_v24 = vrot.slane %v5472_v43, %v9014_v58  ;;  %v8317_v47 = vpack.c.bf16 %v1935_v55, %v1935_v55 }
 0x329   : > { %4602 = vmatpush1.bf16.msra.mxu0 %v9013_v9  ;;  %v987_v7 = vpop.permute.xlu0 %986  ;;  %1022 = vst.msk [vmem:[#allocation3 + $0x1b0] sm:$0xff] %vm311_vm0, %v989_v6  ;;  %v1960_v44 = vpack.c.bf16 %v1942_v8, %v1936_v56  ;;  %v862_v42 = vpack.c.bf16 %v847_v5, %v842_v38  ;;  %v1951_v36 = vmul.f32 %v1928_v29, %v8957_v49 }
 0x32a   : > { %v1003_v54 = vsel %vm311_vm0, %v987_v7, %v989_v6  ;;  %1991 = vrot.lane.b32.xlu1 %v1963_v46, %s5644_s29  ;;  %1987 = vrot.lane.b32.xlu0 %v1961_v45, %s5644_s29  ;;  %v1318_v60 = vmul.f32 %v1308_v39, %v1270_v53  ;;  %v1323_v16 = vmul.f32 %v1308_v39, %v1275_v1  ;;  %v857_v53 = vld [vmem:[#allocation2 + $0x108] sm:$0xff] }
 0x32b   : > { %4709 = vmatprep.subr.bf16.mxu1 %v1003_v54  ;;  %v413_v33 = vmul.f32 %v8060_v52, %v403_v24  ;;  %v418_v25 = vmul.f32 %v8077_v32, %v403_v24  ;;  %v1957_v6 = vmul.f32 %v1928_v29, %v8959_v23  ;;  %872 = vst.msk [vmem:[#allocation3 + $0x160] sm:$0xff] %vm311_vm0, %v862_v42  ;;  %v852_v52 = vld [vmem:[#allocation2 + $0xc0] sm:$0xff] }
 0x32c   : > { %v983_v26 = vpop.permute.xlu1 %982  ;;  %v1328_v46 = vmul.f32 %v1308_v39, %v1280_v50  ;;  %v1333_v55 = vmul.f32 %v1308_v39, %v1285_v3  ;;  %v1338_v9 = vpack.c.bf16 %v1323_v16, %v1318_v60  ;;  %v867_v23 = vpack.c.bf16 %v857_v53, %v852_v52  ;;  %v9016_v3 = vld [vmem:[#allocation49_spill] sm:$0xff] }
 0x32d   : > { %v985_v2 = vpop.permute.xlu0 %984  ;;  %v433_v45 = vpack.c.bf16 %v418_v25, %v413_v33  ;;  %v423_v32 = vmul.f32 %v7967_v48, %v403_v24  ;;  %v1949_v29 = vmul.f32 %v7918_v14, %v1926_v12  ;;  %v1968_v50 = vpack.c.bf16 %v1956_v20, %v1950_v41  ;;  %v5473_v16 = vld [vmem:[#allocation10 + $0xa] sm:$0x1f] }
 0x32e   : > { %v1002_v56 = vsel %vm311_vm0, %v985_v2, %v987_v7  ;;  %v1001_v8 = vsel %vm311_vm0, %v983_v26, %v985_v2  ;;  %1985 = vrot.lane.b32.xlu1 %v1960_v44, %s5644_s29  ;;  %1983 = vrot.lane.b32.xlu0 %v8317_v47, %s5644_s29  ;;  %v1343_v49 = vpack.c.bf16 %v1333_v55, %v1328_v46  ;;  %v9017_v46 = vld [vmem:[#allocation51_spill] sm:$0xff]  ;;  %v9018_v55 = vld [vmem:[#allocation50_spill] sm:$0xff] }
 0x32f   : > { %4710 = vmatpush1.bf16.msra.mxu1 %v1002_v56  ;;  %v1955_v7 = vmul.f32 %v7927_v35, %v1926_v12  ;;  %4603 = vmatprep.subr.bf16.mxu0 %v1001_v8  ;;  %1348 = vst.msk [vmem:[#allocation3 + $0x2a0] sm:$0xff] %vm311_vm0, %v1338_v9  ;;  %443 = vst.msk [vmem:[#allocation3 + $0x20] sm:$0xff] %vm311_vm0, %v433_v45  ;;  %v428_v54 = vmul.f32 %v7969_v34, %v403_v24 }
 0x330   : > { %v997_v1 = vpop.permute.xlu1 %996  ;;  %v1969_v38 = vpack.c.bf16 %v1957_v6, %v1951_v36  ;;  %v1948_v5 = vmul.f32 %v8249_v51, %v8294_v62  ;;  %v1954_v48 = vmul.f32 %v8252_v31, %v8294_v62  ;;  %1353 = vst.msk [vmem:[#allocation3 + $0x2c8] sm:$0xff] %vm311_vm0, %v1343_v49  ;;  %877 = vst.msk [vmem:[#allocation3 + $0x188] sm:$0xff] %vm311_vm0, %v867_v23  ;;  %v9015_v62 = vld [vmem:[#allocation52_spill] sm:$0xff] }
 0x331   : > { %v981_v39 = vpop.permute.xlu0 %980  ;;  %v438_v35 = vpack.c.bf16 %v428_v54, %v423_v32  ;;  %v1967_v12 = vpack.c.bf16 %v1955_v7, %v1949_v29  ;;  %v1427_v20 = vmul.f32 %v7775_v40, %v9015_v62  ;;  %v1433_v43 = vmul.f32 %v7777_v61, %v9015_v62  ;;  %v9020_v29 = vld [vmem:[#allocation21_spill] sm:$0xff]  ;;  %v9021_v7 = vld [vmem:[#allocation20_spill] sm:$0xff] }
 0x332   : > { %v1000_v14 = vsel %vm311_vm0, %v981_v39, %v983_v26  ;;  %2001 = vrot.lane.b32.xlu1 %v1968_v50, %s5644_s29  ;;  %2003 = vrot.lane.b32.xlu0 %v1969_v38, %s5644_s29  ;;  %v1966_v31 = vpack.c.bf16 %v1954_v48, %v1948_v5  ;;  %v1070_v44 = vrot.slane %v9016_v3, %v9014_v58  ;;  %v9023_v54 = vld [vmem:[#allocation17_spill] sm:$0xff]  ;;  %v9024_v39 = vld [vmem:[#allocation22_spill] sm:$0xff] }
 0x333   : > { %4604 = vmatpush1.bf16.msra.mxu0 %v1000_v14  ;;  %448 = vst.msk [vmem:[#allocation3 + $0x48] sm:$0xff] %vm311_vm0, %v438_v35  ;;  %v1439_v26 = vmul.f32 %v7965_v18, %v9015_v62  ;;  %v1445_v60 = vmul.f32 %v7975_v22, %v9015_v62  ;;  %v642_v33 = vrot.slane %v5473_v16, %v9014_v58  ;;  %v9030_v62 = vld [vmem:[#allocation24_spill] sm:$0xff] }
 0x334   : > { %v995_v34 = vpop.permute.xlu1 %994  ;;  %v1451_v2 = vpack.c.bf16 %v1433_v43, %v1427_v20  ;;  %v1598_v36 = vmul.f32 %v7775_v40, %v8141_v15  ;;  %v1604_v6 = vmul.f32 %v7777_v61, %v8141_v15  ;;  %v9019_v56 = vpack.c.bf16 %v9017_v46, %v9018_v55  ;;  %v9031_v20 = vld [vmem:[#allocation16_spill] sm:$0xff] }
 0x335   : > { %v999_v51 = vpop.permute.xlu0 %998  ;;  %v1006_v41 = vsel %vm311_vm0, %v995_v34, %v997_v1  ;;  %v1080_v8 = vmul.f32 %v7799_v13, %v1070_v44  ;;  %v652_v58 = vmul.f32 %v8046_v28, %v642_v33  ;;  %v657_v52 = vmul.f32 %v8056_v57, %v642_v33 }
 0x336   : > { %v1007_v24 = vsel %vm311_vm0, %v997_v1, %v999_v51  ;;  %1027 = vst.msk [vmem:[#allocation3 + $0x1d8] sm:$0xff] %vm311_vm0, %v999_v51  ;;  %1999 = vrot.lane.b32.xlu1 %v1967_v12, %s5644_s29  ;;  %1997 = vrot.lane.b32.xlu0 %v1966_v31, %s5644_s29  ;;  %v1610_v53 = vmul.f32 %v7965_v18, %v8141_v15  ;;  %v9027_v51 = vld [vmem:[#allocation28_spill] sm:$0xff] }
 0x337   : > { %4711 = vmatprep.subr.bf16.mxu1 %v1007_v24  ;;  %v1616_v49 = vmul.f32 %v7975_v22, %v8141_v15  ;;  %v1100_v13 = vpack.c.bf16 %v1080_v8, %v1080_v8  ;;  %v1457_v32 = vpack.c.bf16 %v1445_v60, %v1439_v26  ;;  %v672_v28 = vpack.c.bf16 %v657_v52, %v652_v58 }
 0x338   : > { %v991_v42 = vpop.permute.xlu1 %990  ;;  %4712 = vmatpush1.bf16.msra.mxu1 %v1006_v41  ;;  %v1769_v57 = vmul.f32 %v8214_v59, %v7775_v40  ;;  %v1775_v1 = vmul.f32 %v8214_v59, %v7777_v61  ;;  %v1622_v15 = vpack.c.bf16 %v1604_v6, %v1598_v36  ;;  %v9025_v38 = vpack.c.bf16 %v9023_v54, %v9024_v39  ;;  %v9028_v41 = vld [vmem:[#allocation25_spill] sm:$0xff]  ;;  %v9037_v36 = vld [vmem:[#allocation15_spill] sm:$0xff] }
 0x339   : > { %v993_v25 = vpop.permute.xlu0 %992  ;;  %4713 = vmatprep.subr.bf16.mxu1 %v9019_v56  ;;  %v9026_v5 = vpack.c.bf16 %v7989_v63, %v7981_v11  ;;  %1110 = vst.msk [vmem:[#allocation3 + $0x200] sm:$0xff] %vm311_vm0, %v1100_v13  ;;  %1115 = vst.msk [vmem:[#allocation3 + $0x228] sm:$0xff] %vm311_vm0, %v1100_v13  ;;  %v662_v14 = vmul.f32 %v8079_v17, %v642_v33  ;;  %v667_v35 = vmul.f32 %v8094_v0, %v642_v33  ;;  %v8449_v13 = vld [vmem:[%s8790_s1 + $0x24] ss:$16 sps:$4 sm:$0xff]   ;;  %v8482_v39 = vld [vmem:[%s8790_s1 + $0xc] ss:$16 sps:$4 sm:$0xff]  }
 0x33a   : > { %v1005_v9 = vsel %vm311_vm0, %v993_v25, %v995_v34  ;;  %v1004_v45 = vsel %vm311_vm0, %v991_v42, %v993_v25  ;;  %1995 = vrot.lane.b32.xlu1 %v8317_v47, %s5644_s29  ;;  %1480 = vrot.lane.b32.xlu0 %v1451_v2, %s5647_s19  ;;  %v9022_v47 = vpack.c.bf16 %v9020_v29, %v9021_v7  ;;  %v9033_v42 = vld [vmem:[#allocation26_spill] sm:$0xff]  ;;  %v9036_v2 = vld [vmem:[#allocation19_spill] sm:$0xff] }
 0x33b   : > { %4605 = vmatprep.subr.bf16.mxu0 %v1005_v9  ;;  %682 = vst.msk [vmem:[#allocation3 + $0xc0] sm:$0xff] %vm311_vm0, %v672_v28  ;;  %v1628_v34 = vpack.c.bf16 %v1616_v49, %v1610_v53  ;;  %v1781_v11 = vmul.f32 %v8214_v59, %v7965_v18  ;;  %v1787_v63 = vmul.f32 %v8214_v59, %v7975_v22  ;;  %v9034_v59 = vld [vmem:[#allocation23_spill] sm:$0xff] }
 0x33c   : > { %v1227_v23 = vpop.permute.xlu1 %1226  ;;  %4606 = vmatpush1.bf16.msra.mxu0 %v1004_v45  ;;  %4714 = vmatpush1.bf16.msra.mxu1 %v9022_v47  ;;  %v9029_v31 = vpack.c.bf16 %v9027_v51, %v9028_v41  ;;  %v9032_v43 = vpack.c.bf16 %v9030_v62, %v9031_v20  ;;  %v677_v17 = vpack.c.bf16 %v667_v35, %v662_v14  ;;  %v8441_v45 = vld [vmem:[%s8790_s1] ss:$16 sps:$4 sm:$0xff]  }
 0x33d   : > { %v1225_v50 = vpop.permute.xlu0 %1224  ;;  %1260 = vst.msk [vmem:[#allocation3 + $0x250] sm:$0xff] %vm311_vm0, %v1227_v23  ;;  %4607 = vmatprep.subr.bf16.mxu0 %v9025_v38  ;;  %4715 = vmatprep.subr.bf16.mxu1 %v9026_v5  ;;  %v1940_v0 = vmul.f32 %v8266_v4, %v7775_v40  ;;  %v1946_v24 = vmul.f32 %v8266_v4, %v7777_v61  ;;  %v8468_v28 = vld [vmem:[%s8790_s1 + $0x20] ss:$16 sps:$4 sm:$0xff]  }
 0x33e   : > { %v1241_v48 = vsel %vm311_vm0, %v1225_v50, %v1227_v23  ;;  %1492 = vrot.lane.b32.xlu1 %v1457_v32, %s5647_s19  ;;  %1651 = vrot.lane.b32.xlu0 %v1622_v15, %s5646_s17  ;;  %v1793_v44 = vpack.c.bf16 %v1775_v1, %v1769_v57  ;;  %v9035_v26 = vpack.c.bf16 %v9033_v42, %v9034_v59  ;;  %v9042_v57 = vld [vmem:[#allocation46_spill] sm:$0xff]  ;;  %v9050_v14 = vld [vmem:[#allocation31_spill] sm:$0xff] }
 0x33f   : > { %687 = vst.msk [vmem:[#allocation3 + $0xe8] sm:$0xff] %vm311_vm0, %v677_v17  ;;  %v1952_v40 = vmul.f32 %v8266_v4, %v7965_v18  ;;  %v1958_v61 = vmul.f32 %v8266_v4, %v7975_v22  ;;  %v1799_v25 = vpack.c.bf16 %v1787_v63, %v1781_v11  ;;  %v9038_v6 = vpack.c.bf16 %v9036_v2, %v9037_v36  ;;  %v9047_v15 = vld [vmem:[#allocation42_spill] sm:$0xff]  ;;  %v4893_v62 = vld [vmem:[%s8792_s3] sm:$0xff] }
 0x340   : > { %v1221_v12 = vpop.permute.xlu1 %1220  ;;  %4608 = vmatpush1.bf16.msra.mxu0 %v9029_v31  ;;  %4716 = vmatpush1.bf16.msra.mxu1 %v9032_v43  ;;  %v1964_v55 = vpack.c.bf16 %v1946_v24, %v1940_v0  ;;  %v9039_v32 = vpack.c.bf16 %v8075_v21, %v8072_v30  ;;  %v9040_v7 = vpack.c.bf16 %v8105_v27, %v8092_v19  ;;  %v9041_v21 = vld [vmem:[#allocation30_spill] sm:$0xff]  ;;  %v9044_v19 = vld [vmem:[#allocation29_spill] sm:$0xff]  ;;  %v4957_v42 = vld [vmem:[%s8793_s4] sm:$0xff] }
 0x341   : > { %v1223_v3 = vpop.permute.xlu0 %1222  ;;  %4609 = vmatprep.subr.bf16.mxu0 %v9035_v26  ;;  %4717 = vmatprep.subr.bf16.mxu1 %v1241_v48  ;;  %v1970_v8 = vpack.c.bf16 %v1958_v61, %v1952_v40  ;;  %v9045_v27 = vpack.c.bf16 %v8117_v37, %v9044_v19  ;;  %v9049_v48 = vld [vmem:[#allocation32_spill] sm:$0xff]  ;;  %v4895_v43 = vld [vmem:[%s8792_s3 + $0x10] sm:$0xff]  ;;  %v4896_v0 = vld [vmem:[%s8792_s3 + $0x18] sm:$0xff] }
 0x342   : > { %v1240_v60 = vsel %vm311_vm0, %v1223_v3, %v1225_v50  ;;  %v1239_v16 = vsel %vm311_vm0, %v1221_v12, %v1223_v3  ;;  %1663 = vrot.lane.b32.xlu1 %v1628_v34, %s5646_s17  ;;  %1822 = vrot.lane.b32.xlu0 %v1793_v44, %s5645_s15  ;;  %v9046_v50 = vld [vmem:[#allocation41_spill] sm:$0xff]  ;;  %v9051_v35 = vpack.c.bf16 %v9049_v48, %v9050_v14  ;;  %s5657_s17 = smov [#allocation11]  }
 0x343   : > { %v9048_v54 = vpack.c.bf16 %v9046_v50, %v9047_v15  ;;  %v4894_v31 = vld [vmem:[%s8792_s3 + $0x8] sm:$0xff]  ;;  %v4959_v61 = vld [vmem:[%s8793_s4 + $0x10] sm:$0xff] }
 0x344   : > { %v1235_v33 = vpop.permute.xlu1 %1234  ;;  %4610 = vmatpush1.bf16.msra.mxu0 %v9038_v6  ;;  %4718 = vmatpush1.bf16.msra.mxu1 %v1240_v60  ;;  %v4958_v26 = vld [vmem:[%s8793_s4 + $0x8] sm:$0xff] }
 0x345   : > { %v1219_v46 = vpop.permute.xlu0 %1218  ;;  %4611 = vmatprep.subr.bf16.mxu0 %v1239_v16 }
 0x346   : > { %v1238_v56 = vsel %vm311_vm0, %v1219_v46, %v1221_v12  ;;  %1834 = vrot.lane.b32.xlu1 %v1799_v25, %s5645_s15  ;;  %1993 = vrot.lane.b32.xlu0 %v1964_v55, %s5644_s29  ;;  %s5565_s15 = sshll.u32 %s5657_s17, 4  ;;  %s5566_s15 = int_to_ptr.vmem [resolvable:$false] %s5565_s15 }
 0x347   : > { %s5567_s19 = scalar_lea.vmem %s5566_s15, 5120  ;;  %p5568_p5 = scmp.lt.s32.totalorder %s8741_s7, %s5566_s15 }
 0x348   : > { %v1233_v18 = vpop.permute.xlu1 %1232  ;;  %4612 = vmatpush1.bf16.msra.mxu0 %v1238_v56  ;;  %p5569_p9 = scmp.lt.s32.totalorder %s5567_s19, %s5561_s27 }
 0x349   : > { %v1237_v22 = vpop.permute.xlu0 %1236  ;;  %v1244_v4 = vsel %vm311_vm0, %v1233_v18, %v1235_v33 }
 0x34a   : > { %v1245_v9 = vsel %vm311_vm0, %v1235_v33, %v1237_v22  ;;  %1265 = vst.msk [vmem:[#allocation3 + $0x278] sm:$0xff] %vm311_vm0, %v1237_v22  ;;  %2005 = vrot.lane.b32.xlu1 %v1970_v8, %s5644_s29  ;;  %4899 = vperm.xlu0 %5407, %v4893_v62   ;;  %v4960_v33 = vld [vmem:[%s8793_s4 + $0x18] sm:$0xff]  ;;  %p5570_p12 = por %p5569_p9, %p5568_p5 }
 0x34b   : > { %4719 = vmatprep.subr.bf16.mxu1 %v1245_v9 }
 0x34c   : > { %v1229_v58 = vpop.permute.xlu1 %1228  ;;  %4720 = vmatpush1.bf16.msra.mxu1 %v1244_v4  ;;  %p5571_p2 = pnand %p5570_p12, %p5564_p3 }
 0x34d   : > { %v1231_v52 = vpop.permute.xlu0 %1230  ;;  %4742 = vmatprep.subr.bf16.mxu1 %v8100_v10 }
 0x34e   : > { %v1243_v53 = vsel %vm311_vm0, %v1231_v52, %v1233_v18  ;;  %v1242_v49 = vsel %vm311_vm0, %v1229_v58, %v1231_v52  ;;  %4904 = vperm.xlu1 %5408, %v4894_v31   ;;  %4914 = vperm.xlu0 %5407, %v4896_v0  }
 0x34f   : > { %4613 = vmatprep.subr.bf16.mxu0 %v1243_v53  ;;  %4722 = vmatmul.mubr.bf16.vlgmr.msra.gmra.mrb[0].mxu1 %v8441_v45 }
 0x350   : > { %4614 = vmatpush1.bf16.msra.mxu0 %v1242_v49  ;;  %4743 = vmatpush1.bf16.msra.mxu1 %v9039_v32 }
 0x351   : > { %4744 = vmatprep.subr.bf16.mxu1 %v8100_v10  ;;  %4636 = vmatprep.subr.bf16.mxu0 %v9040_v7  ;;  %v9043_v10 = vpack.c.bf16 %v9041_v21, %v9042_v57 }
 0x352   : > { %v8452_v23 = vpop.permute.xlu1 %1478  ;;  %4731 = vmatprep.mubr.bf16.mxu1 %v8449_v13  ;;  %4909 = vperm.xlu1 %5408, %v4895_v43  }
 0x353   : > { %v1477_v29 = vpop.permute.xlu0 %1476  ;;  %4616 = vmatmul.mubr.bf16.vlgmr.msra.gmra.mrb[0].mxu0 %v8441_v45  ;;  %4968 = vperm.xlu0 %5407, %v4958_v26  }
 0x354   : > { %v1498_v47 = vsel %vm1494_vm5, %v1477_v29, %v8452_v23  ;;  %4745 = vmatpush1.bf16.msra.mxu1 %v9043_v10  ;;  %4637 = vmatpush1.bf16.msra.mxu0 %v9045_v27 }
 0x355   : > { %4746 = vmatprep.subr.bf16.mxu1 %v1498_v47  ;;  %4638 = vmatprep.subr.bf16.mxu0 %v9048_v54 }
 0x356   : > { %4625 = vmatprep.mubr.bf16.mxu0 %v8449_v13  ;;  %4963 = vperm.xlu1 %5408, %v4957_v42  }
 0x357   : > { %v1473_v30 = vpop.permute.xlu1 %1472  ;;  %v1475_v1 = vpop.permute.xlu0 %1474  ;;  %4732 = vmatmul.mubr.bf16.gmra.mrb[4].mxu1 %v8468_v28  ;;  %4978 = vperm.xlu0 %5407, %v4960_v33  }
 0x358   : > { %v1497_v38 = vsel %vm1494_vm5, %v1475_v1, %v1477_v29  ;;  %v1496_v5 = vsel %vm1494_vm5, %v1473_v30, %v1475_v1  ;;  %4639 = vmatpush1.bf16.msra.mxu0 %v9051_v35  ;;  %5172 = vmatprep.mubr.msk.bf16.mxu1 %vm4576_vm14, %v8482_v39 }
 0x359   : > { %4747 = vmatpush1.bf16.msra.mxu1 %v1497_v38  ;;  %4640 = vmatprep.subr.bf16.mxu0 %v1496_v5 }
 0x35a   : > { %4973 = vperm.xlu1 %5408, %v4959_v61  }
 0x35b   : > { %v1489_v37 = vpop.permute.xlu1 %1488  ;;  %v1471_v34 = vpop.permute.xlu0 %1470  ;;  %4626 = vmatmul.mubr.bf16.gmra.mrb[4].mxu0 %v8468_v28 }
 0x35c   : > { %v1495_v11 = vsel %vm1494_vm5, %v1471_v34, %v1473_v30  ;;  %5170 = vmatprep.mubr.msk.bf16.mxu0 %vm4576_vm14, %v8482_v39 }
 0x35d   : > { %4641 = vmatpush1.bf16.msra.mxu0 %v1495_v11 }
 0x35f   : > { %v1487_v63 = vpop.permute.xlu1 %1486  ;;  %v8497_v12 = vpop.permute.xlu0 %1490 }
 0x360   : > { %v1502_v51 = vsel %vm1494_vm5, %v1487_v63, %v1489_v37  ;;  %v1503_v41 = vsel %vm1494_vm5, %v1489_v37, %v8497_v12 }
 0x361   : > { %4748 = vmatprep.subr.bf16.mxu1 %v1503_v41 }
 0x362   : > { %4749 = vmatpush1.bf16.msra.mxu1 %v1502_v51 }
 0x363   : > { %v1483_v20 = vpop.permute.xlu1 %1482  ;;  %v1485_v17 = vpop.permute.xlu0 %1484 }
 0x364   : > { %v1501_v24 = vsel %vm1494_vm5, %v1485_v17, %v1487_v63  ;;  %v1500_v3 = vsel %vm1494_vm5, %v1483_v20, %v1485_v17 }
 0x365   : > { %4642 = vmatprep.subr.bf16.mxu0 %v1501_v24 }
 0x366   : > { %4643 = vmatpush1.bf16.msra.mxu0 %v1500_v3 }
 0x367   : > { %v8516_v44 = vpop.permute.xlu1 %1649  ;;  %v1648_v59 = vpop.permute.xlu0 %1647 }
 0x368   : > { %v1669_v60 = vsel %vm1665_vm4, %v1648_v59, %v8516_v44 }
 0x369   : > { %4750 = vmatprep.subr.bf16.mxu1 %v1669_v60 }
 0x36b   : > { %v1644_v16 = vpop.permute.xlu1 %1643  ;;  %v1646_v40 = vpop.permute.xlu0 %1645 }
 0x36c   : > { %v1668_v25 = vsel %vm1665_vm4, %v1646_v40, %v1648_v59  ;;  %v1667_v2 = vsel %vm1665_vm4, %v1644_v16, %v1646_v40 }
 0x36d   : > { %4644 = vmatprep.subr.bf16.mxu0 %v1667_v2  ;;  %4751 = vmatpush1.bf16.msra.mxu1 %v1668_v25  ;;  %v8575_v2 = vld [vmem:[%s8790_s1 + $0x8] ss:$16 sps:$4 sm:$0xff]  }
 0x36f   : > { %v1660_v36 = vpop.permute.xlu1 %1659  ;;  %v1642_v6 = vpop.permute.xlu0 %1641 }
 0x370   : > { %v1666_v46 = vsel %vm1665_vm4, %v1642_v6, %v1644_v16 }
 0x371   : > { %4645 = vmatpush1.bf16.msra.mxu0 %v1666_v46 }
 0x373   : > { %v1658_v55 = vpop.permute.xlu1 %1657  ;;  %v8535_v56 = vpop.permute.xlu0 %1661 }
 0x374   : > { %v1673_v18 = vsel %vm1665_vm4, %v1658_v55, %v1660_v36  ;;  %v1674_v8 = vsel %vm1665_vm4, %v1660_v36, %v8535_v56 }
 0x375   : > { %4752 = vmatprep.subr.bf16.mxu1 %v1674_v8 }
 0x376   : > { %4753 = vmatpush1.bf16.msra.mxu1 %v1673_v18  ;;  %v4022_v18 = vld [vmem:[#allocation3 + $0x2a0] sm:$0xff] }
 0x377   : > { %v1654_v22 = vpop.permute.xlu1 %1653  ;;  %v1656_v4 = vpop.permute.xlu0 %1655 }
 0x378   : > { %v1672_v9 = vsel %vm1665_vm4, %v1656_v4, %v1658_v55  ;;  %v1671_v58 = vsel %vm1665_vm4, %v1654_v22, %v1656_v4  ;;  %v9052_v55 = vmov 0  }
 0x379   : > { %4646 = vmatprep.subr.bf16.mxu0 %v1672_v9  ;;  %v3982_v9 = vld [vmem:[#allocation3 + $0x160] sm:$0xff] }
 0x37a   : > { %4647 = vmatpush1.bf16.msra.mxu0 %v1671_v58  ;;  %v8582_v58 = vld [vmem:[%s8790_s1 + $0x2c] ss:$16 sps:$4 sm:$0xff]  }
 0x380   : > { %v1819_v52 = vpop.permute.xlu0 %1818  ;;  %v8542_v53 = vpop.permute.xlu1 %1820 }
 0x381   : > { %v1840_v49 = vsel %vm1836_vm3, %v1819_v52, %v8542_v53 }
 0x382   : > { %4754 = vmatprep.subr.bf16.mxu1 %v1840_v49 }
 0x384   : > { %v1817_v32 = vpop.permute.xlu0 %1816 }
 0x385   : > { %v1839_v29 = vsel %vm1836_vm3, %v1817_v32, %v1819_v52 }
 0x386   : > { %4755 = vmatpush1.bf16.msra.mxu1 %v1839_v29 }
 0x38b   : > { %v1813_v7 = vpop.permute.xlu0 %1812 }
 0x38c   : > { %v1815_v47 = vpop.permute.xlu1 %1814 }
 0x38d   : > { %v1837_v30 = vsel %vm1836_vm3, %v1813_v7, %v1815_v47  ;;  %v1838_v21 = vsel %vm1836_vm3, %v1815_v47, %v1817_v32 }
 0x38e   : > { %4648 = vmatprep.subr.bf16.mxu0 %v1838_v21  ;;  %v3937_v21 = vld [vmem:[%s8790_s1 + $0x38] sm:$0xff] }
 0x38f   : > { %v8549_v57 = vpop.permute.xlu0 %1832  ;;  %4649 = vmatpush1.bf16.msra.mxu0 %v1837_v30  ;;  %v3935_v30 = vld [vmem:[%s8790_s1 + $0x28] sm:$0xff] }
 0x390   : > { %v1831_v10 = vpop.permute.xlu1 %1830 }
 0x391   : > { %v1845_v19 = vsel %vm1836_vm3, %v1831_v10, %v8549_v57 }
 0x392   : > { %4756 = vmatprep.subr.bf16.mxu1 %v1845_v19  ;;  %v4027_v19 = vld [vmem:[#allocation3 + $0x2c8] sm:$0xff] }
 0x393   : > { %v1827_v27 = vpop.permute.xlu0 %1826 }
 0x394   : > { %v1829_v1 = vpop.permute.xlu1 %1828 }
 0x395   : > { %v1843_v50 = vsel %vm1836_vm3, %v1827_v27, %v1829_v1  ;;  %v1844_v15 = vsel %vm1836_vm3, %v1829_v1, %v1831_v10  ;;  %v3942_v10 = vld [vmem:[#allocation3 + $0x20] sm:$0xff]  ;;  %v3987_v1 = vld [vmem:[#allocation3 + $0x188] sm:$0xff] }
 0x396   : > { %4650 = vmatprep.subr.bf16.mxu0 %v1843_v50  ;;  %4757 = vmatpush1.bf16.msra.mxu1 %v1844_v15 }
 0x398   : > { %v1825_v54 = vpop.permute.xlu1 %1824  ;;  %v1990_v38 = vpop.permute.xlu0 %1989 }
 0x399   : > { %v1842_v5 = vsel %vm1836_vm3, %v1825_v54, %v1827_v27  ;;  %v8605_v54 = vcombine.low %v3935_v30, %v3937_v21 }
 0x39a   : > { %4651 = vmatpush1.bf16.msra.mxu0 %v1842_v5  ;;  %v3947_v5 = vld [vmem:[#allocation3 + $0x48] sm:$0xff] }
 0x39c   : > { %v8556_v37 = vpop.permute.xlu1 %1991  ;;  %v1988_v48 = vpop.permute.xlu0 %1987 }
 0x39d   : > { %v2011_v14 = vsel %vm2007_vm2, %v1990_v38, %v8556_v37  ;;  %v5195_v35 = vpop.f32.mrb[8].mxu0  ;;  %v2010_v34 = vsel %vm2007_vm2, %v1988_v48, %v1990_v38 }
 0x39e   : > { %4758 = vmatprep.subr.bf16.mxu1 %v2011_v14  ;;  %v5196_v11 = vpop.f32.mrb[9].mxu0  ;;  %v5263_v63 = vpop.f32.mrb[8].mxu1 }
 0x39f   : > { %4759 = vmatpush1.bf16.msra.mxu1 %v2010_v34  ;;  %v5197_v51 = vadd.f32 %v5196_v11, %v5195_v35  ;;  %v5198_v41 = vpop.f32.mrb[10].mxu0  ;;  %v4523_v31 = vpop.f32.mrb[9].mxu1  ;;  %v3992_v34 = vld [vmem:[#allocation3 + $0x1b0] sm:$0xff] }
 0x3a0   : > { %v1986_v62 = vpop.permute.xlu1 %1985  ;;  %v5199_v20 = vpop.f32.mrb[11].mxu0 }
 0x3a1   : > { %v1984_v43 = vpop.permute.xlu0 %1983  ;;  %v2009_v17 = vsel %vm2007_vm2, %v1986_v62, %v1988_v48  ;;  %v5200_v0 = vadd.f32 %v5199_v20, %v5198_v41  ;;  %v8562_v24 = vadd.f32 %v5197_v51, %v4523_v31  ;;  %v5264_v3 = vpop.f32.mrb[10].mxu1  ;;  %v5474_v31 = vld [vmem:[%s8790_s1 + $0x4] ss:$16 sps:$4 sm:$0xff]   ;;  %v3957_v20 = vld [vmem:[#allocation3 + $0x98] sm:$0xff] }
 0x3a2   : > { %v2008_v42 = vsel %vm2007_vm2, %v1984_v43, %v1986_v62  ;;  %4652 = vmatprep.subr.bf16.mxu0 %v2009_v17  ;;  %v4526_v59 = vpop.f32.mrb[11].mxu1  ;;  %v4002_v62 = vld [vmem:[#allocation3 + $0x200] sm:$0xff] }
 0x3a3   : > { %4653 = vmatpush1.bf16.msra.mxu0 %v2008_v42  ;;  %v8565_v26 = vadd.f32 %v5200_v0, %v4526_v59  ;;  %v3962_v17 = vld [vmem:[#allocation3 + $0xc0] sm:$0xff]  ;;  %v4007_v0 = vld [vmem:[#allocation3 + $0x228] sm:$0xff] }
 0x3a4   : > { %v2002_v60 = vpop.permute.xlu1 %2001  ;;  %v3967_v42 = vld [vmem:[#allocation3 + $0xe8] sm:$0xff] }
 0x3a5   : > { %v8567_v16 = vpop.permute.xlu0 %2003 }
 0x3a6   : > { %v2016_v40 = vsel %vm2007_vm2, %v2002_v60, %v8567_v16 }
 0x3a7   : > { %4760 = vmatprep.subr.bf16.mxu1 %v2016_v40 }
 0x3a8   : > { %v2000_v61 = vpop.permute.xlu1 %1999 }
 0x3a9   : > { %v1998_v33 = vpop.permute.xlu0 %1997  ;;  %v2015_v25 = vsel %vm2007_vm2, %v2000_v61, %v2002_v60  ;;  %v5201_v36 = vpop.f32.mrb[12].mxu0  ;;  %v4012_v60 = vld [vmem:[#allocation3 + $0x250] sm:$0xff] }
 0x3aa   : > { %v2014_v6 = vsel %vm2007_vm2, %v1998_v33, %v2000_v61  ;;  %4761 = vmatpush1.bf16.msra.mxu1 %v2015_v25  ;;  %v5202_v46 = vpop.f32.mrb[13].mxu0  ;;  %v4017_v61 = vld [vmem:[#allocation3 + $0x278] sm:$0xff] }
 0x3ab   : > { %4654 = vmatprep.subr.bf16.mxu0 %v2014_v6  ;;  %4844 = vmatprep.subr.bf16.mxu1 %v9052_v55  ;;  %v5203_v8 = vadd.f32 %v5202_v46, %v5201_v36  ;;  %v5204_v22 = vpop.f32.mrb[14].mxu0 }
 0x3ac   : > { %v1996_v4 = vpop.permute.xlu1 %1995  ;;  %v5205_v52 = vpop.f32.mrb[15].mxu0 }
 0x3ad   : > { %v1481_v49 = vpop.permute.xlu0 %1480  ;;  %v2013_v32 = vsel %vm2007_vm2, %v1996_v4, %v1998_v33  ;;  %4775 = vmatmul.mubr.bf16.vlgmr.msra.gmra.mrb[0].mxu1 %v8575_v2  ;;  %v8586_v29 = vadd.f32 %v5263_v63, %v5203_v8  ;;  %v5206_v7 = vadd.f32 %v5205_v52, %v5204_v22  ;;  %v3977_v33 = vld [vmem:[#allocation3 + $0x138] sm:$0xff] }
 0x3ae   : > { %v1499_v47 = vsel %vm1494_vm5, %v8452_v23, %v1481_v49  ;;  %4655 = vmatpush1.bf16.msra.mxu0 %v2013_v32  ;;  %4845 = vmatpush1.bf16.msra.mxu1 %v4022_v18 }
 0x3af   : > { %1519 = vst.msk [vmem:[#allocation3 + $0x2f0] sm:$0xff] %vm311_vm0, %v1499_v47  ;;  %5217 = vmatprep.subr.bf16.mxu0 %v3982_v9  ;;  %4846 = vmatprep.subr.bf16.mxu1 %v9052_v55  ;;  %v8598_v27 = vadd.f32 %v5264_v3, %v5206_v7 }
 0x3b0   : > { %v1493_v23 = vpop.permute.xlu1 %1492  ;;  %5173 = vmatprep.mubr.msk.bf16.mxu1 %vm4576_vm14, %v8582_v58 }
 0x3b1   : > { %v1652_v50 = vpop.permute.xlu0 %1651  ;;  %v1504_v15 = vsel %vm1494_vm5, %v8497_v12, %v1493_v23  ;;  %4669 = vmatmul.mubr.bf16.vlgmr.msra.gmra.mrb[0].mxu0 %v8575_v2 }
 0x3b2   : > { %v1670_v38 = vsel %vm1665_vm4, %v8516_v44, %v1652_v50  ;;  %1524 = vst.msk [vmem:[#allocation3 + $0x318] sm:$0xff] %vm311_vm0, %v1504_v15  ;;  %5218 = vmatpush3.bf16.msra.mxu0 %v3942_v10  ;;  %4847 = vmatpush1.bf16.msra.mxu1 %v4027_v19 }
 0x3b3   : > { %1690 = vst.msk [vmem:[#allocation3 + $0x340] sm:$0xff] %vm311_vm0, %v1670_v38  ;;  %5219 = vmatprep.subr.bf16.mxu0 %v3987_v1  ;;  %4848 = vmatprep.subr.bf16.mxu1 %v9052_v55 }
 0x3b4   : > { %v1664_v48 = vpop.permute.xlu1 %1663  ;;  %5171 = vmatprep.mubr.msk.bf16.mxu0 %vm4576_vm14, %v8582_v58 }
 0x3b5   : > { %v1823_v12 = vpop.permute.xlu0 %1822  ;;  %v1675_v14 = vsel %vm1665_vm4, %v8535_v56, %v1664_v48  ;;  %4785 = vmatmul.mubr.bf16.gmra.mrb[4].mxu1 %v8605_v54 }
 0x3b6   : > { %v1841_v44 = vsel %vm1836_vm3, %v8542_v53, %v1823_v12  ;;  %1695 = vst.msk [vmem:[#allocation3 + $0x368] sm:$0xff] %vm311_vm0, %v1675_v14  ;;  %5220 = vmatpush3.bf16.msra.mxu0 %v3947_v5  ;;  %v4032_v35 = vld [vmem:[#allocation3 + $0x2f0] sm:$0xff]  ;;  %5174 = vmatprep.mubr.msk.bf16.mxu1 %vm4576_vm14, %v8482_v39  ;;  %v3997_v39 = vld [vmem:[#allocation3 + $0x1d8] sm:$0xff] }
 0x3b7   : > { %1861 = vst.msk [vmem:[#allocation3 + $0x390] sm:$0xff] %vm311_vm0, %v1841_v44  ;;  %4849 = vmatpush1.bf16.msra.mxu1 %v4032_v35  ;;  %5221 = vmatprep.subr.bf16.mxu0 %v3992_v34  ;;  %v3952_v53 = vld [vmem:[#allocation3 + $0x70] sm:$0xff] }
 0x3b8   : > { %v1835_v11 = vpop.permute.xlu1 %1834  ;;  %4850 = vmatprep.subr.bf16.mxu1 %v9052_v55 }
 0x3b9   : > { %v1994_v56 = vpop.permute.xlu0 %1993  ;;  %v1846_v63 = vsel %vm1836_vm3, %v8549_v57, %v1835_v11  ;;  %4679 = vmatmul.mubr.bf16.gmra.mrb[4].mxu0 %v8605_v54  ;;  %v4037_v51 = vld [vmem:[#allocation3 + $0x318] sm:$0xff] }
 0x3ba   : > { %v2012_v41 = vsel %vm2007_vm2, %v8556_v37, %v1994_v56  ;;  %1866 = vst.msk [vmem:[#allocation3 + $0x3b8] sm:$0xff] %vm311_vm0, %v1846_v63  ;;  %5222 = vmatpush3.bf16.msra.mxu0 %v3952_v53  ;;  %4827 = vmatprep.mubr.bf16.mxu0 %v5474_v31  ;;  %v4042_v43 = vld [vmem:[#allocation3 + $0x340] sm:$0xff] }
 0x3bb   : > { %2032 = vst.msk [vmem:[#allocation3 + $0x3e0] sm:$0xff] %vm311_vm0, %v2012_v41  ;;  %4851 = vmatpush1.bf16.msra.mxu1 %v4037_v51  ;;  %5223 = vmatprep.subr.bf16.mxu0 %v3997_v39 }
 0x3bc   : > { %v2006_v57 = vpop.permute.xlu1 %2005  ;;  %4852 = vmatprep.subr.bf16.mxu1 %v9052_v55 }
 0x3bd   : > { %v2017_v37 = vsel %vm2007_vm2, %v8567_v16, %v2006_v57  ;;  %v4047_v3 = vld [vmem:[#allocation3 + $0x368] sm:$0xff]  ;;  %v3972_v16 = vld [vmem:[#allocation3 + $0x110] sm:$0xff] }
 0x3be   : > { %2037 = vst.msk [vmem:[#allocation3 + $0x408] sm:$0xff] %vm311_vm0, %v2017_v37  ;;  %5224 = vmatpush3.bf16.msra.mxu0 %v3957_v20  ;;  %v4052_v59 = vld [vmem:[#allocation3 + $0x390] sm:$0xff] }
 0x3bf   : > { %4853 = vmatpush1.bf16.msra.mxu1 %v4042_v43  ;;  %5225 = vmatprep.subr.bf16.mxu0 %v4002_v62 }
 0x3c0   : > { %4854 = vmatprep.subr.bf16.mxu1 %v9052_v55 }
 0x3c1   : > { %v4057_v40 = vld [vmem:[#allocation3 + $0x3b8] sm:$0xff] }
 0x3c2   : > { %5226 = vmatpush3.bf16.msra.mxu0 %v3962_v17  ;;  %v4062_v25 = vld [vmem:[#allocation3 + $0x3e0] sm:$0xff] }
 0x3c3   : > { %4855 = vmatpush1.bf16.msra.mxu1 %v4047_v3  ;;  %5227 = vmatprep.subr.bf16.mxu0 %v4007_v0 }
 0x3c4   : > { %4856 = vmatprep.subr.bf16.mxu1 %v9052_v55 }
 0x3c5   : > { %v4067_v36 = vld [vmem:[#allocation3 + $0x408] sm:$0xff] }
 0x3c6   : > { %5228 = vmatpush3.bf16.msra.mxu0 %v3967_v42 }
 0x3c7   : > { %4857 = vmatpush1.bf16.msra.mxu1 %v4052_v59  ;;  %5229 = vmatprep.subr.bf16.mxu0 %v4012_v60 }
 0x3c8   : > { %4858 = vmatprep.subr.bf16.mxu1 %v9052_v55 }
 0x3c9   : > { %v8652_v46 = vpop.permute.xlu0 %4899 }
 0x3ca   : > { %5230 = vmatpush3.bf16.msra.mxu0 %v3972_v16 }
 0x3cb   : > { %4859 = vmatpush1.bf16.msra.mxu1 %v4057_v40  ;;  %5231 = vmatprep.subr.bf16.mxu0 %v4017_v61 }
 0x3cc   : > { %4860 = vmatprep.subr.bf16.mxu1 %v9052_v55 }
 0x3cd   : > { %v8650_v6 = vpop.permute.xlu1 %4904 }
 0x3ce   : > { %5232 = vmatpush3.bf16.msra.mxu0 %v3977_v33 }
 0x3cf   : > { %4861 = vmatpush1.bf16.msra.mxu1 %v4062_v25 }
 0x3d0   : > { %4862 = vmatprep.subr.bf16.mxu1 %v9052_v55 }
 0x3d1   : > { %4828 = vmatmul.mubr.bf16.vlgmr.msra.gmra.mrb[16].mxu0 %v8441_v45  ;;  %v8654_v55 = vpop.permute.xlu1 %4909  ;;  %v8656_v45 = vpop.permute.xlu0 %4914 }
 0x3d2   : > { %4835 = vmatprep.mubr.bf16.mxu0 %v8449_v13 }
 0x3d3   : > { %4863 = vmatpush1.bf16.msra.mxu1 %v4067_v36 }
 0x3d5   : > { %v8658_v13 = vpop.permute.xlu1 %4963 }
 0x3d6   : > { %4877 = vmatmul.mubr.bf16.vlgmr.msra.gmra.mrb[12].mxu1 %v8575_v2 }
 0x3d7   : > { %5175 = vmatprep.mubr.msk.bf16.mxu1 %vm4576_vm14, %v8582_v58 }
 0x3d9   : > { %4836 = vmatmul.mubr.bf16.gmra.mrb[20].mxu0 %v8468_v28  ;;  %v8662_v28 = vpop.permute.xlu0 %4968  ;;  %v8683_v35 = vpop.permute.xlu1 %4973 }
 0x3dd   : > { %v8691_v31 = vpop.permute.xlu0 %4978 }
 0x3de   : > { %4885 = vmatmul.mubr.bf16.gmra.mrb[16].mxu1 %v8605_v54 }
 0x480   : > { %v4776_v18 = vpop.f32.mrb[0].mxu1 }
 0x481   : > { %v4919_v2 = vadd.f32 %v8652_v46, %v4776_v18  ;;  %v4778_v8 = vpop.f32.mrb[1].mxu1 }
 0x482   : > { %v4920_v22 = vadd.f32 %v8652_v46, %v4778_v8  ;;  %v4780_v4 = vpop.f32.mrb[2].mxu1 }
 0x483   : > { %vm4939_vm15 = vcmp.ge.f32.partialorder %v4919_v2, 0.0  ;;  %v4924_v9 = vadd.f32 %v8650_v6, %v4780_v4  ;;  %v4983_v58 = vmul.f32 %v8658_v13, %v4919_v2  ;;  %v4782_v52 = vpop.f32.mrb[3].mxu1 }
 0x484   : > { %vm4940_vm1 = vcmp.ge.f32.partialorder %v4920_v22, 0.0  ;;  %v4984_v49 = vmul.f32 %v8658_v13, %v4920_v22  ;;  %v4925_v32 = vadd.f32 %v8650_v6, %v4782_v52  ;;  %v4670_v7 = vpop.f32.mrb[0].mxu0 }
 0x485   : > { %vm4944_vm2 = vcmp.ge.f32.partialorder %v4924_v9, 0.0  ;;  %v5003_v47 = vsel %vm4939_vm15, %v4919_v2, %v4983_v58  ;;  %v4988_v30 = vmul.f32 %v8662_v28, %v4924_v9  ;;  %v4917_v21 = vadd.f32 %v8652_v46, %v4670_v7  ;;  %v4672_v10 = vpop.f32.mrb[1].mxu0 }
 0x486   : > { %v5004_v19 = vsel %vm4940_vm1, %v4920_v22, %v4984_v49  ;;  %5023 = vst [vmem:[%s8672_s11 + $0x10] sm:$0xff] %v5003_v47  ;;  %vm4945_vm3 = vcmp.ge.f32.partialorder %v4925_v32, 0.0  ;;  %v4989_v23 = vmul.f32 %v8662_v28, %v4925_v32  ;;  %v4918_v1 = vadd.f32 %v8652_v46, %v4672_v10  ;;  %v4674_v50 = vpop.f32.mrb[2].mxu0 }
 0x487   : > { %5024 = vst [vmem:[%s8672_s11 + $0x18] sm:$0xff] %v5004_v19  ;;  %v5008_v15 = vsel %vm4944_vm2, %v4924_v9, %v4988_v30  ;;  %vm4937_vm4 = vcmp.ge.f32.partialorder %v4917_v21, 0.0  ;;  %v4981_v54 = vmul.f32 %v8658_v13, %v4917_v21  ;;  %v4922_v38 = vadd.f32 %v8650_v6, %v4674_v50  ;;  %v4676_v5 = vpop.f32.mrb[3].mxu0 }
 0x488   : > { %v5009_v48 = vsel %vm4945_vm3, %v4925_v32, %v4989_v23  ;;  %5028 = vst [vmem:[%s8672_s11 + $0x38] sm:$0xff] %v5008_v15  ;;  %vm4938_vm5 = vcmp.ge.f32.partialorder %v4918_v1, 0.0  ;;  %v4982_v12 = vmul.f32 %v8658_v13, %v4918_v1  ;;  %v4923_v14 = vadd.f32 %v8650_v6, %v4676_v5  ;;  %v4786_v44 = vpop.f32.mrb[4].mxu1 }
 0x489   : > { %5029 = vst [vmem:[%s8672_s11 + $0x40] sm:$0xff] %v5009_v48  ;;  %v5001_v34 = vsel %vm4937_vm4, %v4917_v21, %v4981_v54  ;;  %vm4942_vm6 = vcmp.ge.f32.partialorder %v4922_v38, 0.0  ;;  %v4986_v11 = vmul.f32 %v8662_v28, %v4922_v38  ;;  %v4929_v56 = vadd.f32 %v8654_v55, %v4786_v44  ;;  %v4788_v63 = vpop.f32.mrb[5].mxu1 }
 0x48a   : > { %5021 = vst [vmem:[%s8672_s11] sm:$0xff] %v5001_v34  ;;  %v5002_v53 = vsel %vm4938_vm5, %v4918_v1, %v4982_v12  ;;  %vm4943_vm7 = vcmp.ge.f32.partialorder %v4923_v14, 0.0  ;;  %v4987_v51 = vmul.f32 %v8662_v28, %v4923_v14  ;;  %v4930_v41 = vadd.f32 %v8654_v55, %v4788_v63  ;;  %v4790_v39 = vpop.f32.mrb[6].mxu1 }
 0x48b   : > { %5022 = vst [vmem:[%s8672_s11 + $0x8] sm:$0xff] %v5002_v53  ;;  %v5006_v57 = vsel %vm4942_vm6, %v4922_v38, %v4986_v11  ;;  %vm4949_vm8 = vcmp.ge.f32.partialorder %v4929_v56, 0.0  ;;  %v4934_v62 = vadd.f32 %v8656_v45, %v4790_v39  ;;  %v4993_v37 = vmul.f32 %v8683_v35, %v4929_v56  ;;  %v4792_v20 = vpop.f32.mrb[7].mxu1 }
 0x48c   : > { %5026 = vst [vmem:[%s8672_s11 + $0x28] sm:$0xff] %v5006_v57  ;;  %v5007_v43 = vsel %vm4943_vm7, %v4923_v14, %v4987_v51  ;;  %vm4950_vm9 = vcmp.ge.f32.partialorder %v4930_v41, 0.0  ;;  %v4994_v17 = vmul.f32 %v8683_v35, %v4930_v41  ;;  %v4935_v0 = vadd.f32 %v8656_v45, %v4792_v20  ;;  %v4680_v3 = vpop.f32.mrb[4].mxu0 }
 0x48d   : > { %5027 = vst [vmem:[%s8672_s11 + $0x30] sm:$0xff] %v5007_v43  ;;  %vm4954_vm10 = vcmp.ge.f32.partialorder %v4934_v62, 0.0  ;;  %v5013_v42 = vsel %vm4949_vm8, %v4929_v56, %v4993_v37  ;;  %v4998_v59 = vmul.f32 %v8691_v31, %v4934_v62  ;;  %v4927_v60 = vadd.f32 %v8654_v55, %v4680_v3  ;;  %v4682_v16 = vpop.f32.mrb[5].mxu0 }
 0x48e   : > { %v5014_v40 = vsel %vm4950_vm9, %v4930_v41, %v4994_v17  ;;  %5033 = vst [vmem:[%s8672_s11 + $0x60] sm:$0xff] %v5013_v42  ;;  %vm4955_vm11 = vcmp.ge.f32.partialorder %v4935_v0, 0.0  ;;  %v4999_v61 = vmul.f32 %v8691_v31, %v4935_v0  ;;  %v4928_v33 = vadd.f32 %v8654_v55, %v4682_v16  ;;  %v4684_v25 = vpop.f32.mrb[6].mxu0 }
 0x48f   : > { %5034 = vst [vmem:[%s8672_s11 + $0x68] sm:$0xff] %v5014_v40  ;;  %v5018_v36 = vsel %vm4954_vm10, %v4934_v62, %v4998_v59  ;;  %vm4947_vm12 = vcmp.ge.f32.partialorder %v4927_v60, 0.0  ;;  %v4991_v18 = vmul.f32 %v8683_v35, %v4927_v60  ;;  %v4932_v2 = vadd.f32 %v8656_v45, %v4684_v25  ;;  %v4686_v8 = vpop.f32.mrb[7].mxu0 }
 0x490   : > { %v5019_v22 = vsel %vm4955_vm11, %v4935_v0, %v4999_v61  ;;  %5038 = vst [vmem:[%s8672_s11 + $0x88] sm:$0xff] %v5018_v36  ;;  %vm4948_vm13 = vcmp.ge.f32.partialorder %v4928_v33, 0.0  ;;  %v4992_v4 = vmul.f32 %v8683_v35, %v4928_v33  ;;  %v4933_v9 = vadd.f32 %v8656_v45, %v4686_v8 }
 0x491   : > { %5039 = vst [vmem:[%s8672_s11 + $0x90] sm:$0xff] %v5019_v22  ;;  %v5011_v58 = vsel %vm4947_vm12, %v4927_v60, %v4991_v18  ;;  %vm4952_vm14 = vcmp.ge.f32.partialorder %v4932_v2, 0.0  ;;  %v4996_v52 = vmul.f32 %v8691_v31, %v4932_v2 }
 0x492   : > { %5031 = vst [vmem:[%s8672_s11 + $0x50] sm:$0xff] %v5011_v58  ;;  %v5012_v49 = vsel %vm4948_vm13, %v4928_v33, %v4992_v4  ;;  %vm4953_vm15 = vcmp.ge.f32.partialorder %v4933_v9, 0.0  ;;  %v4997_v32 = vmul.f32 %v8691_v31, %v4933_v9 }
 0x493   : > { %5032 = vst [vmem:[%s8672_s11 + $0x58] sm:$0xff] %v5012_v49  ;;  %v5016_v7 = vsel %vm4952_vm14, %v4932_v2, %v4996_v52 }
 0x494   : > { %5036 = vst [vmem:[%s8672_s11 + $0x78] sm:$0xff] %v5016_v7  ;;  %v5017_v47 = vsel %vm4953_vm15, %v4933_v9, %v4997_v32 }
 0x495   : > { %5037 = vst [vmem:[%s8672_s11 + $0x80] sm:$0xff] %v5017_v47 }
 0x4a4   : > { %v5233_v30 = vpop.f32.mrb[16].mxu0 }
 0x4a5   : > { %v5234_v21 = vpop.f32.mrb[17].mxu0 }
 0x4a6   : > { %v5235_v10 = vadd.f32 %v5234_v21, %v5233_v30  ;;  %v5236_v19 = vpop.f32.mrb[18].mxu0 }
 0x4a7   : > { %v5237_v23 = vpop.f32.mrb[19].mxu0 }
 0x4a8   : > { %v5238_v1 = vadd.f32 %v5237_v23, %v5236_v19  ;;  %v4830_v50 = vadd.f32 %v5235_v10, %v8562_v24 }
 0x4a9   : > { %v4878_v15 = vpop.f32.mrb[12].mxu1 }
 0x4aa   : > { %v4879_v54 = vadd.f32 %v4878_v15, %v4830_v50  ;;  %v4880_v38 = vpop.f32.mrb[13].mxu1  ;;  %v4833_v5 = vadd.f32 %v5238_v1, %v8565_v26 }
 0x4ab   : > { %v4881_v48 = vpop.f32.mrb[14].mxu1 }
 0x4ac   : > { %v4921_v12 = vadd.f32 %v8652_v46, %v4879_v54  ;;  %v4882_v14 = vadd.f32 %v4881_v48, %v4833_v5  ;;  %v4883_v44 = vpop.f32.mrb[15].mxu1  ;;  %v5239_v34 = vpop.f32.mrb[20].mxu0 }
 0x4ad   : > { %v5240_v11 = vpop.f32.mrb[21].mxu0 }
 0x4ae   : > { %vm4941_vm1 = vcmp.ge.f32.partialorder %v4921_v12, 0.0  ;;  %v4985_v56 = vmul.f32 %v8658_v13, %v4921_v12  ;;  %v4926_v63 = vadd.f32 %v8650_v6, %v4882_v14  ;;  %v5241_v24 = vadd.f32 %v5240_v11, %v5239_v34  ;;  %v5242_v53 = vpop.f32.mrb[22].mxu0 }
 0x4af   : > { %v5243_v51 = vpop.f32.mrb[23].mxu0 }
 0x4b0   : > { %v5005_v41 = vsel %vm4941_vm1, %v4921_v12, %v4985_v56  ;;  %vm4946_vm2 = vcmp.ge.f32.partialorder %v4926_v63, 0.0  ;;  %v4990_v26 = vmul.f32 %v8662_v28, %v4926_v63  ;;  %v5244_v46 = vadd.f32 %v5243_v51, %v5242_v53 }
 0x4b1   : > { %5025 = vst.msk [vmem:[%s8672_s11 + $0x20] sm:$0xff] %vm311_vm0, %v5005_v41  ;;  %v4838_v39 = vadd.f32 %v5241_v24, %v8586_v29  ;;  %v4886_v57 = vpop.f32.mrb[16].mxu1 }
 0x4b2   : > { %v5010_v62 = vsel %vm4946_vm2, %v4926_v63, %v4990_v26  ;;  %v4888_v37 = vpop.f32.mrb[17].mxu1  ;;  %v4841_v13 = vadd.f32 %v5244_v46, %v8598_v27 }
 0x4b3   : > { %5030 = vst.msk [vmem:[%s8672_s11 + $0x48] sm:$0xff] %vm311_vm0, %v5010_v62  ;;  %v4887_v6 = vadd.f32 %v4886_v57, %v4838_v39  ;;  %v4889_v20 = vpop.f32.mrb[18].mxu1 }
 0x4b4   : > { %v4890_v43 = vadd.f32 %v4889_v20, %v4841_v13  ;;  %v4891_v28 = vpop.f32.mrb[19].mxu1 }
 0x4b5   : > { %v4931_v17 = vadd.f32 %v8654_v55, %v4887_v6 }
 0x4b6   : > { %v4936_v29 = vadd.f32 %v8656_v45, %v4890_v43 }
 0x4b7   : > { %vm4951_vm3 = vcmp.ge.f32.partialorder %v4931_v17, 0.0  ;;  %v4995_v0 = vmul.f32 %v8683_v35, %v4931_v17 }
 0x4b8   : > { %vm4956_vm4 = vcmp.ge.f32.partialorder %v4936_v29, 0.0  ;;  %v5000_v27 = vmul.f32 %v8691_v31, %v4936_v29 }
 0x4b9   : > { %v5015_v3 = vsel %vm4951_vm3, %v4931_v17, %v4995_v0 }
 0x4ba   : > { %5035 = vst.msk [vmem:[%s8672_s11 + $0x70] sm:$0xff] %vm311_vm0, %v5015_v3  ;;  %v5020_v55 = vsel %vm4956_vm4, %v4936_v29, %v5000_v27 }
 0x4bb   : > { %5040 = vst.msk [vmem:[%s8672_s11 + $0x98] sm:$0xff] %vm311_vm0, %v5020_v55 }
 0x4bc   : > { %5574 = shalt.err (!%p5571_p2)
}
 0x4bd   : > { %s5575_s29 = scalar_lea.hbm %s8739_s14, 2560  ;;  %s5579_s26 = scalar_lea.hbm %s8795_s6, 5120 }
 0x4be   : > { %p5576_p13 = scmp.ne.s32.totalorder %s8739_s14, %s5575_s29  ;;  %p5580_p4 = scmp.lt.u32.totalorder %s8739_s14, %s8795_s6 }
 0x4bf   : > { %p5581_p7 = scmp.lt.u32.totalorder %s5579_s26, %s5575_s29  ;;  %p5583_p11 = scmp.lt.u32.totalorder %s5575_s29, %s8739_s14 }
 0x4c0   : > { %p5577_p6 = pnand %p5576_p13, %p9053_p0 }
 0x4c1   : > { %p5582_p8 = por %p5581_p7, %p5580_p4 }
 0x4c2   : > { %p5578_p10 = pneg %p5577_p6 }
 0x4c3   : > { %p5584_p1 = por %p5583_p11, %p5582_p8 }
 0x4c5   : > { %p5585_p3 = pnand %p5584_p1, %p5578_p10 }
 0x4c7   : > { %5588 = shalt.err (!%p5585_p3)
}
 0x4c8   : > { %s5658_s8 = smov 640   ;;  %s5659_s20 = smov 40  }
 0x4c9   : > { %5327 = dma.vmem_to_hbm [thread:$0]  (%p9053_p0), %s8741_s7, 2560, %s8739_s14, %s5042_s25, %s5658_s8, %s5658_s8, %s5659_s20  }
 0x4ca PF: > { %s5070_s27 = sand.u32 1, %s5619_s21   ;;  %p9054_p5 = scmp.ne.s32.totalorder %s8878_s28, 0 }
 0x4cb   : > { %p9055_p9 = scmp.ge.s32.totalorder %s5631_s24, 2  ;;  %s5071_s17 = scalar_lea.sflag [#allocation7], %s5070_s27 }
 0x4cd   : > { %p5341_p12 = pnand %p9055_p9, %p9054_p5 }
 0x4cf   : > { %5614 = dma.done.wait (!%p5341_p12), %s5071_s17, 2560  }
 0x4d0   : > { %5616 = vsyncadd (!%p5341_p12), %s5071_s17, 4294964736  ;;  %p20_p2 = scmp.ge.s32.totalorder %s5806_s30, 4   ;;  %s9056_s21 = smov %s5623_s22 }
 0x4d1   : > { %s9057_s22 = smov %s5627_s23  ;;  %s9058_s23 = smov %s5815_s12 }
 0x4d2   : > { %s9059_s24 = smov %s5806_s30  ;;  %22 = sbr.rel (!%p20_p2) target bundleno = 6 (0x6), region = 120 }
 0x4d9   :  { %5076 = vsyncpa [#allocation6], 1 }
 0x4da   :  { %5078 = vsyncpa [#allocation6 + $0x1], 1 }
 0x4db   :  { %5079 = vsyncpa [#allocation9], 1 }
 0x4dc   :  { %5080 = vsyncpa [#allocation7], 1 }
 0x4dd   :  { %5082 = vsyncpa [#allocation7 + $0x1], 1 }

</bundles_post_ra>
